<compile_context>
chip_gen: v7x
topology: tpu7x:2x2x1
jax: 0.10.0
libtpu: 0.0.40
codegen_flags: <defaults>
</compile_context>

<pallas_src>
import jax
import jax.numpy as jnp
from jax.experimental import pallas as pl
from jax.experimental.pallas import tpu as pltpu


def _compiler_params(dims):
    # Small compat shim: recent jax uses pltpu.CompilerParams.
    cp = getattr(pltpu, "CompilerParams", None) or getattr(pltpu, "TPUCompilerParams")
    return cp(dimension_semantics=dims)


# ---------------------------------------------------------------------------
# Kernel 1: fused Conv (im2col GEMM) + bias + ReLU + 2x2 MaxPool + BatchNorm
# ---------------------------------------------------------------------------
def _conv_pool_bn_kernel(cols_ref, w_ref, b_ref, scale_ref, shift_ref, o_ref):
    """cols_ref: (1, 2, 2, P, KKC) bf16 -- im2col patches grouped by 2x2-pool parity
       w_ref:    (KKC, 128)       bf16 -- conv weight, Cout zero-padded to 128 lanes
       b/scale/shift: (1, 128)    f32  -- bias and folded BatchNorm
       o_ref:    (1, P, 128)      bf16 -- pooled + BN'd activations
    """
    w = w_ref[...]
    y00 = jnp.dot(cols_ref[0, 0, 0], w, preferred_element_type=jnp.float32)
    y01 = jnp.dot(cols_ref[0, 0, 1], w, preferred_element_type=jnp.float32)
    y10 = jnp.dot(cols_ref[0, 1, 0], w, preferred_element_type=jnp.float32)
    y11 = jnp.dot(cols_ref[0, 1, 1], w, preferred_element_type=jnp.float32)
    # bias-add and ReLU commute with max, so pool first (fewer VPU ops).
    m = jnp.maximum(jnp.maximum(y00, y01), jnp.maximum(y10, y11))
    y = jnp.maximum(m + b_ref[...], 0.0)
    o_ref[0] = (y * scale_ref[...] + shift_ref[...]).astype(o_ref.dtype)


def conv_pool_bn(cols, w, b, scale, shift):
    N, _, _, P, KKC = cols.shape
    C = w.shape[1]                                     # 128 (lane-padded Cout)
    return pl.pallas_call(
        _conv_pool_bn_kernel,
        out_shape=jax.ShapeDtypeStruct((N, P, C), jnp.bfloat16),
        grid=(N,),
        in_specs=[
            pl.BlockSpec((1, 2, 2, P, KKC), lambda n: (n, 0, 0, 0, 0)),
            pl.BlockSpec((KKC, C), lambda n: (0, 0)),
            pl.BlockSpec((1, C), lambda n: (0, 0)),
            pl.BlockSpec((1, C), lambda n: (0, 0)),
            pl.BlockSpec((1, C), lambda n: (0, 0)),
        ],
        out_specs=pl.BlockSpec((1, P, C), lambda n: (n, 0, 0)),
        compiler_params=_compiler_params(("parallel",)),
    )(cols, w, b, scale, shift)


# ---------------------------------------------------------------------------
# Kernel 2: fused fc1(+ReLU+BN) + fc2(+ReLU+BN) + fc3 — intermediates stay in VMEM
# ---------------------------------------------------------------------------
def _fc_fused_kernel(x_ref, w1_ref, b1_ref, s1_ref, t1_ref,
                     w2_ref, b2_ref, s2_ref, t2_ref,
                     w3_ref, b3_ref, o_ref):
    a = jnp.dot(x_ref[...], w1_ref[...], preferred_element_type=jnp.float32)
    a = jnp.maximum(a + b1_ref[...], 0.0) * s1_ref[...] + t1_ref[...]
    a = jnp.dot(a.astype(jnp.bfloat16), w2_ref[...], preferred_element_type=jnp.float32)
    a = jnp.maximum(a + b2_ref[...], 0.0) * s2_ref[...] + t2_ref[...]
    a = jnp.dot(a.astype(jnp.bfloat16), w3_ref[...], preferred_element_type=jnp.float32)
    o_ref[...] = a + b3_ref[...]


def fc_fused(x, w1, b1, s1, t1, w2, b2, s2, t2, w3, b3, *, block_m=128):
    M, K1 = x.shape
    N3 = w3.shape[1]
    tm = M if M < block_m else block_m                 # row tile (full batch if tiny)

    def _full(arr):
        nd = arr.ndim
        return pl.BlockSpec(arr.shape, lambda i: (0,) * nd)

    return pl.pallas_call(
        _fc_fused_kernel,
        out_shape=jax.ShapeDtypeStruct((M, N3), jnp.float32),
        grid=(pl.cdiv(M, tm),),
        in_specs=[
            pl.BlockSpec((tm, K1), lambda i: (i, 0)),
            _full(w1), _full(b1), _full(s1), _full(t1),
            _full(w2), _full(b2), _full(s2), _full(t2),
            _full(w3), _full(b3),
        ],
        out_specs=pl.BlockSpec((tm, N3), lambda i: (i, 0)),
        compiler_params=_compiler_params(("parallel",)),
    )(x, w1, b1, s1, t1, w2, b2, s2, t2, w3, b3)


# ---------------------------------------------------------------------------
# Glue: im2col grouped by pooling parity, parameters, forward pass
# ---------------------------------------------------------------------------
def im2col_pool_parity(x, k, pad):
    """x: (N,H,W,C) -> (N, 2, 2, (Ho//2)*(Wo//2), k*k*C).

    Axis 1/2 are the (h, w) parities of the 2x2 max-pool window, so the conv
    kernel can pool with four element-wise-aligned GEMMs. Patch columns are
    ordered (kh, kw, cin), matching the im2col weight layout."""
    if pad:
        x = jnp.pad(x, ((0, 0), (pad, pad), (pad, pad), (0, 0)))
    N, H, W, C = x.shape
    Ho, Wo = H - k + 1, W - k + 1
    taps = [x[:, di:di + Ho, dj:dj + Wo, :] for di in range(k) for dj in range(k)]
    p = jnp.stack(taps, axis=3)                        # (N, Ho, Wo, k*k, C)
    p = p.reshape(N, Ho, Wo, k * k * C)
    p = p.reshape(N, Ho // 2, 2, Wo // 2, 2, k * k * C)
    p = p.transpose(0, 2, 4, 1, 3, 5)                  # (N, hp, wp, Ho//2, Wo//2, KKC)
    return p.reshape(N, 2, 2, (Ho // 2) * (Wo // 2), k * k * C)


def init_params(key):
    ks = jax.random.split(key, 10)

    def nrm(k, shape, s=0.05):
        return jax.random.normal(k, shape, jnp.float32) * s

    eps = 1e-5

    def bn_fold(c, cpad):
        # Eval-mode BatchNorm with PyTorch default init / running stats, folded
        # into per-channel scale/shift and zero-padded to the lane width.
        gamma = jnp.ones((c,), jnp.float32)
        beta = jnp.zeros((c,), jnp.float32)
        rmean = jnp.zeros((c,), jnp.float32)
        rvar = jnp.ones((c,), jnp.float32)
        scale = gamma / jnp.sqrt(rvar + eps)
        shift = beta - rmean * scale
        padn = cpad - c
        return (jnp.pad(scale, (0, padn)).reshape(1, cpad),
                jnp.pad(shift, (0, padn)).reshape(1, cpad))

    # conv1: Conv2d(1, 32, k=5, pad=2) -> im2col weight (25, 32), Cout padded to 128.
    w1 = nrm(ks[0], (25, 32))
    b1 = nrm(ks[1], (32,))
    # conv2: Conv2d(32, 64, k=5) -> im2col weight (800, 64), rows ordered (kh, kw, cin).
    w2 = nrm(ks[2], (800, 64))
    b2 = nrm(ks[3], (64,))
    # fc1: Linear(1600, 512). PyTorch flattens NCHW (c,h,w); permute rows once so the
    # NHWC (h, w, c_pad128) flatten of the conv2 kernel output feeds it directly.
    wf1 = nrm(ks[4], (1600, 512))
    bf1 = nrm(ks[5], (512,))
    wf1p = wf1.reshape(64, 5, 5, 512).transpose(1, 2, 0, 3)   # (h, w, c, out)
    wf1p = jnp.pad(wf1p, ((0, 0), (0, 0), (0, 64), (0, 0)))   # pad c: 64 -> 128
    wf1p = wf1p.reshape(5 * 5 * 128, 512)
    # fc2: Linear(512, 84) out-padded to 128.  fc3: Linear(84, 10) padded to (128,128).
    wf2 = nrm(ks[6], (512, 84))
    bf2 = nrm(ks[7], (84,))
    wf3 = nrm(ks[8], (84, 10))
    bf3 = nrm(ks[9], (10,))

    bn1_s, bn1_t = bn_fold(32, 128)
    bn2_s, bn2_t = bn_fold(64, 128)
    bn3_s, bn3_t = bn_fold(512, 512)
    bn4_s, bn4_t = bn_fold(84, 128)

    bf16 = jnp.bfloat16
    return dict(
        w1=jnp.pad(w1, ((0, 0), (0, 96))).astype(bf16),
        b1=jnp.pad(b1, (0, 96)).reshape(1, 128),
        bn1_s=bn1_s, bn1_t=bn1_t,
        w2=jnp.pad(w2, ((0, 0), (0, 64))).astype(bf16),
        b2=jnp.pad(b2, (0, 64)).reshape(1, 128),
        bn2_s=bn2_s, bn2_t=bn2_t,
        wf1=wf1p.astype(bf16),
        bf1=bf1.reshape(1, 512),
        bn3_s=bn3_s, bn3_t=bn3_t,
        wf2=jnp.pad(wf2, ((0, 0), (0, 44))).astype(bf16),
        bf2=jnp.pad(bf2, (0, 44)).reshape(1, 128),
        bn4_s=bn4_s, bn4_t=bn4_t,
        wf3=jnp.pad(wf3, ((0, 44), (0, 118))).astype(bf16),
        bf3=jnp.pad(bf3, (0, 118)).reshape(1, 128),
    )


def net_forward(x_nchw, params):
    x = jnp.transpose(x_nchw, (0, 2, 3, 1)).astype(jnp.bfloat16)   # NHWC, bf16 MXU feed
    N = x.shape[0]

    # ---- conv1 block: Conv(1->32, k5, pad2) + ReLU + MaxPool2 + BN (one kernel) ----
    cols = im2col_pool_parity(x, 5, 2)                  # (N, 2, 2, 196, 25)
    y = conv_pool_bn(cols, params["w1"], params["b1"],
                     params["bn1_s"], params["bn1_t"])  # (N, 196, 128) == (N,14,14,128)
    y = y.reshape(N, 14, 14, 128)[:, :, :, :32]         # drop lane padding for conv2

    # ---- conv2 block: Conv(32->64, k5) + ReLU + MaxPool2 + BN (one kernel) ----
    cols = im2col_pool_parity(y, 5, 0)                  # (N, 2, 2, 25, 800)
    y = conv_pool_bn(cols, params["w2"], params["b2"],
                     params["bn2_s"], params["bn2_t"])  # (N, 25, 128) == (N,5,5,128)

    # ---- flatten in NHWC (h, w, c_pad) order; fc1 rows were permuted to match ----
    y = y.reshape(N, 25 * 128)

    # ---- fused fc1(+ReLU+BN) + fc2(+ReLU+BN) + fc3, single kernel ----
    logits = fc_fused(y,
                      params["wf1"], params["bf1"], params["bn3_s"], params["bn3_t"],
                      params["wf2"], params["bf2"], params["bn4_s"], params["bn4_t"],
                      params["wf3"], params["bf3"])     # (N, 128), lane-dense
    return logits[:, :10]


if __name__ == "__main__":
    key = jax.random.PRNGKey(0)
    k_p, k_x = jax.random.split(key)
    params = init_params(k_p)
    # The module's fc1 (64*5*5 inputs) implies 1x28x28 inputs (MNIST-shaped).
    x = jax.random.normal(k_x, (2, 1, 28, 28), jnp.float32)

    out = jax.jit(net_forward)(x, params)
    out = jax.block_until_ready(out)
    assert out.shape == (2, 10) and out.dtype == jnp.float32
    print("KERNEL_OK")
</pallas_src>

<mosaic_0001>
module attributes {stable_mosaic.version = 11 : i64} {
  func.func @_conv_pool_bn_kernel(%arg0: i32, %arg1: memref<1x2x2x196x25xbf16, #tpu.memory_space<vmem>>, %arg2: memref<25x128xbf16, #tpu.memory_space<vmem>>, %arg3: memref<1x128xf32, #tpu.memory_space<vmem>>, %arg4: memref<1x128xf32, #tpu.memory_space<vmem>>, %arg5: memref<1x128xf32, #tpu.memory_space<vmem>>, %arg6: memref<1x196x128xbf16, #tpu.memory_space<vmem>>) attributes {dimension_semantics = [#tpu.dimension_semantics<parallel>], iteration_bounds = array<i64: 2>, scalar_prefetch = 0 : i64, scratch_operands = 0 : i64, tpu.core_type = #tpu.core_type<tc>, window_params = [{transform_indices = @transform_0, window_bounds = array<i64: 1, 2, 2, 196, 25>}, {pipeline_mode = #tpu.pipeline_mode<synchronous>, transform_indices = @transform_1, window_bounds = array<i64: 25, 128>}, {pipeline_mode = #tpu.pipeline_mode<synchronous>, transform_indices = @transform_2, window_bounds = array<i64: 1, 128>}, {pipeline_mode = #tpu.pipeline_mode<synchronous>, transform_indices = @transform_3, window_bounds = array<i64: 1, 128>}, {pipeline_mode = #tpu.pipeline_mode<synchronous>, transform_indices = @transform_4, window_bounds = array<i64: 1, 128>}, {transform_indices = @transform_5, window_bounds = array<i64: 1, 196, 128>}]} {
    %c0 = arith.constant 0 : index
    %c0_0 = arith.constant 0 : index
    %0 = vector.load %arg2[%c0, %c0_0] : memref<25x128xbf16, #tpu.memory_space<vmem>>, vector<25x128xbf16>
    %c0_1 = arith.constant 0 : index
    %c0_2 = arith.constant 0 : index
    %c0_3 = arith.constant 0 : index
    %c0_4 = arith.constant 0 : index
    %c0_5 = arith.constant 0 : index
    %1 = vector.load %arg1[%c0_1, %c0_2, %c0_3, %c0_4, %c0_5] : memref<1x2x2x196x25xbf16, #tpu.memory_space<vmem>>, vector<1x1x1x196x25xbf16>
    %2 = vector.shape_cast %1 : vector<1x1x1x196x25xbf16> to vector<196x25xbf16>
    %cst = arith.constant dense<0.000000e+00> : vector<196x128xf32>
    %3 = tpu.matmul %2, %0, %cst {dimension_numbers = #tpu.dot_dimension_numbers<[1], [0], [0], [1], [0, 0, 1, 1], [], []>} : vector<196x25xbf16>, vector<25x128xbf16>, vector<196x128xf32> -> vector<196x128xf32>
    %c0_6 = arith.constant 0 : index
    %c0_7 = arith.constant 0 : index
    %c1 = arith.constant 1 : index
    %c0_8 = arith.constant 0 : index
    %c0_9 = arith.constant 0 : index
    %4 = vector.load %arg1[%c0_6, %c0_7, %c1, %c0_8, %c0_9] : memref<1x2x2x196x25xbf16, #tpu.memory_space<vmem>>, vector<1x1x1x196x25xbf16>
    %5 = vector.shape_cast %4 : vector<1x1x1x196x25xbf16> to vector<196x25xbf16>
    %cst_10 = arith.constant dense<0.000000e+00> : vector<196x128xf32>
    %6 = tpu.matmul %5, %0, %cst_10 {dimension_numbers = #tpu.dot_dimension_numbers<[1], [0], [0], [1], [0, 0, 1, 1], [], []>} : vector<196x25xbf16>, vector<25x128xbf16>, vector<196x128xf32> -> vector<196x128xf32>
    %c0_11 = arith.constant 0 : index
    %c1_12 = arith.constant 1 : index
    %c0_13 = arith.constant 0 : index
    %c0_14 = arith.constant 0 : index
    %c0_15 = arith.constant 0 : index
    %7 = vector.load %arg1[%c0_11, %c1_12, %c0_13, %c0_14, %c0_15] : memref<1x2x2x196x25xbf16, #tpu.memory_space<vmem>>, vector<1x1x1x196x25xbf16>
    %8 = vector.shape_cast %7 : vector<1x1x1x196x25xbf16> to vector<196x25xbf16>
    %cst_16 = arith.constant dense<0.000000e+00> : vector<196x128xf32>
    %9 = tpu.matmul %8, %0, %cst_16 {dimension_numbers = #tpu.dot_dimension_numbers<[1], [0], [0], [1], [0, 0, 1, 1], [], []>} : vector<196x25xbf16>, vector<25x128xbf16>, vector<196x128xf32> -> vector<196x128xf32>
    %c0_17 = arith.constant 0 : index
    %c1_18 = arith.constant 1 : index
    %c1_19 = arith.constant 1 : index
    %c0_20 = arith.constant 0 : index
    %c0_21 = arith.constant 0 : index
    %10 = vector.load %arg1[%c0_17, %c1_18, %c1_19, %c0_20, %c0_21] : memref<1x2x2x196x25xbf16, #tpu.memory_space<vmem>>, vector<1x1x1x196x25xbf16>
    %11 = vector.shape_cast %10 : vector<1x1x1x196x25xbf16> to vector<196x25xbf16>
    %cst_22 = arith.constant dense<0.000000e+00> : vector<196x128xf32>
    %12 = tpu.matmul %11, %0, %cst_22 {dimension_numbers = #tpu.dot_dimension_numbers<[1], [0], [0], [1], [0, 0, 1, 1], [], []>} : vector<196x25xbf16>, vector<25x128xbf16>, vector<196x128xf32> -> vector<196x128xf32>
    %13 = arith.maximumf %3, %6 : vector<196x128xf32>
    %14 = arith.maximumf %9, %12 : vector<196x128xf32>
    %15 = arith.maximumf %13, %14 : vector<196x128xf32>
    %c0_23 = arith.constant 0 : index
    %c0_24 = arith.constant 0 : index
    %16 = vector.load %arg3[%c0_23, %c0_24] : memref<1x128xf32, #tpu.memory_space<vmem>>, vector<1x128xf32>
    %17 = vector.broadcast %16 : vector<1x128xf32> to vector<196x128xf32>
    %18 = arith.addf %15, %17 : vector<196x128xf32>
    %cst_25 = arith.constant 0.000000e+00 : f32
    %19 = vector.broadcast %cst_25 : f32 to vector<196x128xf32>
    %20 = arith.maximumf %18, %19 : vector<196x128xf32>
    %c0_26 = arith.constant 0 : index
    %c0_27 = arith.constant 0 : index
    %21 = vector.load %arg4[%c0_26, %c0_27] : memref<1x128xf32, #tpu.memory_space<vmem>>, vector<1x128xf32>
    %22 = vector.broadcast %21 : vector<1x128xf32> to vector<196x128xf32>
    %23 = arith.mulf %20, %22 : vector<196x128xf32>
    %c0_28 = arith.constant 0 : index
    %c0_29 = arith.constant 0 : index
    %24 = vector.load %arg5[%c0_28, %c0_29] : memref<1x128xf32, #tpu.memory_space<vmem>>, vector<1x128xf32>
    %25 = vector.broadcast %24 : vector<1x128xf32> to vector<196x128xf32>
    %26 = arith.addf %23, %25 : vector<196x128xf32>
    %27 = arith.truncf %26 : vector<196x128xf32> to vector<196x128xbf16>
    %c0_30 = arith.constant 0 : index
    %c0_31 = arith.constant 0 : index
    %c0_32 = arith.constant 0 : index
    %28 = vector.load %arg6[%c0_30, %c0_31, %c0_32] : memref<1x196x128xbf16, #tpu.memory_space<vmem>>, vector<1x196x128xbf16>
    %29 = vector.shape_cast %28 : vector<1x196x128xbf16> to vector<196x128xbf16>
    %30 = vector.shape_cast %27 : vector<196x128xbf16> to vector<1x196x128xbf16>
    tpu.vector_store %arg6[%c0_30, %c0_31, %c0_32], %30 {strides = array<i32>} : memref<1x196x128xbf16, #tpu.memory_space<vmem>>, vector<1x196x128xbf16>,
    return
  }
  func.func @transform_0(%arg0: i32) -> (i32, i32, i32, i32, i32) {
    %c0_i32 = arith.constant 0 : i32
    %c0_i32_0 = arith.constant 0 : i32
    %c0_i32_1 = arith.constant 0 : i32
    %c0_i32_2 = arith.constant 0 : i32
    %c0_i32_3 = arith.constant 0 : i32
    return %arg0, %c0_i32, %c0_i32_0, %c0_i32_1, %c0_i32_2 : i32, i32, i32, i32, i32
  }
  func.func @transform_1(%arg0: i32) -> (i32, i32) {
    %c0_i32 = arith.constant 0 : i32
    %c0_i32_0 = arith.constant 0 : i32
    %c0_i32_1 = arith.constant 0 : i32
    return %c0_i32, %c0_i32_0 : i32, i32
  }
  func.func @transform_2(%arg0: i32) -> (i32, i32) {
    %c0_i32 = arith.constant 0 : i32
    %c0_i32_0 = arith.constant 0 : i32
    %c0_i32_1 = arith.constant 0 : i32
    return %c0_i32, %c0_i32_0 : i32, i32
  }
  func.func @transform_3(%arg0: i32) -> (i32, i32) {
    %c0_i32 = arith.constant 0 : i32
    %c0_i32_0 = arith.constant 0 : i32
    %c0_i32_1 = arith.constant 0 : i32
    return %c0_i32, %c0_i32_0 : i32, i32
  }
  func.func @transform_4(%arg0: i32) -> (i32, i32) {
    %c0_i32 = arith.constant 0 : i32
    %c0_i32_0 = arith.constant 0 : i32
    %c0_i32_1 = arith.constant 0 : i32
    return %c0_i32, %c0_i32_0 : i32, i32
  }
  func.func @transform_5(%arg0: i32) -> (i32, i32, i32) {
    %c0_i32 = arith.constant 0 : i32
    %c0_i32_0 = arith.constant 0 : i32
    %c0_i32_1 = arith.constant 0 : i32
    return %arg0, %c0_i32, %c0_i32_0 : i32, i32, i32
  }
}

module attributes {stable_mosaic.version = 11 : i64} {
  func.func @_conv_pool_bn_kernel(%arg0: i32, %arg1: memref<1x2x2x25x800xbf16, #tpu.memory_space<vmem>>, %arg2: memref<800x128xbf16, #tpu.memory_space<vmem>>, %arg3: memref<1x128xf32, #tpu.memory_space<vmem>>, %arg4: memref<1x128xf32, #tpu.memory_space<vmem>>, %arg5: memref<1x128xf32, #tpu.memory_space<vmem>>, %arg6: memref<1x25x128xbf16, #tpu.memory_space<vmem>>) attributes {dimension_semantics = [#tpu.dimension_semantics<parallel>], iteration_bounds = array<i64: 2>, scalar_prefetch = 0 : i64, scratch_operands = 0 : i64, tpu.core_type = #tpu.core_type<tc>, window_params = [{transform_indices = @transform_0, window_bounds = array<i64: 1, 2, 2, 25, 800>}, {pipeline_mode = #tpu.pipeline_mode<synchronous>, transform_indices = @transform_1, window_bounds = array<i64: 800, 128>}, {pipeline_mode = #tpu.pipeline_mode<synchronous>, transform_indices = @transform_2, window_bounds = array<i64: 1, 128>}, {pipeline_mode = #tpu.pipeline_mode<synchronous>, transform_indices = @transform_3, window_bounds = array<i64: 1, 128>}, {pipeline_mode = #tpu.pipeline_mode<synchronous>, transform_indices = @transform_4, window_bounds = array<i64: 1, 128>}, {transform_indices = @transform_5, window_bounds = array<i64: 1, 25, 128>}]} {
    %c0 = arith.constant 0 : index
    %c0_0 = arith.constant 0 : index
    %0 = vector.load %arg2[%c0, %c0_0] : memref<800x128xbf16, #tpu.memory_space<vmem>>, vector<800x128xbf16>
    %c0_1 = arith.constant 0 : index
    %c0_2 = arith.constant 0 : index
    %c0_3 = arith.constant 0 : index
    %c0_4 = arith.constant 0 : index
    %c0_5 = arith.constant 0 : index
    %1 = vector.load %arg1[%c0_1, %c0_2, %c0_3, %c0_4, %c0_5] : memref<1x2x2x25x800xbf16, #tpu.memory_space<vmem>>, vector<1x1x1x25x800xbf16>
    %2 = vector.shape_cast %1 : vector<1x1x1x25x800xbf16> to vector<25x800xbf16>
    %cst = arith.constant dense<0.000000e+00> : vector<25x128xf32>
    %3 = tpu.matmul %2, %0, %cst {dimension_numbers = #tpu.dot_dimension_numbers<[1], [0], [0], [1], [0, 0, 1, 1], [], []>} : vector<25x800xbf16>, vector<800x128xbf16>, vector<25x128xf32> -> vector<25x128xf32>
    %c0_6 = arith.constant 0 : index
    %c0_7 = arith.constant 0 : index
    %c1 = arith.constant 1 : index
    %c0_8 = arith.constant 0 : index
    %c0_9 = arith.constant 0 : index
    %4 = vector.load %arg1[%c0_6, %c0_7, %c1, %c0_8, %c0_9] : memref<1x2x2x25x800xbf16, #tpu.memory_space<vmem>>, vector<1x1x1x25x800xbf16>
    %5 = vector.shape_cast %4 : vector<1x1x1x25x800xbf16> to vector<25x800xbf16>
    %cst_10 = arith.constant dense<0.000000e+00> : vector<25x128xf32>
    %6 = tpu.matmul %5, %0, %cst_10 {dimension_numbers = #tpu.dot_dimension_numbers<[1], [0], [0], [1], [0, 0, 1, 1], [], []>} : vector<25x800xbf16>, vector<800x128xbf16>, vector<25x128xf32> -> vector<25x128xf32>
    %c0_11 = arith.constant 0 : index
    %c1_12 = arith.constant 1 : index
    %c0_13 = arith.constant 0 : index
    %c0_14 = arith.constant 0 : index
    %c0_15 = arith.constant 0 : index
    %7 = vector.load %arg1[%c0_11, %c1_12, %c0_13, %c0_14, %c0_15] : memref<1x2x2x25x800xbf16, #tpu.memory_space<vmem>>, vector<1x1x1x25x800xbf16>
    %8 = vector.shape_cast %7 : vector<1x1x1x25x800xbf16> to vector<25x800xbf16>
    %cst_16 = arith.constant dense<0.000000e+00> : vector<25x128xf32>
    %9 = tpu.matmul %8, %0, %cst_16 {dimension_numbers = #tpu.dot_dimension_numbers<[1], [0], [0], [1], [0, 0, 1, 1], [], []>} : vector<25x800xbf16>, vector<800x128xbf16>, vector<25x128xf32> -> vector<25x128xf32>
    %c0_17 = arith.constant 0 : index
    %c1_18 = arith.constant 1 : index
    %c1_19 = arith.constant 1 : index
    %c0_20 = arith.constant 0 : index
    %c0_21 = arith.constant 0 : index
    %10 = vector.load %arg1[%c0_17, %c1_18, %c1_19, %c0_20, %c0_21] : memref<1x2x2x25x800xbf16, #tpu.memory_space<vmem>>, vector<1x1x1x25x800xbf16>
    %11 = vector.shape_cast %10 : vector<1x1x1x25x800xbf16> to vector<25x800xbf16>
    %cst_22 = arith.constant dense<0.000000e+00> : vector<25x128xf32>
    %12 = tpu.matmul %11, %0, %cst_22 {dimension_numbers = #tpu.dot_dimension_numbers<[1], [0], [0], [1], [0, 0, 1, 1], [], []>} : vector<25x800xbf16>, vector<800x128xbf16>, vector<25x128xf32> -> vector<25x128xf32>
    %13 = arith.maximumf %3, %6 : vector<25x128xf32>
    %14 = arith.maximumf %9, %12 : vector<25x128xf32>
    %15 = arith.maximumf %13, %14 : vector<25x128xf32>
    %c0_23 = arith.constant 0 : index
    %c0_24 = arith.constant 0 : index
    %16 = vector.load %arg3[%c0_23, %c0_24] : memref<1x128xf32, #tpu.memory_space<vmem>>, vector<1x128xf32>
    %17 = vector.broadcast %16 : vector<1x128xf32> to vector<25x128xf32>
    %18 = arith.addf %15, %17 : vector<25x128xf32>
    %cst_25 = arith.constant 0.000000e+00 : f32
    %19 = vector.broadcast %cst_25 : f32 to vector<25x128xf32>
    %20 = arith.maximumf %18, %19 : vector<25x128xf32>
    %c0_26 = arith.constant 0 : index
    %c0_27 = arith.constant 0 : index
    %21 = vector.load %arg4[%c0_26, %c0_27] : memref<1x128xf32, #tpu.memory_space<vmem>>, vector<1x128xf32>
    %22 = vector.broadcast %21 : vector<1x128xf32> to vector<25x128xf32>
    %23 = arith.mulf %20, %22 : vector<25x128xf32>
    %c0_28 = arith.constant 0 : index
    %c0_29 = arith.constant 0 : index
    %24 = vector.load %arg5[%c0_28, %c0_29] : memref<1x128xf32, #tpu.memory_space<vmem>>, vector<1x128xf32>
    %25 = vector.broadcast %24 : vector<1x128xf32> to vector<25x128xf32>
    %26 = arith.addf %23, %25 : vector<25x128xf32>
    %27 = arith.truncf %26 : vector<25x128xf32> to vector<25x128xbf16>
    %c0_30 = arith.constant 0 : index
    %c0_31 = arith.constant 0 : index
    %c0_32 = arith.constant 0 : index
    %28 = vector.load %arg6[%c0_30, %c0_31, %c0_32] : memref<1x25x128xbf16, #tpu.memory_space<vmem>>, vector<1x25x128xbf16>
    %29 = vector.shape_cast %28 : vector<1x25x128xbf16> to vector<25x128xbf16>
    %30 = vector.shape_cast %27 : vector<25x128xbf16> to vector<1x25x128xbf16>
    tpu.vector_store %arg6[%c0_30, %c0_31, %c0_32], %30 {strides = array<i32>} : memref<1x25x128xbf16, #tpu.memory_space<vmem>>, vector<1x25x128xbf16>,
    return
  }
  func.func @transform_0(%arg0: i32) -> (i32, i32, i32, i32, i32) {
    %c0_i32 = arith.constant 0 : i32
    %c0_i32_0 = arith.constant 0 : i32
    %c0_i32_1 = arith.constant 0 : i32
    %c0_i32_2 = arith.constant 0 : i32
    %c0_i32_3 = arith.constant 0 : i32
    return %arg0, %c0_i32, %c0_i32_0, %c0_i32_1, %c0_i32_2 : i32, i32, i32, i32, i32
  }
  func.func @transform_1(%arg0: i32) -> (i32, i32) {
    %c0_i32 = arith.constant 0 : i32
    %c0_i32_0 = arith.constant 0 : i32
    %c0_i32_1 = arith.constant 0 : i32
    return %c0_i32, %c0_i32_0 : i32, i32
  }
  func.func @transform_2(%arg0: i32) -> (i32, i32) {
    %c0_i32 = arith.constant 0 : i32
    %c0_i32_0 = arith.constant 0 : i32
    %c0_i32_1 = arith.constant 0 : i32
    return %c0_i32, %c0_i32_0 : i32, i32
  }
  func.func @transform_3(%arg0: i32) -> (i32, i32) {
    %c0_i32 = arith.constant 0 : i32
    %c0_i32_0 = arith.constant 0 : i32
    %c0_i32_1 = arith.constant 0 : i32
    return %c0_i32, %c0_i32_0 : i32, i32
  }
  func.func @transform_4(%arg0: i32) -> (i32, i32) {
    %c0_i32 = arith.constant 0 : i32
    %c0_i32_0 = arith.constant 0 : i32
    %c0_i32_1 = arith.constant 0 : i32
    return %c0_i32, %c0_i32_0 : i32, i32
  }
  func.func @transform_5(%arg0: i32) -> (i32, i32, i32) {
    %c0_i32 = arith.constant 0 : i32
    %c0_i32_0 = arith.constant 0 : i32
    %c0_i32_1 = arith.constant 0 : i32
    return %arg0, %c0_i32, %c0_i32_0 : i32, i32, i32
  }
}

module attributes {stable_mosaic.version = 11 : i64} {
  func.func @_fc_fused_kernel(%arg0: i32, %arg1: memref<2x3200xbf16, #tpu.memory_space<vmem>>, %arg2: memref<3200x512xbf16, #tpu.memory_space<vmem>>, %arg3: memref<1x512xf32, #tpu.memory_space<vmem>>, %arg4: memref<1x512xf32, #tpu.memory_space<vmem>>, %arg5: memref<1x512xf32, #tpu.memory_space<vmem>>, %arg6: memref<512x128xbf16, #tpu.memory_space<vmem>>, %arg7: memref<1x128xf32, #tpu.memory_space<vmem>>, %arg8: memref<1x128xf32, #tpu.memory_space<vmem>>, %arg9: memref<1x128xf32, #tpu.memory_space<vmem>>, %arg10: memref<128x128xbf16, #tpu.memory_space<vmem>>, %arg11: memref<1x128xf32, #tpu.memory_space<vmem>>, %arg12: memref<2x128xf32, #tpu.memory_space<vmem>>) attributes {dimension_semantics = [#tpu.dimension_semantics<parallel>], iteration_bounds = array<i64: 1>, scalar_prefetch = 0 : i64, scratch_operands = 0 : i64, tpu.core_type = #tpu.core_type<tc>, window_params = [{transform_indices = @transform_0, window_bounds = array<i64: 2, 3200>}, {pipeline_mode = #tpu.pipeline_mode<synchronous>, transform_indices = @transform_1, window_bounds = array<i64: 3200, 512>}, {pipeline_mode = #tpu.pipeline_mode<synchronous>, transform_indices = @transform_2, window_bounds = array<i64: 1, 512>}, {pipeline_mode = #tpu.pipeline_mode<synchronous>, transform_indices = @transform_3, window_bounds = array<i64: 1, 512>}, {pipeline_mode = #tpu.pipeline_mode<synchronous>, transform_indices = @transform_4, window_bounds = array<i64: 1, 512>}, {pipeline_mode = #tpu.pipeline_mode<synchronous>, transform_indices = @transform_5, window_bounds = array<i64: 512, 128>}, {pipeline_mode = #tpu.pipeline_mode<synchronous>, transform_indices = @transform_6, window_bounds = array<i64: 1, 128>}, {pipeline_mode = #tpu.pipeline_mode<synchronous>, transform_indices = @transform_7, window_bounds = array<i64: 1, 128>}, {pipeline_mode = #tpu.pipeline_mode<synchronous>, transform_indices = @transform_8, window_bounds = array<i64: 1, 128>}, {pipeline_mode = #tpu.pipeline_mode<synchronous>, transform_indices = @transform_9, window_bounds = array<i64: 128, 128>}, {pipeline_mode = #tpu.pipeline_mode<synchronous>, transform_indices = @transform_10, window_bounds = array<i64: 1, 128>}, {transform_indices = @transform_11, window_bounds = array<i64: 2, 128>}]} {
    %c0 = arith.constant 0 : index
    %c0_0 = arith.constant 0 : index
    %0 = vector.load %arg1[%c0, %c0_0] : memref<2x3200xbf16, #tpu.memory_space<vmem>>, vector<2x3200xbf16>
    %c0_1 = arith.constant 0 : index
    %c0_2 = arith.constant 0 : index
    %1 = vector.load %arg2[%c0_1, %c0_2] : memref<3200x512xbf16, #tpu.memory_space<vmem>>, vector<3200x512xbf16>
    %cst = arith.constant dense<0.000000e+00> : vector<2x512xf32>
    %2 = tpu.matmul %0, %1, %cst {dimension_numbers = #tpu.dot_dimension_numbers<[1], [0], [0], [1], [0, 0, 1, 1], [], []>} : vector<2x3200xbf16>, vector<3200x512xbf16>, vector<2x512xf32> -> vector<2x512xf32>
    %c0_3 = arith.constant 0 : index
    %c0_4 = arith.constant 0 : index
    %3 = vector.load %arg3[%c0_3, %c0_4] : memref<1x512xf32, #tpu.memory_space<vmem>>, vector<1x512xf32>
    %4 = vector.broadcast %3 : vector<1x512xf32> to vector<2x512xf32>
    %5 = arith.addf %2, %4 : vector<2x512xf32>
    %cst_5 = arith.constant 0.000000e+00 : f32
    %6 = vector.broadcast %cst_5 : f32 to vector<2x512xf32>
    %7 = arith.maximumf %5, %6 : vector<2x512xf32>
    %c0_6 = arith.constant 0 : index
    %c0_7 = arith.constant 0 : index
    %8 = vector.load %arg4[%c0_6, %c0_7] : memref<1x512xf32, #tpu.memory_space<vmem>>, vector<1x512xf32>
    %9 = vector.broadcast %8 : vector<1x512xf32> to vector<2x512xf32>
    %10 = arith.mulf %7, %9 : vector<2x512xf32>
    %c0_8 = arith.constant 0 : index
    %c0_9 = arith.constant 0 : index
    %11 = vector.load %arg5[%c0_8, %c0_9] : memref<1x512xf32, #tpu.memory_space<vmem>>, vector<1x512xf32>
    %12 = vector.broadcast %11 : vector<1x512xf32> to vector<2x512xf32>
    %13 = arith.addf %10, %12 : vector<2x512xf32>
    %14 = arith.truncf %13 : vector<2x512xf32> to vector<2x512xbf16>
    %c0_10 = arith.constant 0 : index
    %c0_11 = arith.constant 0 : index
    %15 = vector.load %arg6[%c0_10, %c0_11] : memref<512x128xbf16, #tpu.memory_space<vmem>>, vector<512x128xbf16>
    %cst_12 = arith.constant dense<0.000000e+00> : vector<2x128xf32>
    %16 = tpu.matmul %14, %15, %cst_12 {dimension_numbers = #tpu.dot_dimension_numbers<[1], [0], [0], [1], [0, 0, 1, 1], [], []>} : vector<2x512xbf16>, vector<512x128xbf16>, vector<2x128xf32> -> vector<2x128xf32>
    %c0_13 = arith.constant 0 : index
    %c0_14 = arith.constant 0 : index
    %17 = vector.load %arg7[%c0_13, %c0_14] : memref<1x128xf32, #tpu.memory_space<vmem>>, vector<1x128xf32>
    %18 = vector.broadcast %17 : vector<1x128xf32> to vector<2x128xf32>
    %19 = arith.addf %16, %18 : vector<2x128xf32>
    %cst_15 = arith.constant 0.000000e+00 : f32
    %20 = vector.broadcast %cst_15 : f32 to vector<2x128xf32>
    %21 = arith.maximumf %19, %20 : vector<2x128xf32>
    %c0_16 = arith.constant 0 : index
    %c0_17 = arith.constant 0 : index
    %22 = vector.load %arg8[%c0_16, %c0_17] : memref<1x128xf32, #tpu.memory_space<vmem>>, vector<1x128xf32>
    %23 = vector.broadcast %22 : vector<1x128xf32> to vector<2x128xf32>
    %24 = arith.mulf %21, %23 : vector<2x128xf32>
    %c0_18 = arith.constant 0 : index
    %c0_19 = arith.constant 0 : index
    %25 = vector.load %arg9[%c0_18, %c0_19] : memref<1x128xf32, #tpu.memory_space<vmem>>, vector<1x128xf32>
    %26 = vector.broadcast %25 : vector<1x128xf32> to vector<2x128xf32>
    %27 = arith.addf %24, %26 : vector<2x128xf32>
    %28 = arith.truncf %27 : vector<2x128xf32> to vector<2x128xbf16>
    %c0_20 = arith.constant 0 : index
    %c0_21 = arith.constant 0 : index
    %29 = vector.load %arg10[%c0_20, %c0_21] : memref<128x128xbf16, #tpu.memory_space<vmem>>, vector<128x128xbf16>
    %cst_22 = arith.constant dense<0.000000e+00> : vector<2x128xf32>
    %30 = tpu.matmul %28, %29, %cst_22 {dimension_numbers = #tpu.dot_dimension_numbers<[1], [0], [0], [1], [0, 0, 1, 1], [], []>} : vector<2x128xbf16>, vector<128x128xbf16>, vector<2x128xf32> -> vector<2x128xf32>
    %c0_23 = arith.constant 0 : index
    %c0_24 = arith.constant 0 : index
    %31 = vector.load %arg11[%c0_23, %c0_24] : memref<1x128xf32, #tpu.memory_space<vmem>>, vector<1x128xf32>
    %32 = vector.broadcast %31 : vector<1x128xf32> to vector<2x128xf32>
    %33 = arith.addf %30, %32 : vector<2x128xf32>
    %c0_25 = arith.constant 0 : index
    %c0_26 = arith.constant 0 : index
    %34 = vector.load %arg12[%c0_25, %c0_26] : memref<2x128xf32, #tpu.memory_space<vmem>>, vector<2x128xf32>
    tpu.vector_store %arg12[%c0_25, %c0_26], %33 {strides = array<i32>} : memref<2x128xf32, #tpu.memory_space<vmem>>, vector<2x128xf32>,
    return
  }
  func.func @transform_0(%arg0: i32) -> (i32, i32) {
    %c0_i32 = arith.constant 0 : i32
    %c0_i32_0 = arith.constant 0 : i32
    return %arg0, %c0_i32 : i32, i32
  }
  func.func @transform_1(%arg0: i32) -> (i32, i32) {
    %c0_i32 = arith.constant 0 : i32
    %c0_i32_0 = arith.constant 0 : i32
    %c0_i32_1 = arith.constant 0 : i32
    return %c0_i32, %c0_i32_0 : i32, i32
  }
  func.func @transform_2(%arg0: i32) -> (i32, i32) {
    %c0_i32 = arith.constant 0 : i32
    %c0_i32_0 = arith.constant 0 : i32
    %c0_i32_1 = arith.constant 0 : i32
    return %c0_i32, %c0_i32_0 : i32, i32
  }
  func.func @transform_3(%arg0: i32) -> (i32, i32) {
    %c0_i32 = arith.constant 0 : i32
    %c0_i32_0 = arith.constant 0 : i32
    %c0_i32_1 = arith.constant 0 : i32
    return %c0_i32, %c0_i32_0 : i32, i32
  }
  func.func @transform_4(%arg0: i32) -> (i32, i32) {
    %c0_i32 = arith.constant 0 : i32
    %c0_i32_0 = arith.constant 0 : i32
    %c0_i32_1 = arith.constant 0 : i32
    return %c0_i32, %c0_i32_0 : i32, i32
  }
  func.func @transform_5(%arg0: i32) -> (i32, i32) {
    %c0_i32 = arith.constant 0 : i32
    %c0_i32_0 = arith.constant 0 : i32
    %c0_i32_1 = arith.constant 0 : i32
    return %c0_i32, %c0_i32_0 : i32, i32
  }
  func.func @transform_6(%arg0: i32) -> (i32, i32) {
    %c0_i32 = arith.constant 0 : i32
    %c0_i32_0 = arith.constant 0 : i32
    %c0_i32_1 = arith.constant 0 : i32
    return %c0_i32, %c0_i32_0 : i32, i32
  }
  func.func @transform_7(%arg0: i32) -> (i32, i32) {
    %c0_i32 = arith.constant 0 : i32
    %c0_i32_0 = arith.constant 0 : i32
    %c0_i32_1 = arith.constant 0 : i32
    return %c0_i32, %c0_i32_0 : i32, i32
  }
  func.func @transform_8(%arg0: i32) -> (i32, i32) {
    %c0_i32 = arith.constant 0 : i32
    %c0_i32_0 = arith.constant 0 : i32
    %c0_i32_1 = arith.constant 0 : i32
    return %c0_i32, %c0_i32_0 : i32, i32
  }
  func.func @transform_9(%arg0: i32) -> (i32, i32) {
    %c0_i32 = arith.constant 0 : i32
    %c0_i32_0 = arith.constant 0 : i32
    %c0_i32_1 = arith.constant 0 : i32
    return %c0_i32, %c0_i32_0 : i32, i32
  }
  func.func @transform_10(%arg0: i32) -> (i32, i32) {
    %c0_i32 = arith.constant 0 : i32
    %c0_i32_0 = arith.constant 0 : i32
    %c0_i32_1 = arith.constant 0 : i32
    return %c0_i32, %c0_i32_0 : i32, i32
  }
  func.func @transform_11(%arg0: i32) -> (i32, i32) {
    %c0_i32 = arith.constant 0 : i32
    %c0_i32_0 = arith.constant 0 : i32
    return %arg0, %c0_i32 : i32, i32
  }
}

</mosaic_0001>

<bundles_post_ra>
// kernel: net_forward.3
= control target key start
LH: loop header
LB: loop body
LE: loop exit
PB: predicated region body
PF: predicated region fallthrough
CT: control target
= control target key end

     0   :  { %s2387_s18 = smov 0   ;;  %s2962_s0 = inlined_call_operand.vmem [shape: bf16[2,2,2,196,25], index: 0, kind: input, shape index: {}]   ;;  %s2963_s1 = inlined_call_operand.vmem [shape: bf16[25,128], index: 1, kind: input, shape index: {}]   ;;  %s2964_s2 = inlined_call_operand.vmem [shape: f32[1,128], index: 2, kind: input, shape index: {}]   ;;  %s2965_s3 = inlined_call_operand.vmem [shape: f32[1,128], index: 3, kind: input, shape index: {}]   ;;  %s2966_s4 = inlined_call_operand.vmem [shape: f32[1,128], index: 4, kind: input, shape index: {}]   ;;  %s2967_s5 = inlined_call_operand.vmem [shape: bf16[2,196,128], index: 5, kind: output, shape index: {}]  }
   0x1 LB: > { %s1681_s19 = sadd.s32 4294967295, %s2352_s18   ;;  %p1685_p0 = scmp.ge.s32.totalorder %s2352_s18, 1  ;;  %s2352_s18 = sphi %s2387_s18, %s15_s18  }
   0x2   : > { %p187_p1 = scmp.lt.s32.totalorder %s2352_s18, 3 }
   0x4   : > { %p188_p2 = pnand %p1685_p0, %p187_p1 }
   0x6   : > { %191 = sbr.rel (%p188_p2) target bundleno = 449 (0x1c1), region = 40 }
   0xd   : > { %v2292_v0 = vld [vmem:[%s2963_s1] sm:$0xff]   ;;  %v2354_v1 = vmov 0.0   ;;  %v2293_v2 = vld [vmem:[%s2963_s1 + $0x8] sm:$0x1f]   ;;  %vm369_vm0 = vcmask 1043456   ;;  %vm370_vm1 = vcmask 1044480  }
   0xe   : > { %2055 = vmatprep.subr.bf16.mxu0 %v2354_v1  ;;  %2111 = vmatprep.subr.bf16.mxu1 %v2354_v1  ;;  %p215_p3 = scmp.lt.s32.totalorder %s1681_s19, 1  ;;  %v2355_v3 = vmov 65535   ;;  %vm2356_vm2 = vmmov 0   ;;  %vm329_vm3 = vcmask 203776  }
   0xf   : > { %2056 = vmatpush3.bf16.msra.mxu0 %v2292_v0  ;;  %2112 = vmatpush3.bf16.msra.mxu1 %v2292_v0  ;;  %v371_v4 = vsel %vm369_vm0, 4294967295, %v2355_v3 }
  0x10   : > { %2057 = vmatprep.subr.bf16.mxu0 %v2354_v1  ;;  %2113 = vmatprep.subr.bf16.mxu1 %v2354_v1  ;;  %v372_v5 = vsel %vm370_vm1, %v371_v4, 0  ;;  %s2997_s19 = smov (!%p215_p3, %s1681_s19), 1 }
  0x11   : > { %2059 = vmatprep.mubr.msk.bf16.mxu0 %vm2356_vm2, %v2354_v1  ;;  %2115 = vmatprep.mubr.msk.bf16.mxu1 %vm2356_vm2, %v2354_v1  ;;  %v374_v6 = vand.u32 %v2293_v2, %v372_v5  ;;  %s2279_s24 = smul.u32 400, %s2997_s19 }
  0x12   : > { %s2280_s9 = smul.u32 100, %s2997_s19 }
  0x13   : > { %2058 = vmatpush3.bf16.msra.mxu0 %v374_v6  ;;  %2114 = vmatpush3.bf16.msra.mxu1 %v374_v6  ;;  %s2415_s27 = scalar_lea.vmem %s2962_s0, %s2279_s24 }
  0x14   : > { %2167 = vmatprep.subr.bf16.mxu0 %v2354_v1  ;;  %2223 = vmatprep.subr.bf16.mxu1 %v2354_v1  ;;  %v2294_v7 = vld [vmem:[%s2415_s27] sm:$0xff]   ;;  %v2296_v9 = vld [vmem:[%s2415_s27 + $0x8] sm:$0xff]   ;;  %v2298_v11 = vld [vmem:[%s2415_s27 + $0x10] sm:$0xff]   ;;  %s2813_s12 = scalar_lea.vmem %s2967_s5, %s2280_s9 }
  0x15   : > { %v2295_v8 = vld [vmem:[%s2415_s27 + $0x64] sm:$0xff]   ;;  %v2297_v10 = vld [vmem:[%s2415_s27 + $0x6c] sm:$0xff]   ;;  %v2299_v12 = vld [vmem:[%s2415_s27 + $0x74] sm:$0xff]  }
  0x16   : > { %2060 = vmatmul.mubr.msk.bf16.vlgmr.msra.gmra.mrb[0].mxu0 %vm329_vm3, %v2294_v7  ;;  %2116 = vmatmul.mubr.msk.bf16.vlgmr.msra.gmra.mrb[0].mxu1 %vm329_vm3, %v2295_v8  ;;  %v2300_v13 = vld [vmem:[%s2415_s27 + $0x18] sm:$0xff]   ;;  %v2302_v15 = vld [vmem:[%s2415_s27 + $0x20] sm:$0xff]   ;;  %v2304_v17 = vld [vmem:[%s2415_s27 + $0x28] sm:$0xff]  }
  0x17   : > { %2168 = vmatpush3.bf16.msra.mxu0 %v2292_v0  ;;  %2224 = vmatpush3.bf16.msra.mxu1 %v2292_v0  ;;  %v2301_v14 = vld [vmem:[%s2415_s27 + $0x7c] sm:$0xff]   ;;  %v2303_v16 = vld [vmem:[%s2415_s27 + $0x84] sm:$0xff]   ;;  %v2305_v18 = vld [vmem:[%s2415_s27 + $0x8c] sm:$0xff]  }
  0x18   : > { %2063 = vmatprep.mubr.msk.bf16.mxu0 %vm2356_vm2, %v2354_v1  ;;  %2119 = vmatprep.mubr.msk.bf16.mxu1 %vm2356_vm2, %v2354_v1  ;;  %v2306_v19 = vld [vmem:[%s2415_s27 + $0x30] sm:$0xff]   ;;  %v2308_v21 = vld [vmem:[%s2415_s27 + $0x38] sm:$0xff]   ;;  %v2310_v23 = vld [vmem:[%s2415_s27 + $0x40] sm:$0xff]  }
  0x19   : > { %2169 = vmatprep.subr.bf16.mxu0 %v2354_v1  ;;  %2225 = vmatprep.subr.bf16.mxu1 %v2354_v1  ;;  %v2307_v20 = vld [vmem:[%s2415_s27 + $0x94] sm:$0xff]   ;;  %v2309_v22 = vld [vmem:[%s2415_s27 + $0x9c] sm:$0xff]   ;;  %v2311_v24 = vld [vmem:[%s2415_s27 + $0xa4] sm:$0xff]  }
  0x1a   : > { %v2312_v25 = vld [vmem:[%s2415_s27 + $0x48] sm:$0xff]   ;;  %v2314_v27 = vld [vmem:[%s2415_s27 + $0x50] sm:$0xff]   ;;  %v2316_v29 = vld [vmem:[%s2415_s27 + $0x58] sm:$0xff]  }
  0x1b   : > { %2170 = vmatpush3.bf16.msra.mxu0 %v374_v6  ;;  %2226 = vmatpush3.bf16.msra.mxu1 %v374_v6  ;;  %v2313_v26 = vld [vmem:[%s2415_s27 + $0xac] sm:$0xff]   ;;  %v2315_v28 = vld [vmem:[%s2415_s27 + $0xb4] sm:$0xff]   ;;  %v2317_v30 = vld [vmem:[%s2415_s27 + $0xbc] sm:$0xff]  }
  0x1c   : > { %v2318_v31 = vld [vmem:[%s2415_s27 + $0x60] ss:$0 sps:$4 sm:$0x33]   ;;  %v2319_v32 = vld [vmem:[%s2415_s27 + $0xc4] ss:$0 sps:$4 sm:$0x33]  }
  0x1d   : > { %v2320_v33 = vld [vmem:[%s2415_s27 + $0xc8] sm:$0xff]   ;;  %v2322_v35 = vld [vmem:[%s2415_s27 + $0xd0] sm:$0xff]   ;;  %v2324_v37 = vld [vmem:[%s2415_s27 + $0xd8] sm:$0xff]  }
  0x1e   : > { %2064 = vmatmul.mubr.msk.bf16.gmra.mrb[4].mxu0 %vm329_vm3, %v2296_v9  ;;  %2120 = vmatmul.mubr.msk.bf16.gmra.mrb[4].mxu1 %vm329_vm3, %v2297_v10  ;;  %v2321_v34 = vld [vmem:[%s2415_s27 + $0x12c] sm:$0xff]   ;;  %v2323_v36 = vld [vmem:[%s2415_s27 + $0x134] sm:$0xff]   ;;  %v2325_v38 = vld [vmem:[%s2415_s27 + $0x13c] sm:$0xff]  }
  0x1f   : > { %2067 = vmatprep.mubr.msk.bf16.mxu0 %vm2356_vm2, %v2354_v1  ;;  %2123 = vmatprep.mubr.msk.bf16.mxu1 %vm2356_vm2, %v2354_v1  ;;  %v2326_v39 = vld [vmem:[%s2415_s27 + $0xe0] sm:$0xff]   ;;  %v2328_v41 = vld [vmem:[%s2415_s27 + $0xe8] sm:$0xff]   ;;  %v2330_v43 = vld [vmem:[%s2415_s27 + $0xf0] sm:$0xff]  }
  0x20   : > { %v2327_v40 = vld [vmem:[%s2415_s27 + $0x144] sm:$0xff]   ;;  %v2329_v42 = vld [vmem:[%s2415_s27 + $0x14c] sm:$0xff]   ;;  %v2331_v44 = vld [vmem:[%s2415_s27 + $0x154] sm:$0xff]  }
  0x21   : > { %v2332_v45 = vld [vmem:[%s2415_s27 + $0xf8] sm:$0xff]   ;;  %v2334_v47 = vld [vmem:[%s2415_s27 + $0x100] sm:$0xff]   ;;  %v2336_v49 = vld [vmem:[%s2415_s27 + $0x108] sm:$0xff]  }
  0x22   : > { %v2333_v46 = vld [vmem:[%s2415_s27 + $0x15c] sm:$0xff]   ;;  %v2335_v48 = vld [vmem:[%s2415_s27 + $0x164] sm:$0xff]   ;;  %v2337_v50 = vld [vmem:[%s2415_s27 + $0x16c] sm:$0xff]  }
  0x23   : > { %v2338_v51 = vld [vmem:[%s2415_s27 + $0x110] sm:$0xff]   ;;  %v2340_v53 = vld [vmem:[%s2415_s27 + $0x118] sm:$0xff]   ;;  %v2342_v55 = vld [vmem:[%s2415_s27 + $0x120] sm:$0xff]  }
  0x24   : > { %v2339_v52 = vld [vmem:[%s2415_s27 + $0x174] sm:$0xff]   ;;  %v2341_v54 = vld [vmem:[%s2415_s27 + $0x17c] sm:$0xff]   ;;  %v2343_v56 = vld [vmem:[%s2415_s27 + $0x184] sm:$0xff]  }
  0x25   : > { %v2344_v57 = vld [vmem:[%s2415_s27 + $0x128] ss:$0 sps:$4 sm:$0x33]   ;;  %v2345_v58 = vld [vmem:[%s2415_s27 + $0x18c] ss:$0 sps:$4 sm:$0x33]  }
  0x26   : > { %2068 = vmatmul.mubr.msk.bf16.gmra.mrb[8].mxu0 %vm329_vm3, %v2298_v11  ;;  %2124 = vmatmul.mubr.msk.bf16.gmra.mrb[8].mxu1 %vm329_vm3, %v2299_v12 }
  0x27   : > { %2071 = vmatprep.mubr.msk.bf16.mxu0 %vm2356_vm2, %v2354_v1  ;;  %2127 = vmatprep.mubr.msk.bf16.mxu1 %vm2356_vm2, %v2354_v1 }
  0x2e   : > { %2072 = vmatmul.mubr.msk.bf16.gmra.mrb[12].mxu0 %vm329_vm3, %v2300_v13  ;;  %2128 = vmatmul.mubr.msk.bf16.gmra.mrb[12].mxu1 %vm329_vm3, %v2301_v14 }
  0x2f   : > { %2075 = vmatprep.mubr.msk.bf16.mxu0 %vm2356_vm2, %v2354_v1  ;;  %2131 = vmatprep.mubr.msk.bf16.mxu1 %vm2356_vm2, %v2354_v1 }
  0x36   : > { %2076 = vmatmul.mubr.msk.bf16.gmra.mrb[16].mxu0 %vm329_vm3, %v2302_v15  ;;  %2132 = vmatmul.mubr.msk.bf16.gmra.mrb[16].mxu1 %vm329_vm3, %v2303_v16 }
  0x37   : > { %2079 = vmatprep.mubr.msk.bf16.mxu0 %vm2356_vm2, %v2354_v1  ;;  %2135 = vmatprep.mubr.msk.bf16.mxu1 %vm2356_vm2, %v2354_v1 }
  0x3e   : > { %2080 = vmatmul.mubr.msk.bf16.gmra.mrb[20].mxu0 %vm329_vm3, %v2304_v17  ;;  %2136 = vmatmul.mubr.msk.bf16.gmra.mrb[20].mxu1 %vm329_vm3, %v2305_v18 }
  0x3f   : > { %2083 = vmatprep.mubr.msk.bf16.mxu0 %vm2356_vm2, %v2354_v1  ;;  %2139 = vmatprep.mubr.msk.bf16.mxu1 %vm2356_vm2, %v2354_v1 }
  0x46   : > { %2084 = vmatmul.mubr.msk.bf16.gmra.mrb[24].mxu0 %vm329_vm3, %v2306_v19  ;;  %2140 = vmatmul.mubr.msk.bf16.gmra.mrb[24].mxu1 %vm329_vm3, %v2307_v20 }
  0x47   : > { %2087 = vmatprep.mubr.msk.bf16.mxu0 %vm2356_vm2, %v2354_v1  ;;  %2143 = vmatprep.mubr.msk.bf16.mxu1 %vm2356_vm2, %v2354_v1 }
  0x4e   : > { %2088 = vmatmul.mubr.msk.bf16.gmra.mrb[28].mxu0 %vm329_vm3, %v2308_v21  ;;  %2144 = vmatmul.mubr.msk.bf16.gmra.mrb[28].mxu1 %vm329_vm3, %v2309_v22 }
  0x4f   : > { %2091 = vmatprep.mubr.msk.bf16.mxu0 %vm2356_vm2, %v2354_v1  ;;  %2147 = vmatprep.mubr.msk.bf16.mxu1 %vm2356_vm2, %v2354_v1 }
  0x56   : > { %2092 = vmatmul.mubr.msk.bf16.gmra.mrb[32].mxu0 %vm329_vm3, %v2310_v23  ;;  %2148 = vmatmul.mubr.msk.bf16.gmra.mrb[32].mxu1 %vm329_vm3, %v2311_v24 }
  0x57   : > { %2095 = vmatprep.mubr.msk.bf16.mxu0 %vm2356_vm2, %v2354_v1  ;;  %2151 = vmatprep.mubr.msk.bf16.mxu1 %vm2356_vm2, %v2354_v1 }
  0x5e   : > { %2096 = vmatmul.mubr.msk.bf16.gmra.mrb[36].mxu0 %vm329_vm3, %v2312_v25  ;;  %2152 = vmatmul.mubr.msk.bf16.gmra.mrb[36].mxu1 %vm329_vm3, %v2313_v26 }
  0x5f   : > { %2099 = vmatprep.mubr.msk.bf16.mxu0 %vm2356_vm2, %v2354_v1  ;;  %2155 = vmatprep.mubr.msk.bf16.mxu1 %vm2356_vm2, %v2354_v1 }
  0x66   : > { %2100 = vmatmul.mubr.msk.bf16.gmra.mrb[40].mxu0 %vm329_vm3, %v2314_v27  ;;  %2156 = vmatmul.mubr.msk.bf16.gmra.mrb[40].mxu1 %vm329_vm3, %v2315_v28 }
  0x67   : > { %2103 = vmatprep.mubr.msk.bf16.mxu0 %vm2356_vm2, %v2354_v1  ;;  %2159 = vmatprep.mubr.msk.bf16.mxu1 %vm2356_vm2, %v2354_v1 }
  0x6e   : > { %2104 = vmatmul.mubr.msk.bf16.gmra.mrb[44].mxu0 %vm329_vm3, %v2316_v29  ;;  %2160 = vmatmul.mubr.msk.bf16.gmra.mrb[44].mxu1 %vm329_vm3, %v2317_v30 }
  0x6f   : > { %2107 = vmatprep.mubr.msk.bf16.mxu0 %vm2356_vm2, %v2354_v1  ;;  %2163 = vmatprep.mubr.msk.bf16.mxu1 %vm2356_vm2, %v2354_v1 }
  0x76   : > { %2108 = vmatmul.mubr.msk.bf16.gmra.mrb[48].mxu0 %vm329_vm3, %v2318_v31  ;;  %2164 = vmatmul.mubr.msk.bf16.gmra.mrb[48].mxu1 %vm329_vm3, %v2319_v32 }
  0x77   : > { %2171 = vmatprep.mubr.msk.bf16.mxu0 %vm2356_vm2, %v2354_v1  ;;  %2227 = vmatprep.mubr.msk.bf16.mxu1 %vm2356_vm2, %v2354_v1 }
  0x7e   : > { %2172 = vmatmul.mubr.msk.bf16.vlgmr.msra.gmra.mrb[52].mxu0 %vm329_vm3, %v2320_v33  ;;  %2228 = vmatmul.mubr.msk.bf16.vlgmr.msra.gmra.mrb[52].mxu1 %vm329_vm3, %v2321_v34 }
  0x7f   : > { %2175 = vmatprep.mubr.msk.bf16.mxu0 %vm2356_vm2, %v2354_v1  ;;  %2231 = vmatprep.mubr.msk.bf16.mxu1 %vm2356_vm2, %v2354_v1 }
  0x86   : > { %2176 = vmatmul.mubr.msk.bf16.gmra.mrb[56].mxu0 %vm329_vm3, %v2322_v35  ;;  %2232 = vmatmul.mubr.msk.bf16.gmra.mrb[56].mxu1 %vm329_vm3, %v2323_v36 }
  0x87   : > { %2179 = vmatprep.mubr.msk.bf16.mxu0 %vm2356_vm2, %v2354_v1  ;;  %2235 = vmatprep.mubr.msk.bf16.mxu1 %vm2356_vm2, %v2354_v1 }
  0x8e   : > { %2180 = vmatmul.mubr.msk.bf16.gmra.mrb[60].mxu0 %vm329_vm3, %v2324_v37  ;;  %2236 = vmatmul.mubr.msk.bf16.gmra.mrb[60].mxu1 %vm329_vm3, %v2325_v38 }
  0x8f   : > { %2183 = vmatprep.mubr.msk.bf16.mxu0 %vm2356_vm2, %v2354_v1  ;;  %2239 = vmatprep.mubr.msk.bf16.mxu1 %vm2356_vm2, %v2354_v1 }
  0x96   : > { %2184 = vmatmul.mubr.msk.bf16.gmra.mrb[64].mxu0 %vm329_vm3, %v2326_v39  ;;  %2240 = vmatmul.mubr.msk.bf16.gmra.mrb[64].mxu1 %vm329_vm3, %v2327_v40 }
  0x97   : > { %2187 = vmatprep.mubr.msk.bf16.mxu0 %vm2356_vm2, %v2354_v1  ;;  %2243 = vmatprep.mubr.msk.bf16.mxu1 %vm2356_vm2, %v2354_v1 }
  0x9e   : > { %2188 = vmatmul.mubr.msk.bf16.gmra.mrb[68].mxu0 %vm329_vm3, %v2328_v41  ;;  %2244 = vmatmul.mubr.msk.bf16.gmra.mrb[68].mxu1 %vm329_vm3, %v2329_v42 }
  0x9f   : > { %2191 = vmatprep.mubr.msk.bf16.mxu0 %vm2356_vm2, %v2354_v1  ;;  %2247 = vmatprep.mubr.msk.bf16.mxu1 %vm2356_vm2, %v2354_v1 }
  0xa6   : > { %2192 = vmatmul.mubr.msk.bf16.gmra.mrb[72].mxu0 %vm329_vm3, %v2330_v43  ;;  %2248 = vmatmul.mubr.msk.bf16.gmra.mrb[72].mxu1 %vm329_vm3, %v2331_v44 }
  0xa7   : > { %2195 = vmatprep.mubr.msk.bf16.mxu0 %vm2356_vm2, %v2354_v1  ;;  %2251 = vmatprep.mubr.msk.bf16.mxu1 %vm2356_vm2, %v2354_v1 }
  0xae   : > { %2196 = vmatmul.mubr.msk.bf16.gmra.mrb[76].mxu0 %vm329_vm3, %v2332_v45  ;;  %2252 = vmatmul.mubr.msk.bf16.gmra.mrb[76].mxu1 %vm329_vm3, %v2333_v46 }
  0xaf   : > { %2199 = vmatprep.mubr.msk.bf16.mxu0 %vm2356_vm2, %v2354_v1  ;;  %2255 = vmatprep.mubr.msk.bf16.mxu1 %vm2356_vm2, %v2354_v1 }
  0xb6   : > { %2200 = vmatmul.mubr.msk.bf16.gmra.mrb[80].mxu0 %vm329_vm3, %v2334_v47  ;;  %2256 = vmatmul.mubr.msk.bf16.gmra.mrb[80].mxu1 %vm329_vm3, %v2335_v48 }
  0xb7   : > { %2203 = vmatprep.mubr.msk.bf16.mxu0 %vm2356_vm2, %v2354_v1  ;;  %2259 = vmatprep.mubr.msk.bf16.mxu1 %vm2356_vm2, %v2354_v1 }
  0xbe   : > { %2204 = vmatmul.mubr.msk.bf16.gmra.mrb[84].mxu0 %vm329_vm3, %v2336_v49  ;;  %2260 = vmatmul.mubr.msk.bf16.gmra.mrb[84].mxu1 %vm329_vm3, %v2337_v50 }
  0xbf   : > { %2207 = vmatprep.mubr.msk.bf16.mxu0 %vm2356_vm2, %v2354_v1  ;;  %2263 = vmatprep.mubr.msk.bf16.mxu1 %vm2356_vm2, %v2354_v1 }
  0xc6   : > { %2208 = vmatmul.mubr.msk.bf16.gmra.mrb[88].mxu0 %vm329_vm3, %v2338_v51  ;;  %2264 = vmatmul.mubr.msk.bf16.gmra.mrb[88].mxu1 %vm329_vm3, %v2339_v52 }
  0xc7   : > { %2211 = vmatprep.mubr.msk.bf16.mxu0 %vm2356_vm2, %v2354_v1  ;;  %2267 = vmatprep.mubr.msk.bf16.mxu1 %vm2356_vm2, %v2354_v1 }
  0xce   : > { %2212 = vmatmul.mubr.msk.bf16.gmra.mrb[92].mxu0 %vm329_vm3, %v2340_v53  ;;  %2268 = vmatmul.mubr.msk.bf16.gmra.mrb[92].mxu1 %vm329_vm3, %v2341_v54 }
  0xcf   : > { %2215 = vmatprep.mubr.msk.bf16.mxu0 %vm2356_vm2, %v2354_v1  ;;  %2271 = vmatprep.mubr.msk.bf16.mxu1 %vm2356_vm2, %v2354_v1 }
  0xd6   : > { %2216 = vmatmul.mubr.msk.bf16.gmra.mrb[96].mxu0 %vm329_vm3, %v2342_v55  ;;  %2272 = vmatmul.mubr.msk.bf16.gmra.mrb[96].mxu1 %vm329_vm3, %v2343_v56 }
  0xd7   : > { %2219 = vmatprep.mubr.msk.bf16.mxu0 %vm2356_vm2, %v2354_v1  ;;  %2275 = vmatprep.mubr.msk.bf16.mxu1 %vm2356_vm2, %v2354_v1 }
  0xde   : > { %2220 = vmatmul.mubr.msk.bf16.gmra.mrb[100].mxu0 %vm329_vm3, %v2344_v57  ;;  %2276 = vmatmul.mubr.msk.bf16.gmra.mrb[100].mxu1 %vm329_vm3, %v2345_v58 }
  0xe9   : > { %v2625_v59 = vpop.f32.mrb[0].mxu0  ;;  %v2627_v60 = vpop.f32.mrb[0].mxu1 }
  0xea   : > { %v2061_v61 = vpop.f32.mrb[1].mxu0  ;;  %v2117_v63 = vpop.f32.mrb[1].mxu1 }
  0xeb   : > { %v2631_v0 = vpop.f32.mrb[2].mxu0  ;;  %v2633_v2 = vpop.f32.mrb[2].mxu1 }
  0xec   : > { %v2062_v1 = vpop.f32.mrb[3].mxu0  ;;  %v2118_v4 = vpop.f32.mrb[3].mxu1 }
  0xf1   : > { %v2637_v5 = vpop.f32.mrb[4].mxu0  ;;  %v2639_v6 = vpop.f32.mrb[4].mxu1 }
  0xf2   : > { %v2065_v7 = vpop.f32.mrb[5].mxu0  ;;  %v2121_v9 = vpop.f32.mrb[5].mxu1 }
  0xf3   : > { %v2643_v10 = vpop.f32.mrb[6].mxu0  ;;  %v2645_v11 = vpop.f32.mrb[6].mxu1 }
  0xf4   : > { %v2066_v12 = vpop.f32.mrb[7].mxu0  ;;  %v2122_v14 = vpop.f32.mrb[7].mxu1 }
  0xf9   : > { %v2649_v15 = vpop.f32.mrb[8].mxu0  ;;  %v2651_v16 = vpop.f32.mrb[8].mxu1 }
  0xfa   : > { %v2069_v17 = vpop.f32.mrb[9].mxu0  ;;  %v2125_v19 = vpop.f32.mrb[9].mxu1 }
  0xfb   : > { %v2655_v20 = vpop.f32.mrb[10].mxu0  ;;  %v2657_v21 = vpop.f32.mrb[10].mxu1 }
  0xfc   : > { %v2070_v22 = vpop.f32.mrb[11].mxu0  ;;  %v2126_v24 = vpop.f32.mrb[11].mxu1 }
 0x101   : > { %v2661_v25 = vpop.f32.mrb[12].mxu0  ;;  %v2663_v26 = vpop.f32.mrb[12].mxu1 }
 0x102   : > { %v2073_v27 = vpop.f32.mrb[13].mxu0  ;;  %v2129_v29 = vpop.f32.mrb[13].mxu1 }
 0x103   : > { %v2667_v30 = vpop.f32.mrb[14].mxu0  ;;  %v2669_v31 = vpop.f32.mrb[14].mxu1 }
 0x104   : > { %v2074_v32 = vpop.f32.mrb[15].mxu0  ;;  %v2130_v34 = vpop.f32.mrb[15].mxu1 }
 0x109   : > { %v2673_v35 = vpop.f32.mrb[16].mxu0  ;;  %v2675_v36 = vpop.f32.mrb[16].mxu1 }
 0x10a   : > { %v2077_v37 = vpop.f32.mrb[17].mxu0  ;;  %v2133_v39 = vpop.f32.mrb[17].mxu1 }
 0x10b   : > { %v2679_v40 = vpop.f32.mrb[18].mxu0  ;;  %v2681_v41 = vpop.f32.mrb[18].mxu1 }
 0x10c   : > { %v2078_v42 = vpop.f32.mrb[19].mxu0  ;;  %v2134_v44 = vpop.f32.mrb[19].mxu1 }
 0x111   : > { %v2685_v45 = vpop.f32.mrb[20].mxu0  ;;  %v2687_v46 = vpop.f32.mrb[20].mxu1 }
 0x112   : > { %v2081_v47 = vpop.f32.mrb[21].mxu0  ;;  %v2137_v49 = vpop.f32.mrb[21].mxu1 }
 0x113   : > { %v2691_v50 = vpop.f32.mrb[22].mxu0  ;;  %v2693_v51 = vpop.f32.mrb[22].mxu1 }
 0x114   : > { %v2082_v52 = vpop.f32.mrb[23].mxu0  ;;  %v2138_v54 = vpop.f32.mrb[23].mxu1 }
 0x119   : > { %v2697_v55 = vpop.f32.mrb[24].mxu0  ;;  %v2699_v56 = vpop.f32.mrb[24].mxu1 }
 0x11a   : > { %v2085_v57 = vpop.f32.mrb[25].mxu0  ;;  %v2141_v61 = vpop.f32.mrb[25].mxu1 }
 0x11b   : > { %v2703_v63 = vpop.f32.mrb[26].mxu0  ;;  %v2705_v1 = vpop.f32.mrb[26].mxu1 }
 0x11c   : > { %v2086_v4 = vpop.f32.mrb[27].mxu0  ;;  %v2142_v9 = vpop.f32.mrb[27].mxu1 }
 0x121   : > { %v2709_v12 = vpop.f32.mrb[28].mxu0  ;;  %v2711_v14 = vpop.f32.mrb[28].mxu1 }
 0x122   : > { %v2089_v17 = vpop.f32.mrb[29].mxu0  ;;  %v2145_v22 = vpop.f32.mrb[29].mxu1 }
 0x123   : > { %v2715_v24 = vpop.f32.mrb[30].mxu0  ;;  %v2717_v27 = vpop.f32.mrb[30].mxu1 }
 0x124   : > { %v2090_v29 = vpop.f32.mrb[31].mxu0  ;;  %v2146_v34 = vpop.f32.mrb[31].mxu1 }
 0x129   : > { %v2721_v37 = vpop.f32.mrb[32].mxu0  ;;  %v2723_v39 = vpop.f32.mrb[32].mxu1 }
 0x12a   : > { %v2093_v42 = vpop.f32.mrb[33].mxu0  ;;  %v2149_v47 = vpop.f32.mrb[33].mxu1 }
 0x12b   : > { %v2727_v49 = vpop.f32.mrb[34].mxu0  ;;  %v2729_v52 = vpop.f32.mrb[34].mxu1 }
 0x12c   : > { %v2094_v54 = vpop.f32.mrb[35].mxu0  ;;  %v2150_v61 = vpop.f32.mrb[35].mxu1 }
 0x131   : > { %v2733_v4 = vpop.f32.mrb[36].mxu0  ;;  %v2735_v9 = vpop.f32.mrb[36].mxu1 }
 0x132   : > { %v2097_v17 = vpop.f32.mrb[37].mxu0  ;;  %v2153_v29 = vpop.f32.mrb[37].mxu1 }
 0x133   : > { %v2739_v34 = vpop.f32.mrb[38].mxu0  ;;  %v2741_v42 = vpop.f32.mrb[38].mxu1 }
 0x134   : > { %v2098_v47 = vpop.f32.mrb[39].mxu0  ;;  %v2154_v44 = vpop.f32.mrb[39].mxu1 }
 0x139   : > { %v2745_v57 = vpop.f32.mrb[40].mxu0  ;;  %v2747_v61 = vpop.f32.mrb[40].mxu1 }
 0x13a   : > { %v2101_v32 = vpop.f32.mrb[41].mxu0  ;;  %v2157_v19 = vpop.f32.mrb[41].mxu1 }
 0x13b   : > { %v2751_v22 = vpop.f32.mrb[42].mxu0  ;;  %v2753_v29 = vpop.f32.mrb[42].mxu1 }
 0x13c   : > { %v2102_v7 = vpop.f32.mrb[43].mxu0  ;;  %v2158_v58 = vpop.f32.mrb[43].mxu1 }
 0x141   : > { %v2757_v54 = vpop.f32.mrb[44].mxu0  ;;  %v2759_v44 = vpop.f32.mrb[44].mxu1 }
 0x142   : > { %v2105_v53 = vpop.f32.mrb[45].mxu0  ;;  %v2161_v48 = vpop.f32.mrb[45].mxu1 }
 0x143   : > { %v2763_v17 = vpop.f32.mrb[46].mxu0  ;;  %v2765_v19 = vpop.f32.mrb[46].mxu1 }
 0x144   : > { %2969 = vst [vmem:[#allocation2_spill] sm:$0xff] %v2765_v19  ;;  %v2106_v43 = vpop.f32.mrb[47].mxu0  ;;  %v2162_v38 = vpop.f32.mrb[47].mxu1 }
 0x145   : > { %v2778_v38 = vld [vmem:[%s2964_s2] ss:$0 sm:$0xff] }
 0x149   : > { %v2769_v47 = vpop.f32.mrb[48].mxu0  ;;  %v2771_v58 = vpop.f32.mrb[48].mxu1 }
 0x14a   : > { %v2109_v33 = vpop.f32.mrb[49].mxu0  ;;  %v2165_v28 = vpop.f32.mrb[49].mxu1 }
 0x14b   : > { %v509_v32 = vpop.f32.mrb[50].mxu0  ;;  %v773_v48 = vpop.f32.mrb[50].mxu1  ;;  %v2970_v28 = vmax.f32 %v2625_v59, %v2627_v60 }
 0x14c   : > { %v2110_v23 = vpop.f32.mrb[51].mxu0  ;;  %v2166_v18 = vpop.f32.mrb[51].mxu1 }
 0x151   : > { %v938_v13 = vpop.f32.mrb[52].mxu0  ;;  %v1202_v8 = vpop.f32.mrb[52].mxu1 }
 0x152   : > { %v2173_v43 = vpop.f32.mrb[53].mxu0  ;;  %v1329_v3 = vmax.f32 %v938_v13, %v1202_v8  ;;  %v2229_v62 = vpop.f32.mrb[53].mxu1  ;;  %v2790_v13 = vld [vmem:[%s2965_s3] ss:$0 sm:$0xff] }
 0x153   : > { %v941_v7 = vpop.f32.mrb[54].mxu0  ;;  %v1205_v33 = vpop.f32.mrb[54].mxu1  ;;  %v2971_v62 = vmax.f32 %v2631_v0, %v2633_v2  ;;  %v2797_v0 = vld [vmem:[%s2966_s4] ss:$0 sm:$0xff] }
 0x154   : > { %v2174_v19 = vpop.f32.mrb[55].mxu0  ;;  %v1354_v32 = vmax.f32 %v2970_v28, %v1329_v3  ;;  %v1330_v48 = vmax.f32 %v941_v7, %v1205_v33  ;;  %v2230_v18 = vpop.f32.mrb[55].mxu1 }
 0x156   : > { %v1386_v23 = vadd.f32 %v2778_v38, %v1354_v32  ;;  %v1355_v8 = vmax.f32 %v2971_v62, %v1330_v48 }
 0x158   : > { %v1411_v43 = vmax.f32 %v1386_v23, 0.0  ;;  %v1387_v19 = vadd.f32 %v2778_v38, %v1355_v8  ;;  %v2972_v23 = vmax.f32 %v2637_v5, %v2639_v6 }
 0x159   : > { %v946_v53 = vpop.f32.mrb[56].mxu0  ;;  %v1210_v59 = vpop.f32.mrb[56].mxu1 }
 0x15a   : > { %v2177_v60 = vpop.f32.mrb[57].mxu0  ;;  %v1443_v3 = vmul.f32 %v2790_v13, %v1411_v43  ;;  %v1412_v7 = vmax.f32 %v1387_v19, 0.0  ;;  %v1331_v33 = vmax.f32 %v946_v53, %v1210_v59  ;;  %v2233_v28 = vpop.f32.mrb[57].mxu1 }
 0x15b   : > { %v949_v32 = vpop.f32.mrb[58].mxu0  ;;  %v1213_v2 = vpop.f32.mrb[58].mxu1  ;;  %v2973_v60 = vmax.f32 %v2643_v10, %v2645_v11 }
 0x15c   : > { %v2178_v48 = vpop.f32.mrb[59].mxu0  ;;  %v1444_v18 = vmul.f32 %v2790_v13, %v1412_v7  ;;  %v1356_v62 = vmax.f32 %v2972_v23, %v1331_v33  ;;  %v1332_v8 = vmax.f32 %v949_v32, %v1213_v2  ;;  %v2234_v43 = vpop.f32.mrb[59].mxu1  ;;  %v1475_v53 = vadd.f32 %v2797_v0, %v1443_v3 }
 0x15d   : > { %v2974_v43 = vmax.f32 %v2649_v15, %v2651_v16 }
 0x15e   : > { %v1476_v19 = vadd.f32 %v2797_v0, %v1444_v18  ;;  %v1388_v59 = vadd.f32 %v2778_v38, %v1356_v62  ;;  %v1357_v28 = vmax.f32 %v2973_v60, %v1332_v8 }
 0x160   : > { %v1927_v5 = vpack.c.bf16 %v1476_v19, %v1475_v53  ;;  %v1413_v6 = vmax.f32 %v1388_v59, 0.0  ;;  %v1389_v7 = vadd.f32 %v2778_v38, %v1357_v28 }
 0x161   : > { %v954_v33 = vpop.f32.mrb[60].mxu0  ;;  %v1218_v3 = vpop.f32.mrb[60].mxu1 }
 0x162   : > { %v2181_v32 = vpop.f32.mrb[61].mxu0  ;;  %1928 = vst [vmem:[%s2813_s12] sm:$0xff] %v1927_v5   ;;  %v1445_v2 = vmul.f32 %v2790_v13, %v1413_v6  ;;  %v1414_v48 = vmax.f32 %v1389_v7, 0.0  ;;  %v1333_v18 = vmax.f32 %v954_v33, %v1218_v3  ;;  %v2237_v10 = vpop.f32.mrb[61].mxu1  ;;  %v2975_v6 = vmax.f32 %v2655_v20, %v2657_v21 }
 0x163   : > { %v957_v11 = vpop.f32.mrb[62].mxu0  ;;  %v1221_v23 = vpop.f32.mrb[62].mxu1  ;;  %v2976_v21 = vmax.f32 %v2661_v25, %v2663_v26 }
 0x164   : > { %v2182_v62 = vpop.f32.mrb[63].mxu0  ;;  %v1446_v8 = vmul.f32 %v2790_v13, %v1414_v48  ;;  %v1358_v53 = vmax.f32 %v2974_v43, %v1333_v18  ;;  %v1334_v19 = vmax.f32 %v957_v11, %v1221_v23  ;;  %v2238_v59 = vpop.f32.mrb[63].mxu1  ;;  %v1477_v60 = vadd.f32 %v2797_v0, %v1445_v2 }
 0x166   : > { %v1478_v28 = vadd.f32 %v2797_v0, %v1446_v8  ;;  %v1390_v5 = vadd.f32 %v2778_v38, %v1358_v53  ;;  %v1359_v7 = vmax.f32 %v2975_v6, %v1334_v19 }
 0x168   : > { %v1932_v33 = vpack.c.bf16 %v1478_v28, %v1477_v60  ;;  %v1415_v3 = vmax.f32 %v1390_v5, 0.0  ;;  %v1391_v32 = vadd.f32 %v2778_v38, %v1359_v7  ;;  %v2977_v5 = vmax.f32 %v2667_v30, %v2669_v31 }
 0x169   : > { %v962_v48 = vpop.f32.mrb[64].mxu0  ;;  %v1226_v10 = vpop.f32.mrb[64].mxu1  ;;  %v2978_v31 = vmax.f32 %v2673_v35, %v2675_v36 }
 0x16a   : > { %v2185_v15 = vpop.f32.mrb[65].mxu0  ;;  %1984 = vst [vmem:[%s2813_s12 + $0x8] sm:$0xff] %v1932_v33   ;;  %v1447_v16 = vmul.f32 %v2790_v13, %v1415_v3  ;;  %v1416_v18 = vmax.f32 %v1391_v32, 0.0  ;;  %v1335_v2 = vmax.f32 %v962_v48, %v1226_v10  ;;  %v2241_v11 = vpop.f32.mrb[65].mxu1 }
 0x16b   : > { %v965_v23 = vpop.f32.mrb[66].mxu0  ;;  %v1229_v62 = vpop.f32.mrb[66].mxu1 }
 0x16c   : > { %v2186_v8 = vpop.f32.mrb[67].mxu0  ;;  %v1448_v20 = vmul.f32 %v2790_v13, %v1416_v18  ;;  %v1360_v43 = vmax.f32 %v2976_v21, %v1335_v2  ;;  %v1336_v53 = vmax.f32 %v965_v23, %v1229_v62  ;;  %v2242_v19 = vpop.f32.mrb[67].mxu1  ;;  %v1479_v59 = vadd.f32 %v2797_v0, %v1447_v16 }
 0x16e   : > { %v1480_v60 = vadd.f32 %v2797_v0, %v1448_v20  ;;  %v1392_v28 = vadd.f32 %v2778_v38, %v1360_v43  ;;  %v1361_v6 = vmax.f32 %v2977_v5, %v1336_v53  ;;  %v2979_v53 = vmax.f32 %v2679_v40, %v2681_v41 }
 0x16f   : > { %v2980_v41 = vmax.f32 %v2685_v45, %v2687_v46 }
 0x170   : > { %v1937_v7 = vpack.c.bf16 %v1480_v60, %v1479_v59  ;;  %v1417_v33 = vmax.f32 %v1392_v28, 0.0  ;;  %v1393_v3 = vadd.f32 %v2778_v38, %v1361_v6 }
 0x171   : > { %v970_v32 = vpop.f32.mrb[68].mxu0  ;;  %v1234_v48 = vpop.f32.mrb[68].mxu1 }
 0x172   : > { %v2189_v25 = vpop.f32.mrb[69].mxu0  ;;  %1985 = vst [vmem:[%s2813_s12 + $0x10] sm:$0xff] %v1937_v7   ;;  %v1449_v26 = vmul.f32 %v2790_v13, %v1417_v33  ;;  %v1418_v10 = vmax.f32 %v1393_v3, 0.0  ;;  %v1337_v15 = vmax.f32 %v970_v32, %v1234_v48  ;;  %v2245_v16 = vpop.f32.mrb[69].mxu1 }
 0x173   : > { %v973_v18 = vpop.f32.mrb[70].mxu0  ;;  %v1237_v2 = vpop.f32.mrb[70].mxu1 }
 0x174   : > { %v2190_v11 = vpop.f32.mrb[71].mxu0  ;;  %v1450_v30 = vmul.f32 %v2790_v13, %v1418_v10  ;;  %v1362_v23 = vmax.f32 %v2978_v31, %v1337_v15  ;;  %v1338_v62 = vmax.f32 %v973_v18, %v1237_v2  ;;  %v2246_v8 = vpop.f32.mrb[71].mxu1  ;;  %v1481_v20 = vadd.f32 %v2797_v0, %v1449_v26 }
 0x175   : > { %v2981_v11 = vmax.f32 %v2691_v50, %v2693_v51  ;;  %v2982_v51 = vmax.f32 %v2697_v55, %v2699_v56 }
 0x176   : > { %v1482_v21 = vadd.f32 %v2797_v0, %v1450_v30  ;;  %v1394_v43 = vadd.f32 %v2778_v38, %v1362_v23  ;;  %v1363_v19 = vmax.f32 %v2979_v53, %v1338_v62 }
 0x178   : > { %v1942_v59 = vpack.c.bf16 %v1482_v21, %v1481_v20  ;;  %v1419_v60 = vmax.f32 %v1394_v43, 0.0  ;;  %v1395_v28 = vadd.f32 %v2778_v38, %v1363_v19 }
 0x179   : > { %v978_v5 = vpop.f32.mrb[72].mxu0  ;;  %v1242_v6 = vpop.f32.mrb[72].mxu1 }
 0x17a   : > { %v2193_v35 = vpop.f32.mrb[73].mxu0  ;;  %1986 = vst [vmem:[%s2813_s12 + $0x18] sm:$0xff] %v1942_v59   ;;  %v1451_v36 = vmul.f32 %v2790_v13, %v1419_v60  ;;  %v1420_v7 = vmax.f32 %v1395_v28, 0.0  ;;  %v1339_v33 = vmax.f32 %v978_v5, %v1242_v6  ;;  %v2249_v3 = vpop.f32.mrb[73].mxu1 }
 0x17b   : > { %v981_v32 = vpop.f32.mrb[74].mxu0  ;;  %v1245_v48 = vpop.f32.mrb[74].mxu1 }
 0x17c   : > { %v2194_v25 = vpop.f32.mrb[75].mxu0  ;;  %v1452_v40 = vmul.f32 %v2790_v13, %v1420_v7  ;;  %v1364_v26 = vmax.f32 %v2980_v41, %v1339_v33  ;;  %v1340_v10 = vmax.f32 %v981_v32, %v1245_v48  ;;  %v2250_v15 = vpop.f32.mrb[75].mxu1  ;;  %v1483_v16 = vadd.f32 %v2797_v0, %v1451_v36 }
 0x17d   : > { %v2983_v33 = vmax.f32 %v2703_v63, %v2705_v1  ;;  %v2984_v1 = vmax.f32 %v2709_v12, %v2711_v14 }
 0x17e   : > { %v1484_v18 = vadd.f32 %v2797_v0, %v1452_v40  ;;  %v1396_v2 = vadd.f32 %v2778_v38, %v1364_v26  ;;  %v1365_v30 = vmax.f32 %v2981_v11, %v1340_v10 }
 0x180   : > { %v1947_v31 = vpack.c.bf16 %v1484_v18, %v1483_v16  ;;  %v1421_v23 = vmax.f32 %v1396_v2, 0.0  ;;  %v1397_v62 = vadd.f32 %v2778_v38, %v1365_v30 }
 0x181   : > { %v986_v8 = vpop.f32.mrb[76].mxu0  ;;  %v1250_v20 = vpop.f32.mrb[76].mxu1 }
 0x182   : > { %v2197_v45 = vpop.f32.mrb[77].mxu0  ;;  %1987 = vst [vmem:[%s2813_s12 + $0x20] sm:$0xff] %v1947_v31   ;;  %v1453_v46 = vmul.f32 %v2790_v13, %v1421_v23  ;;  %v1422_v21 = vmax.f32 %v1397_v62, 0.0  ;;  %v1341_v43 = vmax.f32 %v986_v8, %v1250_v20  ;;  %v2253_v53 = vpop.f32.mrb[77].mxu1  ;;  %v2985_v20 = vmax.f32 %v2715_v24, %v2717_v27 }
 0x183   : > { %v989_v19 = vpop.f32.mrb[78].mxu0  ;;  %v1253_v59 = vpop.f32.mrb[78].mxu1  ;;  %v2986_v27 = vmax.f32 %v2721_v37, %v2723_v39 }
 0x184   : > { %v2198_v60 = vpop.f32.mrb[79].mxu0  ;;  %v1454_v50 = vmul.f32 %v2790_v13, %v1422_v21  ;;  %v1366_v28 = vmax.f32 %v2982_v51, %v1341_v43  ;;  %v1342_v5 = vmax.f32 %v989_v19, %v1253_v59  ;;  %v2254_v6 = vpop.f32.mrb[79].mxu1  ;;  %v1485_v35 = vadd.f32 %v2797_v0, %v1453_v46 }
 0x186   : > { %v1486_v36 = vadd.f32 %v2797_v0, %v1454_v50  ;;  %v1398_v7 = vadd.f32 %v2778_v38, %v1366_v28  ;;  %v1367_v3 = vmax.f32 %v2983_v33, %v1342_v5 }
 0x188   : > { %v1952_v32 = vpack.c.bf16 %v1486_v36, %v1485_v35  ;;  %v1423_v48 = vmax.f32 %v1398_v7, 0.0  ;;  %v1399_v25 = vadd.f32 %v2778_v38, %v1367_v3 }
 0x189   : > { %v994_v40 = vpop.f32.mrb[80].mxu0  ;;  %v1258_v41 = vpop.f32.mrb[80].mxu1 }
 0x18a   : > { %v2201_v55 = vpop.f32.mrb[81].mxu0  ;;  %1988 = vst [vmem:[%s2813_s12 + $0x28] sm:$0xff] %v1952_v32   ;;  %v1455_v56 = vmul.f32 %v2790_v13, %v1423_v48  ;;  %v1424_v26 = vmax.f32 %v1399_v25, 0.0  ;;  %v1343_v10 = vmax.f32 %v994_v40, %v1258_v41  ;;  %v2257_v15 = vpop.f32.mrb[81].mxu1  ;;  %v2987_v32 = vmax.f32 %v2727_v49, %v2729_v52 }
 0x18b   : > { %v997_v16 = vpop.f32.mrb[82].mxu0  ;;  %v1261_v18 = vpop.f32.mrb[82].mxu1  ;;  %v2988_v52 = vmax.f32 %v2733_v4, %v2735_v9 }
 0x18c   : > { %v2202_v2 = vpop.f32.mrb[83].mxu0  ;;  %v1456_v63 = vmul.f32 %v2790_v13, %v1424_v26  ;;  %v1368_v11 = vmax.f32 %v2984_v1, %v1343_v10  ;;  %v1344_v30 = vmax.f32 %v997_v16, %v1261_v18  ;;  %v2258_v31 = vpop.f32.mrb[83].mxu1  ;;  %v1487_v23 = vadd.f32 %v2797_v0, %v1455_v56 }
 0x18e   : > { %v1488_v62 = vadd.f32 %v2797_v0, %v1456_v63  ;;  %v1400_v8 = vadd.f32 %v2778_v38, %v1368_v11  ;;  %v1369_v45 = vmax.f32 %v2985_v20, %v1344_v30 }
 0x190   : > { %v1957_v46 = vpack.c.bf16 %v1488_v62, %v1487_v23  ;;  %v1425_v21 = vmax.f32 %v1400_v8, 0.0  ;;  %v1401_v43 = vadd.f32 %v2778_v38, %v1369_v45  ;;  %v2989_v62 = vmax.f32 %v2739_v34, %v2741_v42 }
 0x191   : > { %v1002_v53 = vpop.f32.mrb[84].mxu0  ;;  %v1266_v19 = vpop.f32.mrb[84].mxu1  ;;  %v2990_v42 = vmax.f32 %v2745_v57, %v2747_v61 }
 0x192   : > { %v2205_v12 = vpop.f32.mrb[85].mxu0  ;;  %1989 = vst [vmem:[%s2813_s12 + $0x30] sm:$0xff] %v1957_v46   ;;  %v1457_v14 = vmul.f32 %v2790_v13, %v1425_v21  ;;  %v1426_v59 = vmax.f32 %v1401_v43, 0.0  ;;  %v1345_v60 = vmax.f32 %v1002_v53, %v1266_v19  ;;  %v2261_v50 = vpop.f32.mrb[85].mxu1 }
 0x193   : > { %v1005_v51 = vpop.f32.mrb[86].mxu0  ;;  %v1269_v28 = vpop.f32.mrb[86].mxu1 }
 0x194   : > { %v2206_v5 = vpop.f32.mrb[87].mxu0  ;;  %v1458_v24 = vmul.f32 %v2790_v13, %v1426_v59  ;;  %v1370_v6 = vmax.f32 %v2986_v27, %v1345_v60  ;;  %v1346_v35 = vmax.f32 %v1005_v51, %v1269_v28  ;;  %v2262_v36 = vpop.f32.mrb[87].mxu1  ;;  %v1489_v7 = vadd.f32 %v2797_v0, %v1457_v14 }
 0x196   : > { %v1490_v33 = vadd.f32 %v2797_v0, %v1458_v24  ;;  %v1402_v3 = vadd.f32 %v2778_v38, %v1370_v6  ;;  %v1371_v48 = vmax.f32 %v2987_v32, %v1346_v35  ;;  %v2991_v6 = vmax.f32 %v2751_v22, %v2753_v29 }
 0x197   : > { %v2992_v29 = vmax.f32 %v2757_v54, %v2759_v44 }
 0x198   : > { %v1962_v25 = vpack.c.bf16 %v1490_v33, %v1489_v7  ;;  %v1427_v40 = vmax.f32 %v1402_v3, 0.0  ;;  %v1403_v41 = vadd.f32 %v2778_v38, %v1371_v48 }
 0x199   : > { %v1010_v55 = vpop.f32.mrb[88].mxu0  ;;  %v1274_v56 = vpop.f32.mrb[88].mxu1 }
 0x19a   : > { %v2209_v37 = vpop.f32.mrb[89].mxu0  ;;  %1990 = vst [vmem:[%s2813_s12 + $0x38] sm:$0xff] %v1962_v25   ;;  %v1459_v39 = vmul.f32 %v2790_v13, %v1427_v40  ;;  %v1428_v26 = vmax.f32 %v1403_v41, 0.0  ;;  %v1347_v10 = vmax.f32 %v1010_v55, %v1274_v56  ;;  %v2265_v15 = vpop.f32.mrb[89].mxu1 }
 0x19b   : > { %v1013_v16 = vpop.f32.mrb[90].mxu0  ;;  %v1277_v18 = vpop.f32.mrb[90].mxu1 }
 0x19c   : > { %v2210_v2 = vpop.f32.mrb[91].mxu0  ;;  %v1460_v49 = vmul.f32 %v2790_v13, %v1428_v26  ;;  %v1372_v63 = vmax.f32 %v2988_v52, %v1347_v10  ;;  %v1348_v1 = vmax.f32 %v1013_v16, %v1277_v18  ;;  %v2266_v11 = vpop.f32.mrb[91].mxu1  ;;  %v1491_v30 = vadd.f32 %v2797_v0, %v1459_v39  ;;  %v2993_v18 = vld [vmem:[#allocation2_spill] sm:$0xff] }
 0x19d   : > { %v2994_v2 = vmax.f32 %v2763_v17, %v2993_v18 }
 0x19e   : > { %v1492_v31 = vadd.f32 %v2797_v0, %v1460_v49  ;;  %v1404_v23 = vadd.f32 %v2778_v38, %v1372_v63  ;;  %v1373_v8 = vmax.f32 %v2989_v62, %v1348_v1 }
 0x1a0   : > { %v1967_v20 = vpack.c.bf16 %v1492_v31, %v1491_v30  ;;  %v1429_v45 = vmax.f32 %v1404_v23, 0.0  ;;  %v1405_v46 = vadd.f32 %v2778_v38, %v1373_v8 }
 0x1a1   : > { %v1018_v21 = vpop.f32.mrb[92].mxu0  ;;  %v1282_v43 = vpop.f32.mrb[92].mxu1 }
 0x1a2   : > { %v2213_v4 = vpop.f32.mrb[93].mxu0  ;;  %1991 = vst [vmem:[%s2813_s12 + $0x40] sm:$0xff] %v1967_v20   ;;  %v1461_v9 = vmul.f32 %v2790_v13, %v1429_v45  ;;  %v1430_v53 = vmax.f32 %v1405_v46, 0.0  ;;  %v1349_v19 = vmax.f32 %v1018_v21, %v1282_v43  ;;  %v2269_v12 = vpop.f32.mrb[93].mxu1  ;;  %v2995_v46 = vmax.f32 %v2769_v47, %v2771_v58 }
 0x1a3   : > { %v1021_v14 = vpop.f32.mrb[94].mxu0  ;;  %v1285_v59 = vpop.f32.mrb[94].mxu1 }
 0x1a4   : > { %v2214_v60 = vpop.f32.mrb[95].mxu0  ;;  %v1462_v34 = vmul.f32 %v2790_v13, %v1430_v53  ;;  %v1374_v50 = vmax.f32 %v2990_v42, %v1349_v19  ;;  %v1350_v51 = vmax.f32 %v1021_v14, %v1285_v59  ;;  %v2270_v28 = vpop.f32.mrb[95].mxu1  ;;  %v1493_v5 = vadd.f32 %v2797_v0, %v1461_v9 }
 0x1a6   : > { %v1494_v24 = vadd.f32 %v2797_v0, %v1462_v34  ;;  %v1406_v27 = vadd.f32 %v2778_v38, %v1374_v50  ;;  %v1375_v35 = vmax.f32 %v2991_v6, %v1350_v51 }
 0x1a8   : > { %v1972_v36 = vpack.c.bf16 %v1494_v24, %v1493_v5  ;;  %v1431_v7 = vmax.f32 %v1406_v27, 0.0  ;;  %v1407_v33 = vadd.f32 %v2778_v38, %v1375_v35 }
 0x1a9   : > { %v1026_v3 = vpop.f32.mrb[96].mxu0  ;;  %v1290_v32 = vpop.f32.mrb[96].mxu1 }
 0x1aa   : > { %v2217_v57 = vpop.f32.mrb[97].mxu0  ;;  %1992 = vst [vmem:[%s2813_s12 + $0x48] sm:$0xff] %v1972_v36   ;;  %v1463_v61 = vmul.f32 %v2790_v13, %v1431_v7  ;;  %v1432_v48 = vmax.f32 %v1407_v33, 0.0  ;;  %v1351_v25 = vmax.f32 %v1026_v3, %v1290_v32  ;;  %v2273_v40 = vpop.f32.mrb[97].mxu1 }
 0x1ab   : > { %v1029_v41 = vpop.f32.mrb[98].mxu0  ;;  %v1293_v55 = vpop.f32.mrb[98].mxu1 }
 0x1ac   : > { %v2218_v56 = vpop.f32.mrb[99].mxu0  ;;  %v1464_v22 = vmul.f32 %v2790_v13, %v1432_v48  ;;  %v1376_v37 = vmax.f32 %v2992_v29, %v1351_v25  ;;  %v1352_v39 = vmax.f32 %v1029_v41, %v1293_v55  ;;  %v2274_v26 = vpop.f32.mrb[99].mxu1  ;;  %v1495_v10 = vadd.f32 %v2797_v0, %v1463_v61 }
 0x1ae   : > { %v1496_v15 = vadd.f32 %v2797_v0, %v1464_v22  ;;  %v1408_v16 = vadd.f32 %v2778_v38, %v1376_v37  ;;  %v1377_v49 = vmax.f32 %v2994_v2, %v1352_v39 }
 0x1b0   : > { %v1977_v52 = vpack.c.bf16 %v1496_v15, %v1495_v10  ;;  %v1433_v63 = vmax.f32 %v1408_v16, 0.0  ;;  %v1409_v1 = vadd.f32 %v2778_v38, %v1377_v49 }
 0x1b1   : > { %v1034_v11 = vpop.f32.mrb[100].mxu0  ;;  %v1298_v30 = vpop.f32.mrb[100].mxu1 }
 0x1b2   : > { %v2221_v54 = vpop.f32.mrb[101].mxu0  ;;  %1993 = vst [vmem:[%s2813_s12 + $0x50] sm:$0xff] %v1977_v52   ;;  %v1465_v44 = vmul.f32 %v2790_v13, %v1433_v63  ;;  %v1434_v31 = vmax.f32 %v1409_v1, 0.0  ;;  %v1353_v23 = vmax.f32 %v1034_v11, %v1298_v30  ;;  %v2277_v62 = vpop.f32.mrb[101].mxu1 }
 0x1b3   : > { %v1037_v8 = vpop.f32.mrb[102].mxu0  ;;  %v1301_v20 = vpop.f32.mrb[102].mxu1 }
 0x1b4   : > { %v2222_v45 = vpop.f32.mrb[103].mxu0  ;;  %v1466_v17 = vmul.f32 %v2790_v13, %v1434_v31  ;;  %v1378_v21 = vmax.f32 %v2995_v46, %v1353_v23  ;;  %v2278_v43 = vpop.f32.mrb[103].mxu1  ;;  %v1497_v4 = vadd.f32 %v2797_v0, %v1465_v44 }
 0x1b6   : > { %v1498_v9 = vadd.f32 %v2797_v0, %v1466_v17  ;;  %v1410_v53 = vadd.f32 %v2778_v38, %v1378_v21 }
 0x1b8   : > { %v1982_v19 = vpack.c.bf16 %v1498_v9, %v1497_v4  ;;  %v1435_v12 = vmax.f32 %v1410_v53, 0.0 }
 0x1ba   : > { %1994 = vst [vmem:[%s2813_s12 + $0x58] sm:$0xff] %v1982_v19   ;;  %v1467_v14 = vmul.f32 %v2790_v13, %v1435_v12 }
 0x1bc   : > { %v1499_v59 = vadd.f32 %v2797_v0, %v1467_v14 }
 0x1be   : > { %v1923_v60 = vpack.c.bf16 %v1499_v59, %v1499_v59 }
 0x1c0   : > { %1625 = vst [vmem:[%s2813_s12 + $0x60] sm:$0x3] %v1923_v60 }
 0x1c1 PF: > { %s15_s18 = sadd.s32 1, %s2352_s18  }
 0x1c2   : > { %p12_p4 = scmp.ge.s32.totalorder %s15_s18, 4  }
 0x1c4   :  { %14 = sbr.rel (!%p12_p4) target bundleno = 1 (0x1), region = 73 }

// kernel: net_forward.4
= control target key start
LH: loop header
LB: loop body
LE: loop exit
PB: predicated region body
PF: predicated region fallthrough
CT: control target
= control target key end

     0   :  { %s2661_s18 = smov 0   ;;  %s3264_s0 = inlined_call_operand.vmem [shape: bf16[2,2,2,25,800], index: 0, kind: input, shape index: {}]   ;;  %s3265_s1 = inlined_call_operand.vmem [shape: bf16[800,128], index: 1, kind: input, shape index: {}]   ;;  %s3266_s2 = inlined_call_operand.vmem [shape: f32[1,128], index: 2, kind: input, shape index: {}]   ;;  %s3267_s3 = inlined_call_operand.vmem [shape: f32[1,128], index: 3, kind: input, shape index: {}]   ;;  %s3268_s4 = inlined_call_operand.vmem [shape: f32[1,128], index: 4, kind: input, shape index: {}]   ;;  %s3269_s5 = inlined_call_operand.vmem [shape: bf16[2,25,128], index: 5, kind: output, shape index: {}]  }
   0x1 LB: > { %s1911_s19 = sadd.s32 4294967295, %s2629_s18   ;;  %p1915_p0 = scmp.ge.s32.totalorder %s2629_s18, 1  ;;  %s2629_s18 = sphi %s2661_s18, %s15_s18  }
   0x2   : > { %p187_p1 = scmp.lt.s32.totalorder %s2629_s18, 3 }
   0x4   : > { %p188_p2 = pnand %p1915_p0, %p187_p1 }
   0x5   : > { %v2672_v0 = vld [vmem:[%s3265_s1 + $0x40] sm:$0xff] (!%p188_p2)   ;;  %v2695_v4 = vld [vmem:[%s3265_s1 + $0x48] sm:$0xff] (!%p188_p2)   ;;  %v2719_v8 = vld [vmem:[%s3265_s1 + $0x50] sm:$0xff] (!%p188_p2)   ;;  %p215_p3 = scmp.lt.s32.totalorder (!%p188_p2), %s1911_s19, 1  ;;  %vm712_vm0 = vcmask (!%p188_p2), 261120   ;;  %vm1850_vm1 = vcmask (!%p188_p2), 1040384  }
   0x6   : > { %191 = sbr.rel (%p188_p2) target bundleno = 477 (0x1dd), region = 40  ;;  %v2677_v1 = vld [vmem:[%s3265_s1 + $0xc0] sm:$0xff] (!%p188_p2)   ;;  %2100 = vmatprep.subr.bf16.mxu0 (!%p188_p2), %v2672_v0  ;;  %v2701_v5 = vld [vmem:[%s3265_s1 + $0xc8] sm:$0xff] (!%p188_p2)   ;;  %v2725_v9 = vld [vmem:[%s3265_s1 + $0xd0] sm:$0xff] (!%p188_p2)   ;;  %vm1851_vm2 = vsmask.f32 (!%p188_p2), 256 }
   0x7   : > { %v2683_v2 = vld [vmem:[%s3265_s1] sm:$0xff] (!%p188_p2)   ;;  %2128 = vmatprep.subr.bf16.mxu1 (!%p188_p2), %v2677_v1  ;;  %v2707_v6 = vld [vmem:[%s3265_s1 + $0x8] sm:$0xff] (!%p188_p2)   ;;  %v2731_v10 = vld [vmem:[%s3265_s1 + $0x10] sm:$0xff] (!%p188_p2)  }
   0x8   : > { %v2689_v3 = vld [vmem:[%s3265_s1 + $0x80] sm:$0xff] (!%p188_p2)   ;;  %2101 = vmatpush3.bf16.msra.mxu0 (!%p188_p2), %v2683_v2  ;;  %v2713_v7 = vld [vmem:[%s3265_s1 + $0x88] sm:$0xff] (!%p188_p2)   ;;  %v2737_v11 = vld [vmem:[%s3265_s1 + $0x90] sm:$0xff] (!%p188_p2)  }
   0x9   : > { %2129 = vmatpush3.bf16.msra.mxu1 (!%p188_p2), %v2689_v3  ;;  %2102 = vmatprep.subr.bf16.mxu0 (!%p188_p2), %v2695_v4  ;;  %v2743_v12 = vld [vmem:[%s3265_s1 + $0x58] sm:$0xff] (!%p188_p2)   ;;  %v2767_v16 = vld [vmem:[%s3265_s1 + $0x60] sm:$0xff] (!%p188_p2)   ;;  %v2793_v20 = vld [vmem:[%s3265_s1 + $0x68] sm:$0xff] (!%p188_p2)  }
   0xa   : > { %2130 = vmatprep.subr.bf16.mxu1 (!%p188_p2), %v2701_v5  ;;  %v2749_v13 = vld [vmem:[%s3265_s1 + $0xd8] sm:$0xff] (!%p188_p2)   ;;  %v2773_v17 = vld [vmem:[%s3265_s1 + $0xe0] sm:$0xff] (!%p188_p2)   ;;  %v2799_v21 = vld [vmem:[%s3265_s1 + $0xe8] sm:$0xff] (!%p188_p2)  }
   0xb   : > { %v2755_v14 = vld [vmem:[%s3265_s1 + $0x18] sm:$0xff] (!%p188_p2)   ;;  %v2781_v18 = vld [vmem:[%s3265_s1 + $0x20] sm:$0xff] (!%p188_p2)   ;;  %v2809_v22 = vld [vmem:[%s3265_s1 + $0x28] sm:$0xff] (!%p188_p2)  }
   0xc   : > { %2103 = vmatpush3.bf16.msra.mxu0 (!%p188_p2), %v2707_v6  ;;  %v2761_v15 = vld [vmem:[%s3265_s1 + $0x98] sm:$0xff] (!%p188_p2)   ;;  %v2787_v19 = vld [vmem:[%s3265_s1 + $0xa0] sm:$0xff] (!%p188_p2)   ;;  %v2815_v23 = vld [vmem:[%s3265_s1 + $0xa8] sm:$0xff] (!%p188_p2)  }
   0xd   : > { %2131 = vmatpush3.bf16.msra.mxu1 %v2713_v7  ;;  %2104 = vmatprep.subr.bf16.mxu0 %v2719_v8  ;;  %s3271_s19 = smov (!%p215_p3, %s1911_s19), 1  ;;  %v2821_v24 = vld [vmem:[%s3265_s1 + $0x70] sm:$0xff]   ;;  %v2846_v28 = vld [vmem:[%s3265_s1 + $0x78] sm:$0xff]   ;;  %v2880_v36 = vld [vmem:[%s3265_s1 + $0x140] sm:$0xff]  }
   0xe   : > { %2132 = vmatprep.subr.bf16.mxu1 %v2725_v9  ;;  %v2827_v25 = vld [vmem:[%s3265_s1 + $0xf0] sm:$0xff]   ;;  %s2484_s26 = smul.u32 448, %s3271_s19  ;;  %v2852_v29 = vld [vmem:[%s3265_s1 + $0xf8] sm:$0xff]   ;;  %v2885_v37 = vld [vmem:[%s3265_s1 + $0x180] sm:$0xff]   ;;  %s2090_s14 = sshll.u32 %s3271_s19, 4 }
   0xf   : > { %v2834_v26 = vld [vmem:[%s3265_s1 + $0x30] sm:$0xff]   ;;  %v2863_v30 = vld [vmem:[%s3265_s1 + $0x38] sm:$0xff]   ;;  %v2891_v38 = vld [vmem:[%s3265_s1 + $0x100] sm:$0xff]   ;;  %s224_s17 = scalar_lea.vmem %s3269_s5, %s2090_s14 }
  0x10   : > { %2105 = vmatpush3.bf16.msra.mxu0 %v2731_v10  ;;  %v2840_v27 = vld [vmem:[%s3265_s1 + $0xb0] sm:$0xff]   ;;  %s2857_s12 = scalar_lea.vmem %s3264_s0, %s2484_s26  ;;  %v2869_v31 = vld [vmem:[%s3265_s1 + $0xb8] sm:$0xff]   ;;  %v2897_v39 = vld [vmem:[%s3265_s1 + $0x148] sm:$0xff]  }
  0x11   : > { %2133 = vmatpush3.bf16.msra.mxu1 %v2737_v11  ;;  %2106 = vmatprep.subr.bf16.mxu0 %v2743_v12  ;;  %v2525_v32 = vld [vmem:[%s2857_s12] ss:$28 sps:$4 sm:$0xff]   ;;  %v2528_v34 = vld [vmem:[%s2857_s12 + $0x8] ss:$28 sps:$4 sm:$0xff]   ;;  %v2912_v43 = vld [vmem:[%s3265_s1 + $0x150] sm:$0xff]  }
  0x12   : > { %2134 = vmatprep.subr.bf16.mxu1 %v2749_v13  ;;  %v2527_v33 = vld [vmem:[%s2857_s12 + $0x4] ss:$28 sps:$4 sm:$0xff]   ;;  %v2530_v35 = vld [vmem:[%s2857_s12 + $0xc] ss:$28 sps:$4 sm:$0xff]   ;;  %v2926_v47 = vld [vmem:[%s3265_s1 + $0x110] sm:$0xff]  }
  0x13   : > { %751 = vmatprep.mubr.bf16.mxu0 %v2527_v33  ;;  %800 = vmatprep.mubr.bf16.mxu1 %v2530_v35  ;;  %v2904_v40 = vld [vmem:[%s3265_s1 + $0x108] sm:$0xff]   ;;  %v2536_v41 = vld [vmem:[%s2857_s12 + $0x3c] ss:$28 sps:$4 sm:$0x1f]   ;;  %v2947_v51 = vld [vmem:[%s3265_s1 + $0x160] sm:$0xff]  }
  0x14   : > { %2107 = vmatpush3.bf16.msra.mxu0 %v2755_v14  ;;  %v2538_v42 = vld [vmem:[%s2857_s12 + $0x44] ss:$28 sps:$4 sm:$0x1f]   ;;  %v2540_v44 = vld [vmem:[%s2857_s12 + $0x38] ss:$28 sps:$4 sm:$0x1f]   ;;  %vm1852_vm3 = vmand %vm1850_vm1, %vm1851_vm2 }
  0x15   : > { %2135 = vmatpush3.bf16.msra.mxu1 %v2761_v15  ;;  %2108 = vmatprep.subr.bf16.mxu0 %v2767_v16  ;;  %v2541_v45 = vld [vmem:[%s2857_s12 + $0x40] ss:$28 sps:$4 sm:$0x1f]   ;;  %v2921_v46 = vld [vmem:[%s3265_s1 + $0x188] sm:$0xff]   ;;  %v2547_v50 = vld [vmem:[%s2857_s12 + $0x18] ss:$28 sps:$4 sm:$0xff]  }
  0x16   : > { %2136 = vmatprep.subr.bf16.mxu1 %v2773_v17  ;;  %v2932_v48 = vld [vmem:[%s3265_s1 + $0x158] sm:$0xff]   ;;  %v2549_v52 = vld [vmem:[%s2857_s12 + $0x50] ss:$28 sps:$4 sm:$0x1f]   ;;  %v2954_v53 = vld [vmem:[%s3265_s1 + $0x120] sm:$0xff]  }
  0x17   : > { %v2939_v49 = vld [vmem:[%s3265_s1 + $0x118] sm:$0xff]   ;;  %v2961_v54 = vld [vmem:[%s3265_s1 + $0x168] sm:$0xff]   ;;  %v2976_v56 = vld [vmem:[%s3265_s1 + $0x170] sm:$0xff]  }
  0x18   : > { %2109 = vmatpush3.bf16.msra.mxu0 %v2781_v18  ;;  %v2970_v55 = vld [vmem:[%s3265_s1 + $0x128] sm:$0xff]   ;;  %v2559_v57 = vld [vmem:[%s2857_s12 + $0x14] ss:$28 sps:$4 sm:$0xff]   ;;  %v2991_v59 = vld [vmem:[%s3265_s1 + $0x178] sm:$0xff]  }
  0x19   : > { %2137 = vmatpush3.bf16.msra.mxu1 %v2787_v19  ;;  %2110 = vmatprep.subr.bf16.mxu0 %v2793_v20  ;;  %v2985_v58 = vld [vmem:[%s3265_s1 + $0x130] sm:$0xff]   ;;  %v3000_v61 = vld [vmem:[%s3265_s1 + $0x138] sm:$0xff]   ;;  %v2560_v63 = vld [vmem:[%s2857_s12 + $0x4c] ss:$28 sps:$4 sm:$0x1f]  }
  0x1a   : > { %2138 = vmatprep.subr.bf16.mxu1 %v2799_v21  ;;  %v2565_v60 = vld [vmem:[%s2857_s12 + $0x74] ss:$28 sps:$4 sm:$0xff]   ;;  %v2568_v33 = vld [vmem:[%s2857_s12 + $0x7c] ss:$28 sps:$4 sm:$0xff]  }
  0x1b   : > { %v2557_v62 = vld [vmem:[%s2857_s12 + $0x10] ss:$28 sps:$4 sm:$0xff]  }
  0x1c   : > { %2111 = vmatpush3.bf16.msra.mxu0 %v2809_v22  ;;  %v2569_v35 = vld [vmem:[%s2857_s12 + $0xac] ss:$28 sps:$4 sm:$0x1f]  }
  0x1d   : > { %2139 = vmatpush3.bf16.msra.mxu1 %v2815_v23  ;;  %2112 = vmatprep.subr.bf16.mxu0 %v2821_v24 }
  0x1e   : > { %2140 = vmatprep.subr.bf16.mxu1 %v2827_v25 }
  0x20   : > { %2113 = vmatpush3.bf16.msra.mxu0 %v2834_v26 }
  0x21   : > { %2141 = vmatpush3.bf16.msra.mxu1 %v2840_v27  ;;  %2114 = vmatprep.subr.bf16.mxu0 %v2846_v28 }
  0x22   : > { %2142 = vmatprep.subr.bf16.mxu1 %v2852_v29 }
  0x24   : > { %2115 = vmatpush3.bf16.msra.mxu0 %v2863_v30 }
  0x25   : > { %2143 = vmatpush3.bf16.msra.mxu1 %v2869_v31  ;;  %2156 = vmatprep.subr.bf16.mxu0 %v2880_v36 }
  0x26   : > { %2452 = vmatprep.subr.bf16.mxu1 %v2885_v37 }
  0x27   : > { %752 = vmatmul.mubr.bf16.vlgmr.msra.gmra.mrb[0].mxu0 %v2525_v32  ;;  %v2562_v32 = vld [vmem:[%s2857_s12 + $0x48] ss:$28 sps:$4 sm:$0x1f]  }
  0x28   : > { %801 = vmatmul.mubr.bf16.vlgmr.msra.gmra.mrb[0].mxu1 %v2528_v34  ;;  %2157 = vmatpush3.bf16.msra.mxu0 %v2891_v38  ;;  %v2563_v34 = vld [vmem:[%s2857_s12 + $0x70] ss:$28 sps:$4 sm:$0xff]  }
  0x29   : > { %2453 = vmatpush3.bf16.msra.mxu1 %v2885_v37  ;;  %2158 = vmatprep.subr.bf16.mxu0 %v2897_v39 }
  0x2a   : > { %759 = vmatprep.mubr.bf16.mxu0 %v2536_v41  ;;  %808 = vmatprep.mubr.bf16.mxu1 %v2538_v42  ;;  %v2571_v41 = vld [vmem:[%s2857_s12 + $0xa8] ss:$28 sps:$4 sm:$0x1f]  }
  0x2b   : > { %2454 = vmatprep.subr.bf16.mxu1 %v2921_v46  ;;  %v2577_v42 = vld [vmem:[%s2857_s12 + $0x84] ss:$28 sps:$4 sm:$0xff]  }
  0x2c   : > { %2159 = vmatpush3.bf16.msra.mxu0 %v2904_v40 }
  0x2d   : > { %2160 = vmatprep.subr.bf16.mxu0 %v2912_v43  ;;  %2455 = vmatpush3.bf16.msra.mxu1 %v2921_v46 }
  0x2e   : > { %2188 = vmatprep.subr.bf16.mxu1 %v2672_v0 }
  0x2f   : > { %760 = vmatmul.mubr.bf16.gmra.mrb[4].mxu0 %v2540_v44  ;;  %v2566_v44 = vld [vmem:[%s2857_s12 + $0x78] ss:$28 sps:$4 sm:$0xff]  }
  0x30   : > { %809 = vmatmul.mubr.bf16.gmra.mrb[4].mxu1 %v2541_v45  ;;  %2161 = vmatpush3.bf16.msra.mxu0 %v2926_v47  ;;  %v2572_v45 = vld [vmem:[%s2857_s12 + $0xb4] ss:$28 sps:$4 sm:$0x1f]  }
  0x31   : > { %2162 = vmatprep.subr.bf16.mxu0 %v2932_v48  ;;  %2456 = vmatprep.mubr.msk.bf16.mxu1 %vm712_vm0, %v2547_v50  ;;  %v2574_v50 = vld [vmem:[%s2857_s12 + $0xb0] ss:$28 sps:$4 sm:$0x1f]  }
  0x32   : > { %849 = vmatprep.mubr.bf16.mxu0 %v2559_v57  ;;  %v2575_v57 = vld [vmem:[%s2857_s12 + $0x80] ss:$28 sps:$4 sm:$0xff]  }
  0x34   : > { %2163 = vmatpush3.bf16.msra.mxu0 %v2939_v49 }
  0x35   : > { %2164 = vmatprep.subr.bf16.mxu0 %v2947_v51 }
  0x38   : > { %2457 = vmatmul.mubr.msk.bf16.vlgmr.msra.gmra.mrb[8].mxu1 %vm712_vm0, %v2549_v52  ;;  %2165 = vmatpush3.bf16.msra.mxu0 %v2954_v53  ;;  %v2578_v52 = vld [vmem:[%s2857_s12 + $0x88] ss:$28 sps:$4 sm:$0xff]  }
  0x39   : > { %2189 = vmatpush3.bf16.msra.mxu1 %v2683_v2  ;;  %2166 = vmatprep.subr.bf16.mxu0 %v2961_v54 }
  0x3a   : > { %2190 = vmatprep.subr.bf16.mxu1 %v2695_v4  ;;  %1040 = vmatprep.mubr.bf16.mxu1 %v2565_v60  ;;  %v2579_v60 = vld [vmem:[%s2857_s12 + $0xc0] ss:$28 sps:$4 sm:$0x1f]  }
  0x3c   : > { %2167 = vmatpush3.bf16.msra.mxu0 %v2970_v55 }
  0x3d   : > { %2191 = vmatpush3.bf16.msra.mxu1 %v2707_v6  ;;  %2168 = vmatprep.subr.bf16.mxu0 %v2976_v56 }
  0x3e   : > { %2192 = vmatprep.subr.bf16.mxu1 %v2719_v8 }
  0x40   : > { %2169 = vmatpush3.bf16.msra.mxu0 %v2985_v58 }
  0x41   : > { %2193 = vmatpush3.bf16.msra.mxu1 %v2731_v10  ;;  %2170 = vmatprep.subr.bf16.mxu0 %v2991_v59 }
  0x42   : > { %2194 = vmatprep.subr.bf16.mxu1 %v2743_v12 }
  0x44   : > { %2171 = vmatpush3.bf16.msra.mxu0 %v3000_v61 }
  0x45   : > { %2195 = vmatpush3.bf16.msra.mxu1 %v2755_v14  ;;  %2216 = vmatprep.subr.bf16.mxu0 %v2677_v1 }
  0x46   : > { %2196 = vmatprep.subr.bf16.mxu1 %v2767_v16 }
  0x47   : > { %850 = vmatmul.mubr.bf16.vlgmr.msra.gmra.mrb[8].mxu0 %v2557_v62  ;;  %v2580_v62 = vld [vmem:[%s2857_s12 + $0xbc] ss:$28 sps:$4 sm:$0x1f]  }
  0x48   : > { %2217 = vmatpush3.bf16.msra.mxu0 %v2689_v3  ;;  %857 = vmatprep.mubr.bf16.mxu0 %v2560_v63  ;;  %v2585_v63 = vld [vmem:[%s2857_s12 + $0xe4] ss:$28 sps:$4 sm:$0xff]  }
  0x49   : > { %2197 = vmatpush3.bf16.msra.mxu1 %v2781_v18  ;;  %2218 = vmatprep.subr.bf16.mxu0 %v2701_v5 }
  0x4a   : > { %2198 = vmatprep.subr.bf16.mxu1 %v2793_v20 }
  0x4c   : > { %2219 = vmatpush3.bf16.msra.mxu0 %v2713_v7 }
  0x4d   : > { %2199 = vmatpush3.bf16.msra.mxu1 %v2809_v22  ;;  %2220 = vmatprep.subr.bf16.mxu0 %v2725_v9 }
  0x4e   : > { %2200 = vmatprep.subr.bf16.mxu1 %v2821_v24 }
  0x4f   : > { %858 = vmatmul.mubr.bf16.gmra.mrb[12].mxu0 %v2562_v32  ;;  %v2582_v32 = vld [vmem:[%s2857_s12 + $0xb8] ss:$28 sps:$4 sm:$0x1f]  }
  0x50   : > { %2221 = vmatpush3.bf16.msra.mxu0 %v2737_v11  ;;  %1089 = vmatprep.mubr.bf16.mxu0 %v2568_v33  ;;  %v2588_v33 = vld [vmem:[%s2857_s12 + $0xec] ss:$28 sps:$4 sm:$0xff]  }
  0x51   : > { %2201 = vmatpush3.bf16.msra.mxu1 %v2834_v26  ;;  %2222 = vmatprep.subr.bf16.mxu0 %v2749_v13 }
  0x52   : > { %2202 = vmatprep.subr.bf16.mxu1 %v2846_v28 }
  0x54   : > { %2223 = vmatpush3.bf16.msra.mxu0 %v2761_v15 }
  0x55   : > { %2203 = vmatpush3.bf16.msra.mxu1 %v2863_v30  ;;  %2224 = vmatprep.subr.bf16.mxu0 %v2773_v17 }
  0x56   : > { %2244 = vmatprep.subr.bf16.mxu1 %v2880_v36 }
  0x58   : > { %1041 = vmatmul.mubr.bf16.vlgmr.msra.gmra.mrb[12].mxu1 %v2563_v34  ;;  %2225 = vmatpush3.bf16.msra.mxu0 %v2787_v19  ;;  %v2586_v34 = vld [vmem:[%s2857_s12 + $0xe8] ss:$28 sps:$4 sm:$0xff]  }
  0x59   : > { %2245 = vmatpush3.bf16.msra.mxu1 %v2891_v38  ;;  %1048 = vmatprep.mubr.bf16.mxu1 %v2569_v35  ;;  %v2583_v35 = vld [vmem:[%s2857_s12 + $0xe0] ss:$28 sps:$4 sm:$0xff]  }
  0x5a   : > { %2246 = vmatprep.subr.bf16.mxu1 %v2897_v39  ;;  %2226 = vmatprep.subr.bf16.mxu0 %v2799_v21 }
  0x5c   : > { %2227 = vmatpush3.bf16.msra.mxu0 %v2815_v23 }
  0x5d   : > { %2247 = vmatpush3.bf16.msra.mxu1 %v2904_v40  ;;  %2228 = vmatprep.subr.bf16.mxu0 %v2827_v25 }
  0x5e   : > { %2248 = vmatprep.subr.bf16.mxu1 %v2912_v43 }
  0x60   : > { %1049 = vmatmul.mubr.bf16.gmra.mrb[16].mxu1 %v2571_v41  ;;  %2229 = vmatpush3.bf16.msra.mxu0 %v2840_v27  ;;  %v2589_v41 = vld [vmem:[%s2857_s12 + $0x11c] ss:$28 sps:$4 sm:$0x1f]  }
  0x61   : > { %2249 = vmatpush3.bf16.msra.mxu1 %v2926_v47  ;;  %1138 = vmatprep.mubr.bf16.mxu1 %v2577_v42  ;;  %v2591_v42 = vld [vmem:[%s2857_s12 + $0x124] ss:$28 sps:$4 sm:$0x1f]  }
  0x62   : > { %2250 = vmatprep.subr.bf16.mxu1 %v2932_v48  ;;  %2230 = vmatprep.subr.bf16.mxu0 %v2852_v29 }
  0x64   : > { %2231 = vmatpush3.bf16.msra.mxu0 %v2869_v31 }
  0x65   : > { %2251 = vmatpush3.bf16.msra.mxu1 %v2939_v49  ;;  %2460 = vmatprep.subr.bf16.mxu0 %v2885_v37 }
  0x66   : > { %2252 = vmatprep.subr.bf16.mxu1 %v2947_v51 }
  0x67   : > { %1090 = vmatmul.mubr.bf16.vlgmr.msra.gmra.mrb[16].mxu0 %v2566_v44  ;;  %v2594_v44 = vld [vmem:[%s2857_s12 + $0x120] ss:$28 sps:$4 sm:$0x1f]  }
  0x68   : > { %1097 = vmatprep.mubr.bf16.mxu0 %v2572_v45  ;;  %2461 = vmatpush3.bf16.msra.mxu0 %v2885_v37  ;;  %v2593_v45 = vld [vmem:[%s2857_s12 + $0x118] ss:$28 sps:$4 sm:$0x1f]  }
  0x69   : > { %2253 = vmatpush3.bf16.msra.mxu1 %v2954_v53  ;;  %2462 = vmatprep.subr.bf16.mxu0 %v2921_v46 }
  0x6a   : > { %2254 = vmatprep.subr.bf16.mxu1 %v2961_v54 }
  0x6c   : > { %2463 = vmatpush3.bf16.msra.mxu0 %v2921_v46 }
  0x6d   : > { %2255 = vmatpush3.bf16.msra.mxu1 %v2970_v55  ;;  %2276 = vmatprep.subr.bf16.mxu0 %v2672_v0 }
  0x6e   : > { %2256 = vmatprep.subr.bf16.mxu1 %v2976_v56 }
  0x6f   : > { %1098 = vmatmul.mubr.bf16.gmra.mrb[20].mxu0 %v2574_v50  ;;  %v2595_v50 = vld [vmem:[%s2857_s12 + $0xf8] ss:$28 sps:$4 sm:$0xff]  }
  0x70   : > { %2464 = vmatprep.mubr.msk.bf16.mxu0 %vm712_vm0, %v2578_v52  ;;  %v2599_v52 = vld [vmem:[%s2857_s12 + $0xf4] ss:$28 sps:$4 sm:$0xff]  }
  0x71   : > { %2257 = vmatpush3.bf16.msra.mxu1 %v2985_v58 }
  0x72   : > { %2258 = vmatprep.subr.bf16.mxu1 %v2991_v59 }
  0x75   : > { %2259 = vmatpush3.bf16.msra.mxu1 %v3000_v61 }
  0x76   : > { %2304 = vmatprep.subr.bf16.mxu1 %v2677_v1 }
  0x77   : > { %2465 = vmatmul.mubr.msk.bf16.vlgmr.msra.gmra.mrb[24].mxu0 %vm712_vm0, %v2579_v60  ;;  %v2605_v60 = vld [vmem:[%s2857_s12 + $0x154] ss:$28 sps:$4 sm:$0xff]  }
  0x78   : > { %1139 = vmatmul.mubr.bf16.vlgmr.msra.gmra.mrb[20].mxu1 %v2575_v57  ;;  %2277 = vmatpush3.bf16.msra.mxu0 %v2683_v2  ;;  %v2596_v57 = vld [vmem:[%s2857_s12 + $0x130] ss:$28 sps:$4 sm:$0x1f]  }
  0x79   : > { %2305 = vmatpush3.bf16.msra.mxu1 %v2689_v3  ;;  %2278 = vmatprep.subr.bf16.mxu0 %v2695_v4 }
  0x7a   : > { %2306 = vmatprep.subr.bf16.mxu1 %v2701_v5  ;;  %1146 = vmatprep.mubr.bf16.mxu1 %v2580_v62 }
  0x7b   : > { %1329 = vmatprep.mubr.bf16.mxu0 %v2585_v63 }
  0x7c   : > { %2279 = vmatpush3.bf16.msra.mxu0 %v2707_v6 }
  0x7d   : > { %2307 = vmatpush3.bf16.msra.mxu1 %v2713_v7  ;;  %2280 = vmatprep.subr.bf16.mxu0 %v2719_v8 }
  0x7e   : > { %2308 = vmatprep.subr.bf16.mxu1 %v2725_v9 }
  0x80   : > { %1147 = vmatmul.mubr.bf16.gmra.mrb[24].mxu1 %v2582_v32  ;;  %2281 = vmatpush3.bf16.msra.mxu0 %v2731_v10 }
  0x81   : > { %2309 = vmatpush3.bf16.msra.mxu1 %v2737_v11  ;;  %1378 = vmatprep.mubr.bf16.mxu1 %v2588_v33 }
  0x82   : > { %2310 = vmatprep.subr.bf16.mxu1 %v2749_v13  ;;  %2282 = vmatprep.subr.bf16.mxu0 %v2743_v12 }
  0x84   : > { %2283 = vmatpush3.bf16.msra.mxu0 %v2755_v14 }
  0x85   : > { %2311 = vmatpush3.bf16.msra.mxu1 %v2761_v15  ;;  %2284 = vmatprep.subr.bf16.mxu0 %v2767_v16 }
  0x86   : > { %2312 = vmatprep.subr.bf16.mxu1 %v2773_v17 }
  0x88   : > { %2285 = vmatpush3.bf16.msra.mxu0 %v2781_v18 }
  0x89   : > { %2313 = vmatpush3.bf16.msra.mxu1 %v2787_v19  ;;  %2286 = vmatprep.subr.bf16.mxu0 %v2793_v20 }
  0x8a   : > { %2314 = vmatprep.subr.bf16.mxu1 %v2799_v21 }
  0x8c   : > { %2287 = vmatpush3.bf16.msra.mxu0 %v2809_v22 }
  0x8d   : > { %2315 = vmatpush3.bf16.msra.mxu1 %v2815_v23  ;;  %2288 = vmatprep.subr.bf16.mxu0 %v2821_v24 }
  0x8e   : > { %2316 = vmatprep.subr.bf16.mxu1 %v2827_v25 }
  0x90   : > { %2289 = vmatpush3.bf16.msra.mxu0 %v2834_v26 }
  0x91   : > { %2317 = vmatpush3.bf16.msra.mxu1 %v2840_v27  ;;  %2290 = vmatprep.subr.bf16.mxu0 %v2846_v28 }
  0x92   : > { %2318 = vmatprep.subr.bf16.mxu1 %v2852_v29 }
  0x94   : > { %2291 = vmatpush3.bf16.msra.mxu0 %v2863_v30 }
  0x95   : > { %2319 = vmatpush3.bf16.msra.mxu1 %v2869_v31  ;;  %2332 = vmatprep.subr.bf16.mxu0 %v2880_v36 }
  0x96   : > { %2468 = vmatprep.subr.bf16.mxu1 %v2885_v37 }
  0x97   : > { %1330 = vmatmul.mubr.bf16.vlgmr.msra.gmra.mrb[28].mxu0 %v2583_v35 }
  0x98   : > { %1379 = vmatmul.mubr.bf16.vlgmr.msra.gmra.mrb[28].mxu1 %v2586_v34  ;;  %2333 = vmatpush3.bf16.msra.mxu0 %v2891_v38 }
  0x99   : > { %2469 = vmatpush3.bf16.msra.mxu1 %v2885_v37  ;;  %1337 = vmatprep.mubr.bf16.mxu0 %v2589_v41 }
  0x9a   : > { %2334 = vmatprep.subr.bf16.mxu0 %v2897_v39  ;;  %1386 = vmatprep.mubr.bf16.mxu1 %v2591_v42 }
  0x9b   : > { %2470 = vmatprep.subr.bf16.mxu1 %v2921_v46 }
  0x9c   : > { %2335 = vmatpush3.bf16.msra.mxu0 %v2904_v40 }
  0x9d   : > { %2471 = vmatpush3.bf16.msra.mxu1 %v2921_v46  ;;  %2336 = vmatprep.subr.bf16.mxu0 %v2912_v43 }
  0x9e   : > { %2364 = vmatprep.subr.bf16.mxu1 %v2672_v0  ;;  %v2597_v0 = vld [vmem:[%s2857_s12 + $0xf0] ss:$28 sps:$4 sm:$0xff]  }
  0x9f   : > { %1338 = vmatmul.mubr.bf16.gmra.mrb[32].mxu0 %v2593_v45 }
  0xa0   : > { %1387 = vmatmul.mubr.bf16.gmra.mrb[32].mxu1 %v2594_v44  ;;  %2337 = vmatpush3.bf16.msra.mxu0 %v2926_v47 }
  0xa1   : > { %2472 = vmatprep.mubr.msk.bf16.mxu1 %vm712_vm0, %v2595_v50  ;;  %1427 = vmatprep.mubr.bf16.mxu0 %v2599_v52 }
  0xa2   : > { %2338 = vmatprep.subr.bf16.mxu0 %v2932_v48 }
  0xa4   : > { %2339 = vmatpush3.bf16.msra.mxu0 %v2939_v49 }
  0xa5   : > { %2340 = vmatprep.subr.bf16.mxu0 %v2947_v51 }
  0xa8   : > { %2473 = vmatmul.mubr.msk.bf16.vlgmr.msra.gmra.mrb[36].mxu1 %vm712_vm0, %v2596_v57  ;;  %2341 = vmatpush3.bf16.msra.mxu0 %v2954_v53 }
  0xa9   : > { %2365 = vmatpush3.bf16.msra.mxu1 %v2683_v2  ;;  %1618 = vmatprep.mubr.bf16.mxu1 %v2605_v60  ;;  %v2600_v2 = vld [vmem:[%s2857_s12 + $0x12c] ss:$28 sps:$4 sm:$0x1f]  }
  0xaa   : > { %2366 = vmatprep.subr.bf16.mxu1 %v2695_v4  ;;  %2342 = vmatprep.subr.bf16.mxu0 %v2961_v54  ;;  %v2602_v4 = vld [vmem:[%s2857_s12 + $0x128] ss:$28 sps:$4 sm:$0x1f]  }
  0xac   : > { %2343 = vmatpush3.bf16.msra.mxu0 %v2970_v55 }
  0xad   : > { %2367 = vmatpush3.bf16.msra.mxu1 %v2707_v6  ;;  %2344 = vmatprep.subr.bf16.mxu0 %v2976_v56  ;;  %v2611_v6 = vld [vmem:[%s2857_s12 + $0x188] ss:$28 sps:$4 sm:$0x1f]  }
  0xae   : > { %2368 = vmatprep.subr.bf16.mxu1 %v2719_v8  ;;  %v2606_v8 = vld [vmem:[%s2857_s12 + $0x158] ss:$28 sps:$4 sm:$0xff]  }
  0xb0   : > { %2345 = vmatpush3.bf16.msra.mxu0 %v2985_v58 }
  0xb1   : > { %2369 = vmatpush3.bf16.msra.mxu1 %v2731_v10  ;;  %2346 = vmatprep.subr.bf16.mxu0 %v2991_v59  ;;  %v2614_v10 = vld [vmem:[%s2857_s12 + $0x190] ss:$28 sps:$4 sm:$0x1f]  }
  0xb2   : > { %2370 = vmatprep.subr.bf16.mxu1 %v2743_v12  ;;  %v2615_v12 = vld [vmem:[%s2857_s12 + $0x160] ss:$28 sps:$4 sm:$0xff]  }
  0xb4   : > { %2347 = vmatpush3.bf16.msra.mxu0 %v3000_v61 }
  0xb5   : > { %2371 = vmatpush3.bf16.msra.mxu1 %v2755_v14  ;;  %2392 = vmatprep.subr.bf16.mxu0 %v2677_v1  ;;  %v2608_v1 = vld [vmem:[%s2857_s12 + $0x15c] ss:$28 sps:$4 sm:$0xff]  }
  0xb6   : > { %2372 = vmatprep.subr.bf16.mxu1 %v2767_v16  ;;  %v2620_v14 = vld [vmem:[%s2857_s12 + $0x19c] ss:$28 sps:$4 sm:$0x1f]  }
  0xb7   : > { %1428 = vmatmul.mubr.bf16.vlgmr.msra.gmra.mrb[36].mxu0 %v2597_v0 }
  0xb8   : > { %2393 = vmatpush3.bf16.msra.mxu0 %v2689_v3  ;;  %1435 = vmatprep.mubr.bf16.mxu0 %v2600_v2  ;;  %v2603_v3 = vld [vmem:[%s2857_s12 + $0x150] ss:$28 sps:$4 sm:$0xff]  }
  0xb9   : > { %2373 = vmatpush3.bf16.msra.mxu1 %v2781_v18  ;;  %2394 = vmatprep.subr.bf16.mxu0 %v2701_v5  ;;  %v2609_v5 = vld [vmem:[%s2857_s12 + $0x18c] ss:$28 sps:$4 sm:$0x1f]  }
  0xba   : > { %2374 = vmatprep.subr.bf16.mxu1 %v2793_v20 }
  0xbc   : > { %2395 = vmatpush3.bf16.msra.mxu0 %v2713_v7  ;;  %v2617_v7 = vld [vmem:[%s2857_s12 + $0x164] ss:$28 sps:$4 sm:$0xff]  }
  0xbd   : > { %2375 = vmatpush3.bf16.msra.mxu1 %v2809_v22  ;;  %2396 = vmatprep.subr.bf16.mxu0 %v2725_v9  ;;  %v2612_v9 = vld [vmem:[%s2857_s12 + $0x194] ss:$28 sps:$4 sm:$0x1f]  }
  0xbe   : > { %2376 = vmatprep.subr.bf16.mxu1 %v2821_v24 }
  0xbf   : > { %1436 = vmatmul.mubr.bf16.gmra.mrb[40].mxu0 %v2602_v4 }
  0xc0   : > { %2397 = vmatpush3.bf16.msra.mxu0 %v2737_v11  ;;  %1667 = vmatprep.mubr.bf16.mxu0 %v2608_v1  ;;  %v2618_v11 = vld [vmem:[%s2857_s12 + $0x168] ss:$28 sps:$4 sm:$0xff]  }
  0xc1   : > { %2377 = vmatpush3.bf16.msra.mxu1 %v2834_v26  ;;  %2398 = vmatprep.subr.bf16.mxu0 %v2749_v13  ;;  %v2619_v13 = vld [vmem:[%s2857_s12 + $0x1a0] ss:$28 sps:$4 sm:$0x1f]  }
  0xc2   : > { %2378 = vmatprep.subr.bf16.mxu1 %v2846_v28 }
  0xc4   : > { %2399 = vmatpush3.bf16.msra.mxu0 %v2761_v15  ;;  %v2622_v15 = vld [vmem:[%s2857_s12 + $0x198] ss:$28 sps:$4 sm:$0x1f]  }
  0xc5   : > { %2379 = vmatpush3.bf16.msra.mxu1 %v2863_v30  ;;  %2400 = vmatprep.subr.bf16.mxu0 %v2773_v17 }
  0xc6   : > { %2420 = vmatprep.subr.bf16.mxu1 %v2880_v36 }
  0xc8   : > { %1619 = vmatmul.mubr.bf16.vlgmr.msra.gmra.mrb[40].mxu1 %v2603_v3  ;;  %2401 = vmatpush3.bf16.msra.mxu0 %v2787_v19 }
  0xc9   : > { %2421 = vmatpush3.bf16.msra.mxu1 %v2891_v38  ;;  %1626 = vmatprep.mubr.bf16.mxu1 %v2609_v5 }
  0xca   : > { %2422 = vmatprep.subr.bf16.mxu1 %v2897_v39  ;;  %2402 = vmatprep.subr.bf16.mxu0 %v2799_v21 }
  0xcc   : > { %2403 = vmatpush3.bf16.msra.mxu0 %v2815_v23 }
  0xcd   : > { %2423 = vmatpush3.bf16.msra.mxu1 %v2904_v40  ;;  %2404 = vmatprep.subr.bf16.mxu0 %v2827_v25 }
  0xce   : > { %2424 = vmatprep.subr.bf16.mxu1 %v2912_v43 }
  0xd0   : > { %1627 = vmatmul.mubr.bf16.gmra.mrb[44].mxu1 %v2611_v6  ;;  %2405 = vmatpush3.bf16.msra.mxu0 %v2840_v27 }
  0xd1   : > { %2425 = vmatpush3.bf16.msra.mxu1 %v2926_v47  ;;  %1716 = vmatprep.mubr.bf16.mxu1 %v2617_v7 }
  0xd2   : > { %2426 = vmatprep.subr.bf16.mxu1 %v2932_v48  ;;  %2406 = vmatprep.subr.bf16.mxu0 %v2852_v29 }
  0xd4   : > { %2407 = vmatpush3.bf16.msra.mxu0 %v2869_v31 }
  0xd5   : > { %2427 = vmatpush3.bf16.msra.mxu1 %v2939_v49  ;;  %2476 = vmatprep.subr.bf16.mxu0 %v2885_v37 }
  0xd6   : > { %2428 = vmatprep.subr.bf16.mxu1 %v2947_v51 }
  0xd7   : > { %1668 = vmatmul.mubr.bf16.vlgmr.msra.gmra.mrb[44].mxu0 %v2606_v8 }
  0xd8   : > { %1675 = vmatprep.mubr.bf16.mxu0 %v2612_v9  ;;  %2477 = vmatpush3.bf16.msra.mxu0 %v2885_v37 }
  0xd9   : > { %2429 = vmatpush3.bf16.msra.mxu1 %v2954_v53  ;;  %2478 = vmatprep.subr.bf16.mxu0 %v2921_v46 }
  0xda   : > { %2430 = vmatprep.subr.bf16.mxu1 %v2961_v54 }
  0xdc   : > { %2479 = vmatpush3.bf16.msra.mxu0 %v2921_v46 }
  0xdd   : > { %2431 = vmatpush3.bf16.msra.mxu1 %v2970_v55 }
  0xde   : > { %2432 = vmatprep.subr.bf16.mxu1 %v2976_v56 }
  0xdf   : > { %1676 = vmatmul.mubr.bf16.gmra.mrb[48].mxu0 %v2614_v10 }
  0xe0   : > { %2480 = vmatprep.mubr.msk.bf16.mxu0 %vm712_vm0, %v2618_v11 }
  0xe1   : > { %2433 = vmatpush3.bf16.msra.mxu1 %v2985_v58 }
  0xe2   : > { %2434 = vmatprep.subr.bf16.mxu1 %v2991_v59 }
  0xe5   : > { %2435 = vmatpush3.bf16.msra.mxu1 %v3000_v61 }
  0xe7   : > { %2481 = vmatmul.mubr.msk.bf16.vlgmr.msra.gmra.mrb[52].mxu0 %vm712_vm0, %v2619_v13 }
  0xe8   : > { %1717 = vmatmul.mubr.bf16.vlgmr.msra.gmra.mrb[48].mxu1 %v2615_v12 }
  0xe9   : > { %1724 = vmatprep.mubr.bf16.mxu1 %v2620_v14 }
  0xf0   : > { %1725 = vmatmul.mubr.bf16.gmra.mrb[52].mxu1 %v2622_v15 }
  0xfa   : > { %v2116_v16 = vpop.f32.mrb[0].mxu0 }
  0xfb   : > { %v2144_v17 = vpop.f32.mrb[0].mxu1  ;;  %v2117_v18 = vpop.f32.mrb[1].mxu0 }
  0xfc   : > { %v2118_v19 = vadd.f32 %v2117_v18, %v2116_v16  ;;  %v2145_v20 = vpop.f32.mrb[1].mxu1  ;;  %v2119_v21 = vpop.f32.mrb[2].mxu0 }
  0xfd   : > { %v2146_v22 = vadd.f32 %v2145_v20, %v2144_v17  ;;  %v2147_v23 = vpop.f32.mrb[2].mxu1  ;;  %v2120_v24 = vpop.f32.mrb[3].mxu0 }
  0xfe   : > { %v2121_v25 = vadd.f32 %v2120_v24, %v2119_v21  ;;  %v2148_v26 = vpop.f32.mrb[3].mxu1 }
  0xff   : > { %v803_v27 = vadd.f32 %v2146_v22, %v2118_v19  ;;  %v2149_v28 = vadd.f32 %v2148_v26, %v2147_v23 }
 0x101   : > { %v806_v29 = vadd.f32 %v2149_v28, %v2121_v25 }
 0x102   : > { %v2122_v30 = vpop.f32.mrb[4].mxu0 }
 0x103   : > { %v2150_v31 = vpop.f32.mrb[4].mxu1  ;;  %v2123_v36 = vpop.f32.mrb[5].mxu0 }
 0x104   : > { %v2124_v37 = vadd.f32 %v2123_v36, %v2122_v30  ;;  %v2151_v38 = vpop.f32.mrb[5].mxu1  ;;  %v2125_v39 = vpop.f32.mrb[6].mxu0 }
 0x105   : > { %v2152_v40 = vadd.f32 %v2151_v38, %v2150_v31  ;;  %v2153_v43 = vpop.f32.mrb[6].mxu1  ;;  %v2126_v46 = vpop.f32.mrb[7].mxu0 }
 0x106   : > { %v2127_v47 = vadd.f32 %v2126_v46, %v2125_v39  ;;  %v2154_v48 = vpop.f32.mrb[7].mxu1 }
 0x107   : > { %v811_v49 = vadd.f32 %v2152_v40, %v2124_v37  ;;  %v2155_v51 = vadd.f32 %v2154_v48, %v2153_v43 }
 0x109   : > { %v814_v53 = vadd.f32 %v2155_v51, %v2127_v47 }
 0x10b   : > { %v2458_v54 = vpop.f32.mrb[8].mxu1 }
 0x10c   : > { %v900_v55 = vpop.f32.mrb[9].mxu1 }
 0x10d   : > { %v2459_v56 = vpop.f32.mrb[10].mxu1 }
 0x10e   : > { %v903_v58 = vpop.f32.mrb[11].mxu1 }
 0x11a   : > { %v2172_v59 = vpop.f32.mrb[8].mxu0 }
 0x11b   : > { %v2173_v61 = vpop.f32.mrb[9].mxu0 }
 0x11c   : > { %v2174_v62 = vadd.f32 %v2173_v61, %v2172_v59  ;;  %v2175_v63 = vpop.f32.mrb[10].mxu0 }
 0x11d   : > { %v2176_v32 = vpop.f32.mrb[11].mxu0 }
 0x11e   : > { %v852_v33 = vadd.f32 %v2174_v62, %v803_v27  ;;  %v2177_v34 = vadd.f32 %v2176_v32, %v2175_v63 }
 0x120   : > { %v855_v35 = vadd.f32 %v2177_v34, %v806_v29  ;;  %v3203_v41 = vadd.f32 %v900_v55, %v852_v33 }
 0x122   : > { %v2178_v42 = vpop.f32.mrb[12].mxu0  ;;  %v3205_v44 = vadd.f32 %v903_v58, %v855_v35 }
 0x123   : > { %v2179_v45 = vpop.f32.mrb[13].mxu0 }
 0x124   : > { %v2180_v50 = vadd.f32 %v2179_v45, %v2178_v42  ;;  %v2181_v52 = vpop.f32.mrb[14].mxu0 }
 0x125   : > { %v2182_v57 = vpop.f32.mrb[15].mxu0 }
 0x126   : > { %v860_v60 = vadd.f32 %v2180_v50, %v811_v49  ;;  %v2183_v0 = vadd.f32 %v2182_v57, %v2181_v52 }
 0x128   : > { %v3207_v2 = vadd.f32 %v2458_v54, %v860_v60  ;;  %v863_v4 = vadd.f32 %v2183_v0, %v814_v53 }
 0x12a   : > { %v3209_v3 = vadd.f32 %v2459_v56, %v863_v4 }
 0x12b   : > { %v2204_v1 = vpop.f32.mrb[12].mxu1 }
 0x12c   : > { %v2205_v5 = vpop.f32.mrb[13].mxu1 }
 0x12d   : > { %v2206_v6 = vadd.f32 %v2205_v5, %v2204_v1  ;;  %v2207_v7 = vpop.f32.mrb[14].mxu1 }
 0x12e   : > { %v2208_v8 = vpop.f32.mrb[15].mxu1 }
 0x12f   : > { %v2209_v9 = vadd.f32 %v2208_v8, %v2207_v7 }
 0x133   : > { %v2210_v10 = vpop.f32.mrb[16].mxu1 }
 0x134   : > { %v2211_v11 = vpop.f32.mrb[17].mxu1 }
 0x135   : > { %v2212_v12 = vadd.f32 %v2211_v11, %v2210_v10  ;;  %v2213_v13 = vpop.f32.mrb[18].mxu1 }
 0x136   : > { %v2214_v14 = vpop.f32.mrb[19].mxu1 }
 0x137   : > { %v2215_v15 = vadd.f32 %v2214_v14, %v2213_v13 }
 0x13a   : > { %v2232_v16 = vpop.f32.mrb[16].mxu0 }
 0x13b   : > { %v2233_v17 = vpop.f32.mrb[17].mxu0 }
 0x13c   : > { %v2234_v18 = vadd.f32 %v2233_v17, %v2232_v16  ;;  %v2235_v19 = vpop.f32.mrb[18].mxu0 }
 0x13d   : > { %v2236_v20 = vpop.f32.mrb[19].mxu0 }
 0x13e   : > { %v1092_v21 = vadd.f32 %v2234_v18, %v2206_v6  ;;  %v2237_v22 = vadd.f32 %v2236_v20, %v2235_v19 }
 0x140   : > { %v1095_v23 = vadd.f32 %v2237_v22, %v2209_v9 }
 0x142   : > { %v2238_v24 = vpop.f32.mrb[20].mxu0 }
 0x143   : > { %v2239_v25 = vpop.f32.mrb[21].mxu0 }
 0x144   : > { %v2240_v26 = vadd.f32 %v2239_v25, %v2238_v24  ;;  %v2241_v27 = vpop.f32.mrb[22].mxu0 }
 0x145   : > { %v2242_v28 = vpop.f32.mrb[23].mxu0 }
 0x146   : > { %v1100_v29 = vadd.f32 %v2240_v26, %v2212_v12  ;;  %v2243_v30 = vadd.f32 %v2242_v28, %v2241_v27 }
 0x148   : > { %v1103_v31 = vadd.f32 %v2243_v30, %v2215_v15 }
 0x14a   : > { %v2466_v38 = vpop.f32.mrb[24].mxu0 }
 0x14b   : > { %v2260_v36 = vpop.f32.mrb[20].mxu1  ;;  %v1189_v43 = vpop.f32.mrb[25].mxu0 }
 0x14c   : > { %v2261_v37 = vpop.f32.mrb[21].mxu1  ;;  %v2467_v47 = vpop.f32.mrb[26].mxu0 }
 0x14d   : > { %v2262_v39 = vadd.f32 %v2261_v37, %v2260_v36  ;;  %v2263_v40 = vpop.f32.mrb[22].mxu1  ;;  %v1192_v51 = vpop.f32.mrb[27].mxu0 }
 0x14e   : > { %v2264_v46 = vpop.f32.mrb[23].mxu1 }
 0x14f   : > { %v2265_v48 = vadd.f32 %v2264_v46, %v2263_v40  ;;  %v1141_v49 = vadd.f32 %v2262_v39, %v1092_v21 }
 0x151   : > { %v3211_v53 = vadd.f32 %v1189_v43, %v1141_v49  ;;  %v1144_v54 = vadd.f32 %v2265_v48, %v1095_v23 }
 0x153   : > { %v1782_v55 = vmax.f32 %v3203_v41, %v3211_v53  ;;  %v3215_v56 = vadd.f32 %v1192_v51, %v1144_v54  ;;  %v2266_v58 = vpop.f32.mrb[24].mxu1 }
 0x154   : > { %v2267_v59 = vpop.f32.mrb[25].mxu1 }
 0x155   : > { %v1783_v61 = vmax.f32 %v3205_v44, %v3215_v56  ;;  %v2268_v62 = vadd.f32 %v2267_v59, %v2266_v58  ;;  %v2269_v63 = vpop.f32.mrb[26].mxu1  ;;  %v2083_v44 = vld [vmem:[%s3268_s4] ss:$0 sm:$0xff] }
 0x156   : > { %v2270_v32 = vpop.f32.mrb[27].mxu1 }
 0x157   : > { %v1149_v33 = vadd.f32 %v2268_v62, %v1100_v29  ;;  %v2271_v34 = vadd.f32 %v2270_v32, %v2269_v63 }
 0x159   : > { %v3219_v35 = vadd.f32 %v2466_v38, %v1149_v33  ;;  %v1152_v42 = vadd.f32 %v2271_v34, %v1103_v31 }
 0x15b   : > { %v1784_v45 = vmax.f32 %v3207_v2, %v3219_v35  ;;  %v3223_v50 = vadd.f32 %v2467_v47, %v1152_v42 }
 0x15d   : > { %v1785_v52 = vmax.f32 %v3209_v3, %v3223_v50 }
 0x16a   : > { %v2292_v60 = vpop.f32.mrb[28].mxu0 }
 0x16b   : > { %v2320_v57 = vpop.f32.mrb[28].mxu1  ;;  %v2293_v4 = vpop.f32.mrb[29].mxu0 }
 0x16c   : > { %v2321_v0 = vpop.f32.mrb[29].mxu1  ;;  %v2294_v6 = vadd.f32 %v2293_v4, %v2292_v60  ;;  %v2295_v7 = vpop.f32.mrb[30].mxu0 }
 0x16d   : > { %v2322_v1 = vadd.f32 %v2321_v0, %v2320_v57  ;;  %v2323_v5 = vpop.f32.mrb[30].mxu1  ;;  %v2296_v9 = vpop.f32.mrb[31].mxu0 }
 0x16e   : > { %v2324_v8 = vpop.f32.mrb[31].mxu1  ;;  %v2297_v12 = vadd.f32 %v2296_v9, %v2295_v7 }
 0x16f   : > { %v2325_v10 = vadd.f32 %v2324_v8, %v2323_v5  ;;  %v1381_v11 = vadd.f32 %v2322_v1, %v2294_v6 }
 0x171   : > { %v1384_v13 = vadd.f32 %v2325_v10, %v2297_v12 }
 0x172   : > { %v2298_v15 = vpop.f32.mrb[32].mxu0 }
 0x173   : > { %v2326_v14 = vpop.f32.mrb[32].mxu1  ;;  %v2299_v17 = vpop.f32.mrb[33].mxu0 }
 0x174   : > { %v2327_v16 = vpop.f32.mrb[33].mxu1  ;;  %v2300_v20 = vadd.f32 %v2299_v17, %v2298_v15  ;;  %v2301_v21 = vpop.f32.mrb[34].mxu0 }
 0x175   : > { %v2328_v18 = vadd.f32 %v2327_v16, %v2326_v14  ;;  %v2329_v19 = vpop.f32.mrb[34].mxu1  ;;  %v2302_v23 = vpop.f32.mrb[35].mxu0 }
 0x176   : > { %v2330_v22 = vpop.f32.mrb[35].mxu1  ;;  %v2303_v26 = vadd.f32 %v2302_v23, %v2301_v21 }
 0x177   : > { %v2331_v24 = vadd.f32 %v2330_v22, %v2329_v19  ;;  %v1389_v25 = vadd.f32 %v2328_v18, %v2300_v20 }
 0x179   : > { %v1392_v27 = vadd.f32 %v2331_v24, %v2303_v26 }
 0x17b   : > { %v2474_v28 = vpop.f32.mrb[36].mxu1 }
 0x17c   : > { %v1478_v29 = vpop.f32.mrb[37].mxu1 }
 0x17d   : > { %v2475_v30 = vpop.f32.mrb[38].mxu1 }
 0x17e   : > { %v1481_v31 = vpop.f32.mrb[39].mxu1 }
 0x18a   : > { %v2348_v36 = vpop.f32.mrb[36].mxu0 }
 0x18b   : > { %v2349_v37 = vpop.f32.mrb[37].mxu0 }
 0x18c   : > { %v2350_v38 = vadd.f32 %v2349_v37, %v2348_v36  ;;  %v2351_v39 = vpop.f32.mrb[38].mxu0 }
 0x18d   : > { %v2352_v40 = vpop.f32.mrb[39].mxu0 }
 0x18e   : > { %v1430_v43 = vadd.f32 %v2350_v38, %v1381_v11  ;;  %v2353_v46 = vadd.f32 %v2352_v40, %v2351_v39 }
 0x190   : > { %v1433_v47 = vadd.f32 %v2353_v46, %v1384_v13  ;;  %v1479_v48 = vadd.f32 %v1478_v29, %v1430_v43 }
 0x192   : > { %v2354_v49 = vpop.f32.mrb[40].mxu0  ;;  %v3227_v51 = vadd.f32 %v1481_v31, %v1433_v47 }
 0x193   : > { %v2355_v54 = vpop.f32.mrb[41].mxu0 }
 0x194   : > { %v2356_v58 = vadd.f32 %v2355_v54, %v2354_v49  ;;  %v2357_v59 = vpop.f32.mrb[42].mxu0 }
 0x195   : > { %v2358_v62 = vpop.f32.mrb[43].mxu0 }
 0x196   : > { %v1438_v63 = vadd.f32 %v2356_v58, %v1389_v25  ;;  %v2359_v32 = vadd.f32 %v2358_v62, %v2357_v59  ;;  %v2081_v62 = vld [vmem:[%s3266_s2] ss:$0 sm:$0xff] }
 0x198   : > { %v3229_v33 = vadd.f32 %v2474_v28, %v1438_v63  ;;  %v1441_v34 = vadd.f32 %v2359_v32, %v1392_v27 }
 0x19a   : > { %v3231_v57 = vadd.f32 %v2475_v30, %v1441_v34 }
 0x19b   : > { %v2380_v42 = vpop.f32.mrb[40].mxu1 }
 0x19c   : > { %v2381_v60 = vpop.f32.mrb[41].mxu1 }
 0x19d   : > { %v2382_v0 = vadd.f32 %v2381_v60, %v2380_v42  ;;  %v2383_v4 = vpop.f32.mrb[42].mxu1 }
 0x19e   : > { %v2384_v1 = vpop.f32.mrb[43].mxu1 }
 0x19f   : > { %v2385_v5 = vadd.f32 %v2384_v1, %v2383_v4 }
 0x1a3   : > { %v2386_v6 = vpop.f32.mrb[44].mxu1 }
 0x1a4   : > { %v2387_v7 = vpop.f32.mrb[45].mxu1 }
 0x1a5   : > { %v2388_v8 = vadd.f32 %v2387_v7, %v2386_v6  ;;  %v2389_v9 = vpop.f32.mrb[46].mxu1  ;;  %v2082_v6 = vld [vmem:[%s3267_s3] ss:$0 sm:$0xff] }
 0x1a6   : > { %v2390_v10 = vpop.f32.mrb[47].mxu1 }
 0x1a7   : > { %v2391_v11 = vadd.f32 %v2390_v10, %v2389_v9 }
 0x1aa   : > { %v2408_v12 = vpop.f32.mrb[44].mxu0 }
 0x1ab   : > { %v2409_v13 = vpop.f32.mrb[45].mxu0 }
 0x1ac   : > { %v2410_v14 = vadd.f32 %v2409_v13, %v2408_v12  ;;  %v2411_v15 = vpop.f32.mrb[46].mxu0 }
 0x1ad   : > { %v2412_v16 = vpop.f32.mrb[47].mxu0 }
 0x1ae   : > { %v1670_v17 = vadd.f32 %v2410_v14, %v2382_v0  ;;  %v2413_v18 = vadd.f32 %v2412_v16, %v2411_v15 }
 0x1b0   : > { %v1673_v19 = vadd.f32 %v2413_v18, %v2385_v5 }
 0x1b2   : > { %v2414_v20 = vpop.f32.mrb[48].mxu0 }
 0x1b3   : > { %v2415_v21 = vpop.f32.mrb[49].mxu0 }
 0x1b4   : > { %v2416_v22 = vadd.f32 %v2415_v21, %v2414_v20  ;;  %v2417_v23 = vpop.f32.mrb[50].mxu0  ;;  %v1853_v20 = vld [vmem:[%s224_s17 + $0xc] sm:$0x1] }
 0x1b5   : > { %v2418_v24 = vpop.f32.mrb[51].mxu0 }
 0x1b6   : > { %v1678_v25 = vadd.f32 %v2416_v22, %v2388_v8  ;;  %v2419_v26 = vadd.f32 %v2418_v24, %v2417_v23 }
 0x1b8   : > { %v1681_v27 = vadd.f32 %v2419_v26, %v2391_v11 }
 0x1ba   : > { %v2482_v30 = vpop.f32.mrb[52].mxu0 }
 0x1bb   : > { %v2436_v28 = vpop.f32.mrb[48].mxu1  ;;  %v1767_v37 = vpop.f32.mrb[53].mxu0 }
 0x1bc   : > { %v2437_v29 = vpop.f32.mrb[49].mxu1  ;;  %v2483_v39 = vpop.f32.mrb[54].mxu0 }
 0x1bd   : > { %v2438_v31 = vadd.f32 %v2437_v29, %v2436_v28  ;;  %v2439_v36 = vpop.f32.mrb[50].mxu1  ;;  %v1770_v46 = vpop.f32.mrb[55].mxu0 }
 0x1be   : > { %v2440_v38 = vpop.f32.mrb[51].mxu1 }
 0x1bf   : > { %v2441_v40 = vadd.f32 %v2440_v38, %v2439_v36  ;;  %v1719_v43 = vadd.f32 %v2438_v31, %v1670_v17 }
 0x1c1   : > { %v1768_v47 = vadd.f32 %v1767_v37, %v1719_v43  ;;  %v1722_v49 = vadd.f32 %v2441_v40, %v1673_v19 }
 0x1c3   : > { %v1786_v54 = vmax.f32 %v1479_v48, %v1768_v47  ;;  %v1771_v58 = vadd.f32 %v1770_v46, %v1722_v49  ;;  %v2442_v59 = vpop.f32.mrb[52].mxu1 }
 0x1c4   : > { %v2443_v63 = vpop.f32.mrb[53].mxu1 }
 0x1c5   : > { %v1790_v32 = vmax.f32 %v1782_v55, %v1786_v54  ;;  %v1787_v34 = vmax.f32 %v3227_v51, %v1771_v58  ;;  %v2444_v42 = vadd.f32 %v2443_v63, %v2442_v59  ;;  %v2445_v60 = vpop.f32.mrb[54].mxu1 }
 0x1c6   : > { %v2446_v0 = vpop.f32.mrb[55].mxu1 }
 0x1c7   : > { %v1801_v4 = vadd.f32 %v2081_v62, %v1790_v32  ;;  %v1791_v48 = vmax.f32 %v1783_v61, %v1787_v34  ;;  %v1727_v1 = vadd.f32 %v2444_v42, %v1678_v25  ;;  %v2447_v5 = vadd.f32 %v2446_v0, %v2445_v60 }
 0x1c9   : > { %v1805_v7 = vmax.f32 %v1801_v4, 0.0  ;;  %v1802_v41 = vadd.f32 %v2081_v62, %v1791_v48  ;;  %v1776_v53 = vadd.f32 %v2482_v30, %v1727_v1  ;;  %v1730_v55 = vadd.f32 %v2447_v5, %v1681_v27 }
 0x1cb   : > { %v1816_v51 = vmul.f32 %v2082_v6, %v1805_v7  ;;  %v1806_v8 = vmax.f32 %v1802_v41, 0.0  ;;  %v1788_v9 = vmax.f32 %v3229_v33, %v1776_v53  ;;  %v1779_v10 = vadd.f32 %v2483_v39, %v1730_v55 }
 0x1cd   : > { %v1817_v56 = vmul.f32 %v2082_v6, %v1806_v8  ;;  %v1792_v61 = vmax.f32 %v1784_v45, %v1788_v9  ;;  %v1789_v11 = vmax.f32 %v3231_v57, %v1779_v10  ;;  %v1827_v12 = vadd.f32 %v2083_v44, %v1816_v51 }
 0x1cf   : > { %v1828_v13 = vadd.f32 %v2083_v44, %v1817_v56  ;;  %v1803_v14 = vadd.f32 %v2081_v62, %v1792_v61  ;;  %v1793_v33 = vmax.f32 %v1785_v52, %v1789_v11 }
 0x1d1   : > { %v2098_v15 = vpack.c.bf16 %v1828_v13, %v1827_v12  ;;  %v1807_v16 = vmax.f32 %v1803_v14, 0.0  ;;  %v1804_v17 = vadd.f32 %v2081_v62, %v1793_v33 }
 0x1d3   : > { %2099 = vst [vmem:[%s224_s17] sm:$0xff] %v2098_v15   ;;  %v1818_v18 = vmul.f32 %v2082_v6, %v1807_v16  ;;  %v1808_v2 = vmax.f32 %v1804_v17, 0.0 }
 0x1d5   : > { %v1829_v35 = vadd.f32 %v2083_v44, %v1818_v18  ;;  %v1819_v45 = vmul.f32 %v2082_v6, %v1808_v2 }
 0x1d7   : > { %v2093_v57 = vpack.c.bf16 %v1829_v35, %v1829_v35  ;;  %v1830_v19 = vadd.f32 %v2083_v44, %v1819_v45 }
 0x1d9   : > { %1849 = vst [vmem:[%s224_s17 + $0x8] sm:$0xf] %v2093_v57  ;;  %v2094_v3 = vpack.c.bf16 %v1830_v19, %v1830_v19 }
 0x1db   : > { %v1854_v50 = vsel %vm1852_vm3, %v2094_v3, %v1853_v20 }
 0x1dc   : > { %1855 = vst [vmem:[%s224_s17 + $0xc] sm:$0x1] %v1854_v50 }
 0x1dd PF: > { %s15_s18 = sadd.s32 1, %s2629_s18  }
 0x1de   : > { %p12_p4 = scmp.ge.s32.totalorder %s15_s18, 4  }
 0x1e0   :  { %14 = sbr.rel (!%p12_p4) target bundleno = 1 (0x1), region = 73 }

// kernel: net_forward.5
= control target key start
LH: loop header
LB: loop body
LE: loop exit
PB: predicated region body
PF: predicated region fallthrough
CT: control target
= control target key end

     0   :  { %v846_v36 = vlaneseq  ;;  %v8961_v37 = vmov 1966171168   ;;  %s11731_s0 = inlined_call_operand.vmem [shape: bf16[2,3200], index: 0, kind: input, shape index: {}]   ;;  %s11732_s1 = inlined_call_operand.vmem [shape: bf16[3200,512], index: 1, kind: input, shape index: {}]   ;;  %s11733_s2 = inlined_call_operand.vmem [shape: f32[1,512], index: 2, kind: input, shape index: {}]   ;;  %s11734_s3 = inlined_call_operand.vmem [shape: f32[1,512], index: 3, kind: input, shape index: {}]   ;;  %s11735_s4 = inlined_call_operand.vmem [shape: f32[1,512], index: 4, kind: input, shape index: {}]   ;;  %s11736_s5 = inlined_call_operand.vmem [shape: bf16[512,128], index: 5, kind: input, shape index: {}]   ;;  %s11737_s6 = inlined_call_operand.vmem [shape: f32[1,128], index: 6, kind: input, shape index: {}]   ;;  %s11738_s7 = inlined_call_operand.vmem [shape: f32[1,128], index: 7, kind: input, shape index: {}]   ;;  %s11739_s8 = inlined_call_operand.vmem [shape: f32[1,128], index: 8, kind: input, shape index: {}]   ;;  %s11740_s9 = inlined_call_operand.vmem [shape: bf16[128,128], index: 9, kind: input, shape index: {}]   ;;  %s11741_s10 = inlined_call_operand.vmem [shape: f32[1,128], index: 10, kind: input, shape index: {}]   ;;  %s11742_s11 = inlined_call_operand.hbm [shape: f32[2,128], index: 11, kind: output, shape index: {}]  }
   0x1   :  { %v7692_v0 = vld [vmem:[%s11732_s1 + $0x4] ss:$16 sps:$4 sm:$0xff]   ;;  %v7694_v1 = vld [vmem:[%s11732_s1 + $0xc] ss:$16 sps:$4 sm:$0xff]   ;;  %v7696_v2 = vld [vmem:[%s11732_s1] ss:$16 sps:$4 sm:$0xff]   ;;  %v872_v38 = vunpack.c.l.s4 %v8961_v37 }
   0x2   :  { %5056 = vmatprep.subr.bf16.mxu0 %v7692_v0  ;;  %v7697_v3 = vld [vmem:[%s11732_s1 + $0x8] ss:$16 sps:$4 sm:$0xff]   ;;  %5589 = vmatprep.subr.bf16.mxu1 %v7694_v1  ;;  %v7698_v4 = vld [vmem:[%s11732_s1 + $0x24] ss:$16 sps:$4 sm:$0xff]   ;;  %v7700_v5 = vld [vmem:[%s11732_s1 + $0x2c] ss:$16 sps:$4 sm:$0xff]  }
   0x3   :  { %5057 = vmatpush1.bf16.msra.mxu0 %v7696_v2  ;;  %5590 = vmatpush1.bf16.msra.mxu1 %v7697_v3  ;;  %v7702_v6 = vld [vmem:[%s11732_s1 + $0x20] ss:$16 sps:$4 sm:$0xff]   ;;  %v7703_v7 = vld [vmem:[%s11732_s1 + $0x28] ss:$16 sps:$4 sm:$0xff]   ;;  %v7704_v8 = vld [vmem:[%s11732_s1 + $0x44] ss:$16 sps:$4 sm:$0xff]   ;;  %v873_v43 = vunpack.c.0.s8 %v872_v38 }
   0x4   :  { %5058 = vmatprep.subr.bf16.mxu0 %v7698_v4  ;;  %5591 = vmatprep.subr.bf16.mxu1 %v7700_v5  ;;  %v7706_v9 = vld [vmem:[%s11732_s1 + $0x4c] ss:$16 sps:$4 sm:$0xff]   ;;  %v7708_v10 = vld [vmem:[%s11732_s1 + $0x40] ss:$16 sps:$4 sm:$0xff]   ;;  %v7709_v11 = vld [vmem:[%s11732_s1 + $0x48] ss:$16 sps:$4 sm:$0xff]  }
   0x5   :  { %v7710_v12 = vld [vmem:[%s11732_s1 + $0x64] ss:$16 sps:$4 sm:$0xff]   ;;  %v7712_v13 = vld [vmem:[%s11732_s1 + $0x6c] ss:$16 sps:$4 sm:$0xff]   ;;  %v7714_v14 = vld [vmem:[%s11732_s1 + $0x60] ss:$16 sps:$4 sm:$0xff]  }
   0x6   :  { %v7715_v15 = vld [vmem:[%s11732_s1 + $0x68] ss:$16 sps:$4 sm:$0xff]   ;;  %v7716_v16 = vld [vmem:[%s11732_s1 + $0x84] ss:$16 sps:$4 sm:$0xff]   ;;  %v7718_v17 = vld [vmem:[%s11732_s1 + $0x8c] ss:$16 sps:$4 sm:$0xff]  }
   0x7   :  { %5059 = vmatpush1.bf16.msra.mxu0 %v7702_v6  ;;  %5592 = vmatpush1.bf16.msra.mxu1 %v7703_v7  ;;  %v7720_v18 = vld [vmem:[%s11732_s1 + $0x80] ss:$16 sps:$4 sm:$0xff]   ;;  %v7721_v19 = vld [vmem:[%s11732_s1 + $0x88] ss:$16 sps:$4 sm:$0xff]   ;;  %v7722_v20 = vld [vmem:[%s11732_s1 + $0xa4] ss:$16 sps:$4 sm:$0xff]  }
   0x8   :  { %5060 = vmatprep.subr.bf16.mxu0 %v7704_v8  ;;  %5593 = vmatprep.subr.bf16.mxu1 %v7706_v9  ;;  %v7724_v21 = vld [vmem:[%s11732_s1 + $0xac] ss:$16 sps:$4 sm:$0xff]   ;;  %v7726_v22 = vld [vmem:[%s11732_s1 + $0xa0] ss:$16 sps:$4 sm:$0xff]   ;;  %v7727_v23 = vld [vmem:[%s11732_s1 + $0xa8] ss:$16 sps:$4 sm:$0xff]  }
   0x9   :  { %v7728_v24 = vld [vmem:[%s11732_s1 + $0xc4] ss:$16 sps:$4 sm:$0xff]   ;;  %v7730_v25 = vld [vmem:[%s11732_s1 + $0xcc] ss:$16 sps:$4 sm:$0xff]   ;;  %v7732_v26 = vld [vmem:[%s11732_s1 + $0xc0] ss:$16 sps:$4 sm:$0xff]  }
   0xa   :  { %v7733_v27 = vld [vmem:[%s11732_s1 + $0xc8] ss:$16 sps:$4 sm:$0xff]   ;;  %v7734_v28 = vld [vmem:[%s11732_s1 + $0xe4] ss:$16 sps:$4 sm:$0xff]   ;;  %v7736_v29 = vld [vmem:[%s11732_s1 + $0xec] ss:$16 sps:$4 sm:$0xff]  }
   0xb   :  { %5061 = vmatpush1.bf16.msra.mxu0 %v7708_v10  ;;  %5594 = vmatpush1.bf16.msra.mxu1 %v7709_v11  ;;  %v7738_v30 = vld [vmem:[%s11732_s1 + $0xe0] ss:$16 sps:$4 sm:$0xff]   ;;  %v7739_v31 = vld [vmem:[%s11732_s1 + $0xe8] ss:$16 sps:$4 sm:$0xff]   ;;  %v7740_v32 = vld [vmem:[%s11732_s1 + $0x104] ss:$16 sps:$4 sm:$0xff]  }
   0xc   :  { %5062 = vmatprep.subr.bf16.mxu0 %v7710_v12  ;;  %5595 = vmatprep.subr.bf16.mxu1 %v7712_v13  ;;  %v7742_v33 = vld [vmem:[%s11732_s1 + $0x10c] ss:$16 sps:$4 sm:$0xff]   ;;  %v7744_v34 = vld [vmem:[%s11732_s1 + $0x100] ss:$16 sps:$4 sm:$0xff]   ;;  %v7745_v35 = vld [vmem:[%s11732_s1 + $0x108] ss:$16 sps:$4 sm:$0xff]  }
   0xd   :  { %v7746_v39 = vld [vmem:[%s11732_s1 + $0x124] ss:$16 sps:$4 sm:$0xff]   ;;  %v7748_v40 = vld [vmem:[%s11732_s1 + $0x12c] ss:$16 sps:$4 sm:$0xff]   ;;  %v7750_v41 = vld [vmem:[%s11732_s1 + $0x120] ss:$16 sps:$4 sm:$0xff]  }
   0xe   :  { %v9143_v42 = vshrl.u32 %v846_v36, 7  ;;  %v7751_v44 = vld [vmem:[%s11732_s1 + $0x128] ss:$16 sps:$4 sm:$0xff]   ;;  %v7752_v45 = vld [vmem:[%s11732_s1 + $0x144] ss:$16 sps:$4 sm:$0xff]  }
   0xf   :  { %5063 = vmatpush1.bf16.msra.mxu0 %v7714_v14  ;;  %5596 = vmatpush1.bf16.msra.mxu1 %v7715_v15  ;;  %v7754_v46 = vld [vmem:[%s11732_s1 + $0x14c] ss:$16 sps:$4 sm:$0xff]   ;;  %v7756_v47 = vld [vmem:[%s11732_s1 + $0x140] ss:$16 sps:$4 sm:$0xff]   ;;  %v7757_v48 = vld [vmem:[%s11732_s1 + $0x148] ss:$16 sps:$4 sm:$0xff]  }
  0x10   :  { %5064 = vmatprep.subr.bf16.mxu0 %v7716_v16  ;;  %5597 = vmatprep.subr.bf16.mxu1 %v7718_v17  ;;  %v9161_v49 = vsub.s32 %v873_v43, %v9143_v42  ;;  %v7758_v50 = vld [vmem:[%s11732_s1 + $0x164] ss:$16 sps:$4 sm:$0xff]   ;;  %v7760_v51 = vld [vmem:[%s11732_s1 + $0x16c] ss:$16 sps:$4 sm:$0xff]   ;;  %v7762_v53 = vld [vmem:[%s11732_s1 + $0x160] ss:$16 sps:$4 sm:$0xff]  }
  0x11   :  { %v9172_v52 = vld [vmem:[%s11731_s0] sm:$0xff]  ;;  %v7763_v55 = vld [vmem:[%s11732_s1 + $0x168] ss:$16 sps:$4 sm:$0xff]   ;;  %v7766_v57 = vld [vmem:[%s11732_s1 + $0x18c] ss:$16 sps:$4 sm:$0xff]  }
  0x12   :  { %v877_v54 = vrot.slane %v9172_v52, %v9161_v49  ;;  %v7764_v56 = vld [vmem:[%s11732_s1 + $0x184] ss:$16 sps:$4 sm:$0xff]   ;;  %v7768_v59 = vld [vmem:[%s11732_s1 + $0x180] ss:$16 sps:$4 sm:$0xff]   ;;  %v7769_v61 = vld [vmem:[%s11732_s1 + $0x188] ss:$16 sps:$4 sm:$0xff]  }
  0x13   :  { %5065 = vmatpush1.bf16.msra.mxu0 %v7720_v18  ;;  %5598 = vmatpush1.bf16.msra.mxu1 %v7721_v19  ;;  %v7770_v62 = vld [vmem:[%s11732_s1 + $0x1a4] ss:$16 sps:$4 sm:$0xff]   ;;  %v7772_v63 = vld [vmem:[%s11732_s1 + $0x1ac] ss:$16 sps:$4 sm:$0xff]   ;;  %v7774_v0 = vld [vmem:[%s11732_s1 + $0x1a0] ss:$16 sps:$4 sm:$0xff]  }
  0x14   :  { %5066 = vmatprep.subr.bf16.mxu0 %v7722_v20  ;;  %5599 = vmatprep.subr.bf16.mxu1 %v7724_v21  ;;  %v885_v58 = vcombine.high %v877_v54, %v877_v54  ;;  %v7775_v1 = vld [vmem:[%s11732_s1 + $0x1a8] ss:$16 sps:$4 sm:$0xff]   ;;  %v7776_v2 = vld [vmem:[%s11732_s1 + $0x1c4] ss:$16 sps:$4 sm:$0xff]   ;;  %v7778_v3 = vld [vmem:[%s11732_s1 + $0x1cc] ss:$16 sps:$4 sm:$0xff]   ;;  %v9241_v13 = vrot.slane %v877_v54, %v9161_v49 }
  0x15   :  { %v7780_v4 = vld [vmem:[%s11732_s1 + $0x1c0] ss:$16 sps:$4 sm:$0xff]   ;;  %v7781_v5 = vld [vmem:[%s11732_s1 + $0x1c8] ss:$16 sps:$4 sm:$0xff]   ;;  %v7782_v6 = vld [vmem:[%s11732_s1 + $0x1e4] ss:$16 sps:$4 sm:$0xff]  }
  0x16   :  { %v907_v60 = vrot.slane %v885_v58, %v9161_v49  ;;  %v7784_v7 = vld [vmem:[%s11732_s1 + $0x1ec] ss:$16 sps:$4 sm:$0xff]   ;;  %v7786_v8 = vld [vmem:[%s11732_s1 + $0x1e0] ss:$16 sps:$4 sm:$0xff]   ;;  %v7787_v9 = vld [vmem:[%s11732_s1 + $0x1e8] ss:$16 sps:$4 sm:$0xff]  }
  0x17   :  { %5067 = vmatpush1.bf16.msra.mxu0 %v7726_v22  ;;  %5600 = vmatpush1.bf16.msra.mxu1 %v7727_v23  ;;  %v7790_v10 = vld [vmem:[%s11732_s1 + $0x204] ss:$16 sps:$4 sm:$0xff]   ;;  %v7793_v11 = vld [vmem:[%s11732_s1 + $0x20c] ss:$16 sps:$4 sm:$0xff]   ;;  %v7788_v12 = vld [vmem:[%s11732_s1 + $0x200] ss:$16 sps:$4 sm:$0xff]  }
  0x18   :  { %5068 = vmatprep.subr.bf16.mxu0 %v7728_v24  ;;  %5601 = vmatprep.subr.bf16.mxu1 %v7730_v25  ;;  %v7791_v14 = vld [vmem:[%s11732_s1 + $0x208] ss:$16 sps:$4 sm:$0xff]   ;;  %v7796_v15 = vld [vmem:[%s11732_s1 + $0x224] ss:$16 sps:$4 sm:$0xff]   ;;  %v7799_v16 = vld [vmem:[%s11732_s1 + $0x22c] ss:$16 sps:$4 sm:$0xff]   ;;  %v917_v17 = vcombine.high %v907_v60, %v907_v60 }
  0x19   :  { %5088 = vmatprep.mubr.bf16.mxu0 %v907_v60  ;;  %5621 = vmatprep.mubr.bf16.mxu1 %v907_v60  ;;  %v7794_v18 = vld [vmem:[%s11732_s1 + $0x220] ss:$16 sps:$4 sm:$0xff]   ;;  %v7797_v19 = vld [vmem:[%s11732_s1 + $0x228] ss:$16 sps:$4 sm:$0xff]   ;;  %v7802_v20 = vld [vmem:[%s11732_s1 + $0x244] ss:$16 sps:$4 sm:$0xff]  }
  0x1a   :  { %v7805_v21 = vld [vmem:[%s11732_s1 + $0x24c] ss:$16 sps:$4 sm:$0xff]   ;;  %v7800_v22 = vld [vmem:[%s11732_s1 + $0x240] ss:$16 sps:$4 sm:$0xff]   ;;  %v7803_v23 = vld [vmem:[%s11732_s1 + $0x248] ss:$16 sps:$4 sm:$0xff]  }
  0x1b   :  { %5069 = vmatpush1.bf16.msra.mxu0 %v7732_v26  ;;  %5602 = vmatpush1.bf16.msra.mxu1 %v7733_v27  ;;  %v7808_v24 = vld [vmem:[%s11732_s1 + $0x264] ss:$16 sps:$4 sm:$0xff]   ;;  %v7811_v25 = vld [vmem:[%s11732_s1 + $0x26c] ss:$16 sps:$4 sm:$0xff]   ;;  %v7806_v26 = vld [vmem:[%s11732_s1 + $0x260] ss:$16 sps:$4 sm:$0xff]  }
  0x1c   :  { %5070 = vmatprep.subr.bf16.mxu0 %v7734_v28  ;;  %5603 = vmatprep.subr.bf16.mxu1 %v7736_v29  ;;  %v7809_v27 = vld [vmem:[%s11732_s1 + $0x268] ss:$16 sps:$4 sm:$0xff]   ;;  %v7814_v28 = vld [vmem:[%s11732_s1 + $0x284] ss:$16 sps:$4 sm:$0xff]   ;;  %v7817_v29 = vld [vmem:[%s11732_s1 + $0x28c] ss:$16 sps:$4 sm:$0xff]  }
  0x1d   :  { %v7826_v36 = vld [vmem:[%s11732_s1 + $0x2c4] ss:$16 sps:$4 sm:$0xff]   ;;  %v7829_v37 = vld [vmem:[%s11732_s1 + $0x2cc] ss:$16 sps:$4 sm:$0xff]   ;;  %v7824_v38 = vld [vmem:[%s11732_s1 + $0x2c0] ss:$16 sps:$4 sm:$0xff]  }
  0x1e   :  { %v7830_v43 = vld [vmem:[%s11732_s1 + $0x2e0] ss:$16 sps:$4 sm:$0xff]   ;;  %v7845_v54 = vld [vmem:[%s11732_s1 + $0x328] ss:$16 sps:$4 sm:$0xff]   ;;  %v7859_v60 = vld [vmem:[%s11732_s1 + $0x36c] ss:$16 sps:$4 sm:$0xff]  }
  0x1f   :  { %5071 = vmatpush1.bf16.msra.mxu0 %v7738_v30  ;;  %5604 = vmatpush1.bf16.msra.mxu1 %v7739_v31  ;;  %v7812_v30 = vld [vmem:[%s11732_s1 + $0x280] ss:$16 sps:$4 sm:$0xff]   ;;  %v7815_v31 = vld [vmem:[%s11732_s1 + $0x288] ss:$16 sps:$4 sm:$0xff]  }
  0x20   :  { %5072 = vmatprep.subr.bf16.mxu0 %v7740_v32  ;;  %5605 = vmatprep.subr.bf16.mxu1 %v7742_v33  ;;  %v7820_v32 = vld [vmem:[%s11732_s1 + $0x2a4] ss:$16 sps:$4 sm:$0xff]   ;;  %v7823_v33 = vld [vmem:[%s11732_s1 + $0x2ac] ss:$16 sps:$4 sm:$0xff]   ;;  %v7851_v58 = vld [vmem:[%s11732_s1 + $0x348] ss:$16 sps:$4 sm:$0xff]  }
  0x23   :  { %5073 = vmatpush1.bf16.msra.mxu0 %v7744_v34  ;;  %5606 = vmatpush1.bf16.msra.mxu1 %v7745_v35  ;;  %v7818_v34 = vld [vmem:[%s11732_s1 + $0x2a0] ss:$16 sps:$4 sm:$0xff]   ;;  %v7821_v35 = vld [vmem:[%s11732_s1 + $0x2a8] ss:$16 sps:$4 sm:$0xff]  }
  0x24   :  { %5074 = vmatprep.subr.bf16.mxu0 %v7746_v39  ;;  %5607 = vmatprep.subr.bf16.mxu1 %v7748_v40  ;;  %v7827_v39 = vld [vmem:[%s11732_s1 + $0x2c8] ss:$16 sps:$4 sm:$0xff]   ;;  %v7832_v40 = vld [vmem:[%s11732_s1 + $0x2e4] ss:$16 sps:$4 sm:$0xff]  }
  0x27   :  { %5075 = vmatpush1.bf16.msra.mxu0 %v7750_v41  ;;  %5608 = vmatpush1.bf16.msra.mxu1 %v7751_v44  ;;  %v7835_v41 = vld [vmem:[%s11732_s1 + $0x2ec] ss:$16 sps:$4 sm:$0xff]   ;;  %v7833_v44 = vld [vmem:[%s11732_s1 + $0x2e8] ss:$16 sps:$4 sm:$0xff]  }
  0x28   :  { %5076 = vmatprep.subr.bf16.mxu0 %v7752_v45  ;;  %5609 = vmatprep.subr.bf16.mxu1 %v7754_v46  ;;  %v7838_v45 = vld [vmem:[%s11732_s1 + $0x304] ss:$16 sps:$4 sm:$0xff]   ;;  %v7841_v46 = vld [vmem:[%s11732_s1 + $0x30c] ss:$16 sps:$4 sm:$0xff]  }
  0x2b   :  { %5077 = vmatpush1.bf16.msra.mxu0 %v7756_v47  ;;  %5610 = vmatpush1.bf16.msra.mxu1 %v7757_v48  ;;  %v7836_v47 = vld [vmem:[%s11732_s1 + $0x300] ss:$16 sps:$4 sm:$0xff]   ;;  %v7839_v48 = vld [vmem:[%s11732_s1 + $0x308] ss:$16 sps:$4 sm:$0xff]  }
  0x2c   :  { %5078 = vmatprep.subr.bf16.mxu0 %v7758_v50  ;;  %5611 = vmatprep.subr.bf16.mxu1 %v7760_v51  ;;  %v7844_v50 = vld [vmem:[%s11732_s1 + $0x324] ss:$16 sps:$4 sm:$0xff]   ;;  %v7847_v51 = vld [vmem:[%s11732_s1 + $0x32c] ss:$16 sps:$4 sm:$0xff]  }
  0x2f   :  { %5079 = vmatpush1.bf16.msra.mxu0 %v7762_v53  ;;  %5612 = vmatpush1.bf16.msra.mxu1 %v7763_v55  ;;  %v7842_v53 = vld [vmem:[%s11732_s1 + $0x320] ss:$16 sps:$4 sm:$0xff]   ;;  %v7850_v55 = vld [vmem:[%s11732_s1 + $0x344] ss:$16 sps:$4 sm:$0xff]  }
  0x30   :  { %5080 = vmatprep.subr.bf16.mxu0 %v7764_v56  ;;  %5613 = vmatprep.subr.bf16.mxu1 %v7766_v57  ;;  %v7853_v56 = vld [vmem:[%s11732_s1 + $0x34c] ss:$16 sps:$4 sm:$0xff]   ;;  %v7848_v57 = vld [vmem:[%s11732_s1 + $0x340] ss:$16 sps:$4 sm:$0xff]  }
  0x33   :  { %5081 = vmatpush1.bf16.msra.mxu0 %v7768_v59  ;;  %5614 = vmatpush1.bf16.msra.mxu1 %v7769_v61  ;;  %v7856_v59 = vld [vmem:[%s11732_s1 + $0x364] ss:$16 sps:$4 sm:$0xff]   ;;  %v7854_v61 = vld [vmem:[%s11732_s1 + $0x360] ss:$16 sps:$4 sm:$0xff]  }
  0x34   :  { %5082 = vmatprep.subr.bf16.mxu0 %v7770_v62  ;;  %5615 = vmatprep.subr.bf16.mxu1 %v7772_v63  ;;  %v7857_v62 = vld [vmem:[%s11732_s1 + $0x368] ss:$16 sps:$4 sm:$0xff]   ;;  %v7862_v63 = vld [vmem:[%s11732_s1 + $0x384] ss:$16 sps:$4 sm:$0xff]  }
  0x37   :  { %5083 = vmatpush1.bf16.msra.mxu0 %v7774_v0  ;;  %5616 = vmatpush1.bf16.msra.mxu1 %v7775_v1  ;;  %v7865_v0 = vld [vmem:[%s11732_s1 + $0x38c] ss:$16 sps:$4 sm:$0xff]   ;;  %v7860_v1 = vld [vmem:[%s11732_s1 + $0x380] ss:$16 sps:$4 sm:$0xff]  }
  0x38   :  { %5084 = vmatprep.subr.bf16.mxu0 %v7776_v2  ;;  %5617 = vmatprep.subr.bf16.mxu1 %v7778_v3  ;;  %v7863_v2 = vld [vmem:[%s11732_s1 + $0x388] ss:$16 sps:$4 sm:$0xff]   ;;  %v7868_v3 = vld [vmem:[%s11732_s1 + $0x3a4] ss:$16 sps:$4 sm:$0xff]  }
  0x3b   :  { %5085 = vmatpush1.bf16.msra.mxu0 %v7780_v4  ;;  %5618 = vmatpush1.bf16.msra.mxu1 %v7781_v5  ;;  %v7871_v4 = vld [vmem:[%s11732_s1 + $0x3ac] ss:$16 sps:$4 sm:$0xff]   ;;  %v7866_v5 = vld [vmem:[%s11732_s1 + $0x3a0] ss:$16 sps:$4 sm:$0xff]  }
  0x3c   :  { %5086 = vmatprep.subr.bf16.mxu0 %v7782_v6  ;;  %5619 = vmatprep.subr.bf16.mxu1 %v7784_v7  ;;  %v7869_v6 = vld [vmem:[%s11732_s1 + $0x3a8] ss:$16 sps:$4 sm:$0xff]   ;;  %v7874_v7 = vld [vmem:[%s11732_s1 + $0x3c4] ss:$16 sps:$4 sm:$0xff]  }
  0x3f   :  { %5087 = vmatpush1.bf16.msra.mxu0 %v7786_v8  ;;  %5620 = vmatpush1.bf16.msra.mxu1 %v7787_v9  ;;  %v7877_v8 = vld [vmem:[%s11732_s1 + $0x3cc] ss:$16 sps:$4 sm:$0xff]   ;;  %v870_v9 = vcombine.high %v9172_v52, %v9172_v52 }
  0x40   :  { %5097 = vmatprep.subr.bf16.mxu0 %v7790_v10  ;;  %5630 = vmatprep.subr.bf16.mxu1 %v7793_v11  ;;  %v7872_v10 = vld [vmem:[%s11732_s1 + $0x3c0] ss:$16 sps:$4 sm:$0xff]   ;;  %v7875_v11 = vld [vmem:[%s11732_s1 + $0x3c8] ss:$16 sps:$4 sm:$0xff]   ;;  %v7883_v52 = vld [vmem:[%s11732_s1 + $0x3ec] ss:$16 sps:$4 sm:$0xff]  }
  0x42   :  { %5089 = vmatmul.mubr.bf16.vlgmr.msra.gmra.mrb[0].mxu0 %v9241_v13  ;;  %5622 = vmatmul.mubr.bf16.vlgmr.msra.gmra.mrb[0].mxu1 %v9241_v13 }
  0x43   :  { %5098 = vmatpush1.bf16.msra.mxu0 %v7788_v12  ;;  %5631 = vmatpush1.bf16.msra.mxu1 %v7791_v14  ;;  %v7880_v12 = vld [vmem:[%s11732_s1 + $0x3e4] ss:$16 sps:$4 sm:$0xff]   ;;  %v9425_v14 = vrot.slane %v870_v9, %v9161_v49  ;;  %v7959_v9 = vld [vmem:[%s11732_s1 + $0x588] ss:$16 sps:$4 sm:$0xff]  }
  0x44   :  { %5099 = vmatprep.subr.bf16.mxu0 %v7796_v15  ;;  %5632 = vmatprep.subr.bf16.mxu1 %v7799_v16  ;;  %v7878_v15 = vld [vmem:[%s11732_s1 + $0x3e0] ss:$16 sps:$4 sm:$0xff]   ;;  %v7881_v16 = vld [vmem:[%s11732_s1 + $0x3e8] ss:$16 sps:$4 sm:$0xff]  }
  0x45   :  { %5129 = vmatprep.mubr.bf16.mxu0 %v917_v17  ;;  %5662 = vmatprep.mubr.bf16.mxu1 %v917_v17  ;;  %v7886_v17 = vld [vmem:[%s11732_s1 + $0x404] ss:$16 sps:$4 sm:$0xff]  }
  0x47   :  { %5100 = vmatpush1.bf16.msra.mxu0 %v7794_v18  ;;  %5633 = vmatpush1.bf16.msra.mxu1 %v7797_v19  ;;  %v7889_v18 = vld [vmem:[%s11732_s1 + $0x40c] ss:$16 sps:$4 sm:$0xff]   ;;  %v886_v19 = vcombine.high %v9425_v14, %v9425_v14 }
  0x48   :  { %5101 = vmatprep.subr.bf16.mxu0 %v7802_v20  ;;  %5634 = vmatprep.subr.bf16.mxu1 %v7805_v21  ;;  %v7884_v20 = vld [vmem:[%s11732_s1 + $0x400] ss:$16 sps:$4 sm:$0xff]   ;;  %v915_v21 = vcombine.high %v9241_v13, %v9241_v13 }
  0x49   :  { %v7890_v13 = vld [vmem:[%s11732_s1 + $0x420] ss:$16 sps:$4 sm:$0xff]  }
  0x4b   :  { %5102 = vmatpush1.bf16.msra.mxu0 %v7800_v22  ;;  %5635 = vmatpush1.bf16.msra.mxu1 %v7803_v23  ;;  %v7887_v22 = vld [vmem:[%s11732_s1 + $0x408] ss:$16 sps:$4 sm:$0xff]   ;;  %v7892_v23 = vld [vmem:[%s11732_s1 + $0x424] ss:$16 sps:$4 sm:$0xff]  }
  0x4c   :  { %5103 = vmatprep.subr.bf16.mxu0 %v7808_v24  ;;  %5636 = vmatprep.subr.bf16.mxu1 %v7811_v25  ;;  %v7895_v24 = vld [vmem:[%s11732_s1 + $0x42c] ss:$16 sps:$4 sm:$0xff]   ;;  %v9456_v25 = vrot.slane %v886_v19, %v9161_v49  ;;  %v7976_v19 = vld [vmem:[%s11732_s1 + $0x5e4] ss:$16 sps:$4 sm:$0xff]  }
  0x4f   :  { %5104 = vmatpush1.bf16.msra.mxu0 %v7806_v26  ;;  %5637 = vmatpush1.bf16.msra.mxu1 %v7809_v27  ;;  %v7893_v26 = vld [vmem:[%s11732_s1 + $0x428] ss:$16 sps:$4 sm:$0xff]   ;;  %v7898_v27 = vld [vmem:[%s11732_s1 + $0x444] ss:$16 sps:$4 sm:$0xff]  }
  0x50   :  { %5105 = vmatprep.subr.bf16.mxu0 %v7814_v28  ;;  %5638 = vmatprep.subr.bf16.mxu1 %v7817_v29  ;;  %v7901_v28 = vld [vmem:[%s11732_s1 + $0x44c] ss:$16 sps:$4 sm:$0xff]   ;;  %v7896_v29 = vld [vmem:[%s11732_s1 + $0x440] ss:$16 sps:$4 sm:$0xff]  }
  0x53   :  { %5106 = vmatpush1.bf16.msra.mxu0 %v7812_v30  ;;  %5639 = vmatpush1.bf16.msra.mxu1 %v7815_v31  ;;  %v7899_v30 = vld [vmem:[%s11732_s1 + $0x448] ss:$16 sps:$4 sm:$0xff]   ;;  %v7904_v31 = vld [vmem:[%s11732_s1 + $0x464] ss:$16 sps:$4 sm:$0xff]  }
  0x54   :  { %5107 = vmatprep.subr.bf16.mxu0 %v7820_v32  ;;  %5640 = vmatprep.subr.bf16.mxu1 %v7823_v33  ;;  %v7907_v32 = vld [vmem:[%s11732_s1 + $0x46c] ss:$16 sps:$4 sm:$0xff]   ;;  %v7902_v33 = vld [vmem:[%s11732_s1 + $0x460] ss:$16 sps:$4 sm:$0xff]  }
  0x57   :  { %5108 = vmatpush1.bf16.msra.mxu0 %v7818_v34  ;;  %5641 = vmatpush1.bf16.msra.mxu1 %v7821_v35  ;;  %v7905_v34 = vld [vmem:[%s11732_s1 + $0x468] ss:$16 sps:$4 sm:$0xff]   ;;  %v7910_v35 = vld [vmem:[%s11732_s1 + $0x484] ss:$16 sps:$4 sm:$0xff]  }
  0x58   :  { %5109 = vmatprep.subr.bf16.mxu0 %v7826_v36  ;;  %5642 = vmatprep.subr.bf16.mxu1 %v7829_v37  ;;  %v7913_v36 = vld [vmem:[%s11732_s1 + $0x48c] ss:$16 sps:$4 sm:$0xff]   ;;  %v7908_v37 = vld [vmem:[%s11732_s1 + $0x480] ss:$16 sps:$4 sm:$0xff]  }
  0x5b   :  { %5110 = vmatpush1.bf16.msra.mxu0 %v7824_v38  ;;  %5643 = vmatpush1.bf16.msra.mxu1 %v7827_v39  ;;  %v7911_v38 = vld [vmem:[%s11732_s1 + $0x488] ss:$16 sps:$4 sm:$0xff]   ;;  %v7916_v39 = vld [vmem:[%s11732_s1 + $0x4a4] ss:$16 sps:$4 sm:$0xff]  }
  0x5c   :  { %5111 = vmatprep.subr.bf16.mxu0 %v7832_v40  ;;  %5644 = vmatprep.subr.bf16.mxu1 %v7835_v41  ;;  %v7919_v40 = vld [vmem:[%s11732_s1 + $0x4ac] ss:$16 sps:$4 sm:$0xff]   ;;  %v7914_v41 = vld [vmem:[%s11732_s1 + $0x4a0] ss:$16 sps:$4 sm:$0xff]  }
  0x5f   :  { %5112 = vmatpush1.bf16.msra.mxu0 %v7830_v43  ;;  %5645 = vmatpush1.bf16.msra.mxu1 %v7833_v44  ;;  %v7917_v43 = vld [vmem:[%s11732_s1 + $0x4a8] ss:$16 sps:$4 sm:$0xff]   ;;  %v7922_v44 = vld [vmem:[%s11732_s1 + $0x4c4] ss:$16 sps:$4 sm:$0xff]  }
  0x60   :  { %5113 = vmatprep.subr.bf16.mxu0 %v7838_v45  ;;  %5646 = vmatprep.subr.bf16.mxu1 %v7841_v46  ;;  %v7925_v45 = vld [vmem:[%s11732_s1 + $0x4cc] ss:$16 sps:$4 sm:$0xff]   ;;  %v7920_v46 = vld [vmem:[%s11732_s1 + $0x4c0] ss:$16 sps:$4 sm:$0xff]  }
  0x63   :  { %5114 = vmatpush1.bf16.msra.mxu0 %v7836_v47  ;;  %5647 = vmatpush1.bf16.msra.mxu1 %v7839_v48  ;;  %v7923_v47 = vld [vmem:[%s11732_s1 + $0x4c8] ss:$16 sps:$4 sm:$0xff]   ;;  %v7928_v48 = vld [vmem:[%s11732_s1 + $0x4e4] ss:$16 sps:$4 sm:$0xff]  }
  0x64   :  { %5115 = vmatprep.subr.bf16.mxu0 %v7844_v50  ;;  %5648 = vmatprep.subr.bf16.mxu1 %v7847_v51  ;;  %v7931_v50 = vld [vmem:[%s11732_s1 + $0x4ec] ss:$16 sps:$4 sm:$0xff]   ;;  %v7926_v51 = vld [vmem:[%s11732_s1 + $0x4e0] ss:$16 sps:$4 sm:$0xff]  }
  0x67   :  { %5116 = vmatpush1.bf16.msra.mxu0 %v7842_v53  ;;  %5649 = vmatpush1.bf16.msra.mxu1 %v7845_v54  ;;  %v7929_v53 = vld [vmem:[%s11732_s1 + $0x4e8] ss:$16 sps:$4 sm:$0xff]   ;;  %v7934_v54 = vld [vmem:[%s11732_s1 + $0x504] ss:$16 sps:$4 sm:$0xff]  }
  0x68   :  { %5117 = vmatprep.subr.bf16.mxu0 %v7850_v55  ;;  %5650 = vmatprep.subr.bf16.mxu1 %v7853_v56  ;;  %v7937_v55 = vld [vmem:[%s11732_s1 + $0x50c] ss:$16 sps:$4 sm:$0xff]   ;;  %v7932_v56 = vld [vmem:[%s11732_s1 + $0x500] ss:$16 sps:$4 sm:$0xff]  }
  0x6b   :  { %5118 = vmatpush1.bf16.msra.mxu0 %v7848_v57  ;;  %5651 = vmatpush1.bf16.msra.mxu1 %v7851_v58  ;;  %v7935_v57 = vld [vmem:[%s11732_s1 + $0x508] ss:$16 sps:$4 sm:$0xff]   ;;  %v7940_v58 = vld [vmem:[%s11732_s1 + $0x524] ss:$16 sps:$4 sm:$0xff]  }
  0x6c   :  { %5119 = vmatprep.subr.bf16.mxu0 %v7856_v59  ;;  %5652 = vmatprep.subr.bf16.mxu1 %v7859_v60  ;;  %v7943_v59 = vld [vmem:[%s11732_s1 + $0x52c] ss:$16 sps:$4 sm:$0xff]   ;;  %v7938_v60 = vld [vmem:[%s11732_s1 + $0x520] ss:$16 sps:$4 sm:$0xff]  }
  0x6f   :  { %5120 = vmatpush1.bf16.msra.mxu0 %v7854_v61  ;;  %5653 = vmatpush1.bf16.msra.mxu1 %v7857_v62  ;;  %v7941_v61 = vld [vmem:[%s11732_s1 + $0x528] ss:$16 sps:$4 sm:$0xff]   ;;  %v7946_v62 = vld [vmem:[%s11732_s1 + $0x544] ss:$16 sps:$4 sm:$0xff]  }
  0x70   :  { %5121 = vmatprep.subr.bf16.mxu0 %v7862_v63  ;;  %5654 = vmatprep.subr.bf16.mxu1 %v7865_v0  ;;  %v7949_v63 = vld [vmem:[%s11732_s1 + $0x54c] ss:$16 sps:$4 sm:$0xff]   ;;  %v7944_v0 = vld [vmem:[%s11732_s1 + $0x540] ss:$16 sps:$4 sm:$0xff]  }
  0x73   :  { %5122 = vmatpush1.bf16.msra.mxu0 %v7860_v1  ;;  %5655 = vmatpush1.bf16.msra.mxu1 %v7863_v2  ;;  %v7947_v1 = vld [vmem:[%s11732_s1 + $0x548] ss:$16 sps:$4 sm:$0xff]   ;;  %v7952_v2 = vld [vmem:[%s11732_s1 + $0x564] ss:$16 sps:$4 sm:$0xff]  }
  0x74   :  { %5123 = vmatprep.subr.bf16.mxu0 %v7868_v3  ;;  %5656 = vmatprep.subr.bf16.mxu1 %v7871_v4  ;;  %v7955_v3 = vld [vmem:[%s11732_s1 + $0x56c] ss:$16 sps:$4 sm:$0xff]   ;;  %v7950_v4 = vld [vmem:[%s11732_s1 + $0x560] ss:$16 sps:$4 sm:$0xff]  }
  0x77   :  { %5124 = vmatpush1.bf16.msra.mxu0 %v7866_v5  ;;  %5657 = vmatpush1.bf16.msra.mxu1 %v7869_v6  ;;  %v7953_v5 = vld [vmem:[%s11732_s1 + $0x568] ss:$16 sps:$4 sm:$0xff]   ;;  %v7958_v6 = vld [vmem:[%s11732_s1 + $0x584] ss:$16 sps:$4 sm:$0xff]  }
  0x78   :  { %5125 = vmatprep.subr.bf16.mxu0 %v7874_v7  ;;  %5658 = vmatprep.subr.bf16.mxu1 %v7877_v8  ;;  %v7961_v7 = vld [vmem:[%s11732_s1 + $0x58c] ss:$16 sps:$4 sm:$0xff]   ;;  %v7956_v8 = vld [vmem:[%s11732_s1 + $0x580] ss:$16 sps:$4 sm:$0xff]  }
  0x7b   :  { %5126 = vmatpush1.bf16.msra.mxu0 %v7872_v10  ;;  %5659 = vmatpush1.bf16.msra.mxu1 %v7875_v11  ;;  %v7964_v10 = vld [vmem:[%s11732_s1 + $0x5a4] ss:$16 sps:$4 sm:$0xff]   ;;  %v7967_v11 = vld [vmem:[%s11732_s1 + $0x5ac] ss:$16 sps:$4 sm:$0xff]  }
  0x7c   :  { %5127 = vmatprep.subr.bf16.mxu0 %v7880_v12  ;;  %5660 = vmatprep.subr.bf16.mxu1 %v7883_v52  ;;  %v7962_v12 = vld [vmem:[%s11732_s1 + $0x5a0] ss:$16 sps:$4 sm:$0xff]   ;;  %v7965_v52 = vld [vmem:[%s11732_s1 + $0x5a8] ss:$16 sps:$4 sm:$0xff]  }
  0x7f   :  { %5128 = vmatpush1.bf16.msra.mxu0 %v7878_v15  ;;  %5661 = vmatpush1.bf16.msra.mxu1 %v7881_v16  ;;  %v7970_v15 = vld [vmem:[%s11732_s1 + $0x5c4] ss:$16 sps:$4 sm:$0xff]   ;;  %v7973_v16 = vld [vmem:[%s11732_s1 + $0x5cc] ss:$16 sps:$4 sm:$0xff]  }
  0x80   :  { %5138 = vmatprep.subr.bf16.mxu0 %v7886_v17  ;;  %5671 = vmatprep.subr.bf16.mxu1 %v7889_v18  ;;  %v7968_v17 = vld [vmem:[%s11732_s1 + $0x5c0] ss:$16 sps:$4 sm:$0xff]   ;;  %v7971_v18 = vld [vmem:[%s11732_s1 + $0x5c8] ss:$16 sps:$4 sm:$0xff]  }
  0x82   :  { %5130 = vmatmul.mubr.bf16.vlgmr.msra.gmra.mrb[0].mxu0 %v915_v21  ;;  %5663 = vmatmul.mubr.bf16.vlgmr.msra.gmra.mrb[0].mxu1 %v915_v21  ;;  %v7974_v21 = vld [vmem:[%s11732_s1 + $0x5e0] ss:$16 sps:$4 sm:$0xff]  }
  0x83   :  { %5139 = vmatpush1.bf16.msra.mxu0 %v7884_v20  ;;  %5672 = vmatpush1.bf16.msra.mxu1 %v7887_v22  ;;  %v7979_v20 = vld [vmem:[%s11732_s1 + $0x5ec] ss:$16 sps:$4 sm:$0xff]   ;;  %v7977_v22 = vld [vmem:[%s11732_s1 + $0x5e8] ss:$16 sps:$4 sm:$0xff]  }
  0x84   :  { %5140 = vmatprep.subr.bf16.mxu0 %v7892_v23  ;;  %5673 = vmatprep.subr.bf16.mxu1 %v7895_v24  ;;  %v7983_v23 = vld [vmem:[%s11732_s1 + $0x604] ss:$16 sps:$4 sm:$0xff]   ;;  %v7986_v24 = vld [vmem:[%s11732_s1 + $0x60c] ss:$16 sps:$4 sm:$0xff]  }
  0x85   :  { %5170 = vmatprep.mubr.bf16.mxu0 %v9456_v25  ;;  %5703 = vmatprep.mubr.bf16.mxu1 %v9456_v25 }
  0x87   :  { %5141 = vmatpush1.bf16.msra.mxu0 %v7890_v13  ;;  %5674 = vmatpush1.bf16.msra.mxu1 %v7893_v26  ;;  %v7981_v13 = vld [vmem:[%s11732_s1 + $0x600] ss:$16 sps:$4 sm:$0xff]   ;;  %v9645_v26 = vrot.slane %v9425_v14, %v9161_v49  ;;  %v918_v14 = vcombine.high %v9456_v25, %v9456_v25  ;;  %v7995_v25 = vld [vmem:[%s11732_s1 + $0x644] ss:$16 sps:$4 sm:$0xff]  }
  0x88   :  { %5142 = vmatprep.subr.bf16.mxu0 %v7898_v27  ;;  %5675 = vmatprep.subr.bf16.mxu1 %v7901_v28  ;;  %v7984_v27 = vld [vmem:[%s11732_s1 + $0x608] ss:$16 sps:$4 sm:$0xff]   ;;  %v7989_v28 = vld [vmem:[%s11732_s1 + $0x624] ss:$16 sps:$4 sm:$0xff]  }
  0x8b   :  { %5143 = vmatpush1.bf16.msra.mxu0 %v7896_v29  ;;  %5676 = vmatpush1.bf16.msra.mxu1 %v7899_v30  ;;  %v7992_v29 = vld [vmem:[%s11732_s1 + $0x62c] ss:$16 sps:$4 sm:$0xff]   ;;  %v7987_v30 = vld [vmem:[%s11732_s1 + $0x620] ss:$16 sps:$4 sm:$0xff]  }
  0x8c   :  { %5144 = vmatprep.subr.bf16.mxu0 %v7904_v31  ;;  %5677 = vmatprep.subr.bf16.mxu1 %v7907_v32  ;;  %v7990_v31 = vld [vmem:[%s11732_s1 + $0x628] ss:$16 sps:$4 sm:$0xff]   ;;  %v7998_v32 = vld [vmem:[%s11732_s1 + $0x64c] ss:$16 sps:$4 sm:$0xff]  }
  0x8f   :  { %5145 = vmatpush1.bf16.msra.mxu0 %v7902_v33  ;;  %5678 = vmatpush1.bf16.msra.mxu1 %v7905_v34  ;;  %v7993_v33 = vld [vmem:[%s11732_s1 + $0x640] ss:$16 sps:$4 sm:$0xff]   ;;  %v7996_v34 = vld [vmem:[%s11732_s1 + $0x648] ss:$16 sps:$4 sm:$0xff]  }
  0x90   :  { %5146 = vmatprep.subr.bf16.mxu0 %v7910_v35  ;;  %5679 = vmatprep.subr.bf16.mxu1 %v7913_v36  ;;  %v8001_v35 = vld [vmem:[%s11732_s1 + $0x664] ss:$16 sps:$4 sm:$0xff]   ;;  %v8004_v36 = vld [vmem:[%s11732_s1 + $0x66c] ss:$16 sps:$4 sm:$0xff]  }
  0x93   :  { %5147 = vmatpush1.bf16.msra.mxu0 %v7908_v37  ;;  %5680 = vmatpush1.bf16.msra.mxu1 %v7911_v38  ;;  %v7999_v37 = vld [vmem:[%s11732_s1 + $0x660] ss:$16 sps:$4 sm:$0xff]   ;;  %v8002_v38 = vld [vmem:[%s11732_s1 + $0x668] ss:$16 sps:$4 sm:$0xff]  }
  0x94   :  { %5148 = vmatprep.subr.bf16.mxu0 %v7916_v39  ;;  %5681 = vmatprep.subr.bf16.mxu1 %v7919_v40  ;;  %v8007_v39 = vld [vmem:[%s11732_s1 + $0x684] ss:$16 sps:$4 sm:$0xff]   ;;  %v8010_v40 = vld [vmem:[%s11732_s1 + $0x68c] ss:$16 sps:$4 sm:$0xff]  }
  0x97   :  { %5149 = vmatpush1.bf16.msra.mxu0 %v7914_v41  ;;  %5682 = vmatpush1.bf16.msra.mxu1 %v7917_v43  ;;  %v8005_v41 = vld [vmem:[%s11732_s1 + $0x680] ss:$16 sps:$4 sm:$0xff]   ;;  %v8008_v43 = vld [vmem:[%s11732_s1 + $0x688] ss:$16 sps:$4 sm:$0xff]  }
  0x98   :  { %5150 = vmatprep.subr.bf16.mxu0 %v7922_v44  ;;  %5683 = vmatprep.subr.bf16.mxu1 %v7925_v45  ;;  %v8013_v44 = vld [vmem:[%s11732_s1 + $0x6a4] ss:$16 sps:$4 sm:$0xff]   ;;  %v8016_v45 = vld [vmem:[%s11732_s1 + $0x6ac] ss:$16 sps:$4 sm:$0xff]  }
  0x9b   :  { %5151 = vmatpush1.bf16.msra.mxu0 %v7920_v46  ;;  %5684 = vmatpush1.bf16.msra.mxu1 %v7923_v47  ;;  %v8011_v46 = vld [vmem:[%s11732_s1 + $0x6a0] ss:$16 sps:$4 sm:$0xff]   ;;  %v8014_v47 = vld [vmem:[%s11732_s1 + $0x6a8] ss:$16 sps:$4 sm:$0xff]  }
  0x9c   :  { %5152 = vmatprep.subr.bf16.mxu0 %v7928_v48  ;;  %5685 = vmatprep.subr.bf16.mxu1 %v7931_v50  ;;  %v8019_v48 = vld [vmem:[%s11732_s1 + $0x6c4] ss:$16 sps:$4 sm:$0xff]   ;;  %v8022_v50 = vld [vmem:[%s11732_s1 + $0x6cc] ss:$16 sps:$4 sm:$0xff]  }
  0x9f   :  { %5153 = vmatpush1.bf16.msra.mxu0 %v7926_v51  ;;  %5686 = vmatpush1.bf16.msra.mxu1 %v7929_v53  ;;  %v8017_v51 = vld [vmem:[%s11732_s1 + $0x6c0] ss:$16 sps:$4 sm:$0xff]   ;;  %v8020_v53 = vld [vmem:[%s11732_s1 + $0x6c8] ss:$16 sps:$4 sm:$0xff]  }
  0xa0   :  { %5154 = vmatprep.subr.bf16.mxu0 %v7934_v54  ;;  %5687 = vmatprep.subr.bf16.mxu1 %v7937_v55  ;;  %v8025_v54 = vld [vmem:[%s11732_s1 + $0x6e4] ss:$16 sps:$4 sm:$0xff]   ;;  %v8028_v55 = vld [vmem:[%s11732_s1 + $0x6ec] ss:$16 sps:$4 sm:$0xff]  }
  0xa3   :  { %5155 = vmatpush1.bf16.msra.mxu0 %v7932_v56  ;;  %5688 = vmatpush1.bf16.msra.mxu1 %v7935_v57  ;;  %v8023_v56 = vld [vmem:[%s11732_s1 + $0x6e0] ss:$16 sps:$4 sm:$0xff]   ;;  %v8026_v57 = vld [vmem:[%s11732_s1 + $0x6e8] ss:$16 sps:$4 sm:$0xff]  }
  0xa4   :  { %5156 = vmatprep.subr.bf16.mxu0 %v7940_v58  ;;  %5689 = vmatprep.subr.bf16.mxu1 %v7943_v59  ;;  %v8031_v58 = vld [vmem:[%s11732_s1 + $0x704] ss:$16 sps:$4 sm:$0xff]   ;;  %v8034_v59 = vld [vmem:[%s11732_s1 + $0x70c] ss:$16 sps:$4 sm:$0xff]  }
  0xa7   :  { %5157 = vmatpush1.bf16.msra.mxu0 %v7938_v60  ;;  %5690 = vmatpush1.bf16.msra.mxu1 %v7941_v61  ;;  %v8029_v60 = vld [vmem:[%s11732_s1 + $0x700] ss:$16 sps:$4 sm:$0xff]   ;;  %v8032_v61 = vld [vmem:[%s11732_s1 + $0x708] ss:$16 sps:$4 sm:$0xff]  }
  0xa8   :  { %5158 = vmatprep.subr.bf16.mxu0 %v7946_v62  ;;  %5691 = vmatprep.subr.bf16.mxu1 %v7949_v63  ;;  %v8037_v62 = vld [vmem:[%s11732_s1 + $0x724] ss:$16 sps:$4 sm:$0xff]   ;;  %v8040_v63 = vld [vmem:[%s11732_s1 + $0x72c] ss:$16 sps:$4 sm:$0xff]  }
  0xab   :  { %5159 = vmatpush1.bf16.msra.mxu0 %v7944_v0  ;;  %5692 = vmatpush1.bf16.msra.mxu1 %v7947_v1  ;;  %v8035_v0 = vld [vmem:[%s11732_s1 + $0x720] ss:$16 sps:$4 sm:$0xff]   ;;  %v8038_v1 = vld [vmem:[%s11732_s1 + $0x728] ss:$16 sps:$4 sm:$0xff]  }
  0xac   :  { %5160 = vmatprep.subr.bf16.mxu0 %v7952_v2  ;;  %5693 = vmatprep.subr.bf16.mxu1 %v7955_v3  ;;  %v8043_v2 = vld [vmem:[%s11732_s1 + $0x744] ss:$16 sps:$4 sm:$0xff]   ;;  %v8046_v3 = vld [vmem:[%s11732_s1 + $0x74c] ss:$16 sps:$4 sm:$0xff]  }
  0xaf   :  { %5161 = vmatpush1.bf16.msra.mxu0 %v7950_v4  ;;  %5694 = vmatpush1.bf16.msra.mxu1 %v7953_v5  ;;  %v8041_v4 = vld [vmem:[%s11732_s1 + $0x740] ss:$16 sps:$4 sm:$0xff]   ;;  %v8044_v5 = vld [vmem:[%s11732_s1 + $0x748] ss:$16 sps:$4 sm:$0xff]  }
  0xb0   :  { %5162 = vmatprep.subr.bf16.mxu0 %v7958_v6  ;;  %5695 = vmatprep.subr.bf16.mxu1 %v7961_v7  ;;  %v8049_v6 = vld [vmem:[%s11732_s1 + $0x764] ss:$16 sps:$4 sm:$0xff]   ;;  %v8052_v7 = vld [vmem:[%s11732_s1 + $0x76c] ss:$16 sps:$4 sm:$0xff]  }
  0xb3   :  { %5163 = vmatpush1.bf16.msra.mxu0 %v7956_v8  ;;  %5696 = vmatpush1.bf16.msra.mxu1 %v7959_v9  ;;  %v8047_v8 = vld [vmem:[%s11732_s1 + $0x760] ss:$16 sps:$4 sm:$0xff]   ;;  %v8050_v9 = vld [vmem:[%s11732_s1 + $0x768] ss:$16 sps:$4 sm:$0xff]  }
  0xb4   :  { %5164 = vmatprep.subr.bf16.mxu0 %v7964_v10  ;;  %5697 = vmatprep.subr.bf16.mxu1 %v7967_v11  ;;  %v8055_v10 = vld [vmem:[%s11732_s1 + $0x784] ss:$16 sps:$4 sm:$0xff]   ;;  %v8058_v11 = vld [vmem:[%s11732_s1 + $0x78c] ss:$16 sps:$4 sm:$0xff]  }
  0xb7   :  { %5165 = vmatpush1.bf16.msra.mxu0 %v7962_v12  ;;  %5698 = vmatpush1.bf16.msra.mxu1 %v7965_v52  ;;  %v8053_v12 = vld [vmem:[%s11732_s1 + $0x780] ss:$16 sps:$4 sm:$0xff]   ;;  %v8056_v52 = vld [vmem:[%s11732_s1 + $0x788] ss:$16 sps:$4 sm:$0xff]  }
  0xb8   :  { %5166 = vmatprep.subr.bf16.mxu0 %v7970_v15  ;;  %5699 = vmatprep.subr.bf16.mxu1 %v7973_v16  ;;  %v8061_v15 = vld [vmem:[%s11732_s1 + $0x7a4] ss:$16 sps:$4 sm:$0xff]   ;;  %v8064_v16 = vld [vmem:[%s11732_s1 + $0x7ac] ss:$16 sps:$4 sm:$0xff]  }
  0xbb   :  { %5167 = vmatpush1.bf16.msra.mxu0 %v7968_v17  ;;  %5700 = vmatpush1.bf16.msra.mxu1 %v7971_v18  ;;  %v8059_v17 = vld [vmem:[%s11732_s1 + $0x7a0] ss:$16 sps:$4 sm:$0xff]   ;;  %v8062_v18 = vld [vmem:[%s11732_s1 + $0x7a8] ss:$16 sps:$4 sm:$0xff]  }
  0xbc   :  { %5168 = vmatprep.subr.bf16.mxu0 %v7976_v19  ;;  %5701 = vmatprep.subr.bf16.mxu1 %v7979_v20  ;;  %v8067_v19 = vld [vmem:[%s11732_s1 + $0x7c4] ss:$16 sps:$4 sm:$0xff]   ;;  %v8070_v20 = vld [vmem:[%s11732_s1 + $0x7cc] ss:$16 sps:$4 sm:$0xff]  }
  0xbf   :  { %5169 = vmatpush1.bf16.msra.mxu0 %v7974_v21  ;;  %5702 = vmatpush1.bf16.msra.mxu1 %v7977_v22  ;;  %v9819_v21 = vld.sshfl [vmem:[%s11731_s0 + $0x8] sm:$0xff pattern:$0x75316420]  ;;  %v8065_v22 = vld [vmem:[%s11732_s1 + $0x7c0] ss:$16 sps:$4 sm:$0xff]  }
  0xc0   :  { %5179 = vmatprep.subr.bf16.mxu0 %v7983_v23  ;;  %5712 = vmatprep.subr.bf16.mxu1 %v7986_v24  ;;  %v8068_v23 = vld [vmem:[%s11732_s1 + $0x7c8] ss:$16 sps:$4 sm:$0xff]   ;;  %v8073_v24 = vld [vmem:[%s11732_s1 + $0x7e4] ss:$16 sps:$4 sm:$0xff]  }
  0xc2   :  { %5171 = vmatmul.mubr.bf16.vlgmr.msra.gmra.mrb[0].mxu0 %v9645_v26  ;;  %5704 = vmatmul.mubr.bf16.vlgmr.msra.gmra.mrb[0].mxu1 %v9645_v26 }
  0xc3   :  { %5180 = vmatpush1.bf16.msra.mxu0 %v7981_v13  ;;  %5713 = vmatpush1.bf16.msra.mxu1 %v7984_v27  ;;  %v8076_v13 = vld [vmem:[%s11732_s1 + $0x7ec] ss:$16 sps:$4 sm:$0xff]   ;;  %v8071_v27 = vld [vmem:[%s11732_s1 + $0x7e0] ss:$16 sps:$4 sm:$0xff]  }
  0xc4   :  { %5181 = vmatprep.subr.bf16.mxu0 %v7989_v28  ;;  %5714 = vmatprep.subr.bf16.mxu1 %v7992_v29  ;;  %v8074_v28 = vld [vmem:[%s11732_s1 + $0x7e8] ss:$16 sps:$4 sm:$0xff]   ;;  %v8079_v29 = vld [vmem:[%s11732_s1 + $0x804] ss:$16 sps:$4 sm:$0xff]  }
  0xc5   :  { %5211 = vmatprep.mubr.bf16.mxu0 %v918_v14  ;;  %5744 = vmatprep.mubr.bf16.mxu1 %v918_v14  ;;  %v8082_v14 = vld [vmem:[%s11732_s1 + $0x80c] ss:$16 sps:$4 sm:$0xff]  }
  0xc7   :  { %5182 = vmatpush1.bf16.msra.mxu0 %v7987_v30  ;;  %5715 = vmatpush1.bf16.msra.mxu1 %v7990_v31  ;;  %v934_v30 = vcombine.high %v9819_v21, %v9819_v21  ;;  %v916_v31 = vcombine.high %v9645_v26, %v9645_v26  ;;  %v8088_v26 = vld [vmem:[%s11732_s1 + $0x82c] ss:$16 sps:$4 sm:$0xff]  }
  0xc8   :  { %5183 = vmatprep.subr.bf16.mxu0 %v7995_v25  ;;  %5716 = vmatprep.subr.bf16.mxu1 %v7998_v32  ;;  %v8077_v25 = vld [vmem:[%s11732_s1 + $0x800] ss:$16 sps:$4 sm:$0xff]   ;;  %v8080_v32 = vld [vmem:[%s11732_s1 + $0x808] ss:$16 sps:$4 sm:$0xff]  }
  0xcb   :  { %5184 = vmatpush1.bf16.msra.mxu0 %v7993_v33  ;;  %5717 = vmatpush1.bf16.msra.mxu1 %v7996_v34  ;;  %v8085_v33 = vld [vmem:[%s11732_s1 + $0x824] ss:$16 sps:$4 sm:$0xff]   ;;  %v9862_v34 = vrot.slane %v934_v30, %v9161_v49 }
  0xcc   :  { %5185 = vmatprep.subr.bf16.mxu0 %v8001_v35  ;;  %5718 = vmatprep.subr.bf16.mxu1 %v8004_v36  ;;  %v8083_v35 = vld [vmem:[%s11732_s1 + $0x820] ss:$16 sps:$4 sm:$0xff]   ;;  %v8086_v36 = vld [vmem:[%s11732_s1 + $0x828] ss:$16 sps:$4 sm:$0xff]   ;;  %v8169_v30 = vld [vmem:[%s11732_s1 + $0x9e4] ss:$16 sps:$4 sm:$0xff]  }
  0xcf   :  { %5186 = vmatpush1.bf16.msra.mxu0 %v7999_v37  ;;  %5719 = vmatpush1.bf16.msra.mxu1 %v8002_v38  ;;  %v8091_v37 = vld [vmem:[%s11732_s1 + $0x844] ss:$16 sps:$4 sm:$0xff]   ;;  %v8094_v38 = vld [vmem:[%s11732_s1 + $0x84c] ss:$16 sps:$4 sm:$0xff]  }
  0xd0   :  { %5187 = vmatprep.subr.bf16.mxu0 %v8007_v39  ;;  %5720 = vmatprep.subr.bf16.mxu1 %v8010_v40  ;;  %v8089_v39 = vld [vmem:[%s11732_s1 + $0x840] ss:$16 sps:$4 sm:$0xff]   ;;  %v8092_v40 = vld [vmem:[%s11732_s1 + $0x848] ss:$16 sps:$4 sm:$0xff]  }
  0xd3   :  { %5188 = vmatpush1.bf16.msra.mxu0 %v8005_v41  ;;  %5721 = vmatpush1.bf16.msra.mxu1 %v8008_v43  ;;  %v8097_v41 = vld [vmem:[%s11732_s1 + $0x864] ss:$16 sps:$4 sm:$0xff]   ;;  %v8100_v43 = vld [vmem:[%s11732_s1 + $0x86c] ss:$16 sps:$4 sm:$0xff]  }
  0xd4   :  { %5189 = vmatprep.subr.bf16.mxu0 %v8013_v44  ;;  %5722 = vmatprep.subr.bf16.mxu1 %v8016_v45  ;;  %v8095_v44 = vld [vmem:[%s11732_s1 + $0x860] ss:$16 sps:$4 sm:$0xff]   ;;  %v8098_v45 = vld [vmem:[%s11732_s1 + $0x868] ss:$16 sps:$4 sm:$0xff]  }
  0xd7   :  { %5190 = vmatpush1.bf16.msra.mxu0 %v8011_v46  ;;  %5723 = vmatpush1.bf16.msra.mxu1 %v8014_v47  ;;  %v8103_v46 = vld [vmem:[%s11732_s1 + $0x884] ss:$16 sps:$4 sm:$0xff]   ;;  %v8106_v47 = vld [vmem:[%s11732_s1 + $0x88c] ss:$16 sps:$4 sm:$0xff]  }
  0xd8   :  { %5191 = vmatprep.subr.bf16.mxu0 %v8019_v48  ;;  %5724 = vmatprep.subr.bf16.mxu1 %v8022_v50  ;;  %v8101_v48 = vld [vmem:[%s11732_s1 + $0x880] ss:$16 sps:$4 sm:$0xff]   ;;  %v8104_v50 = vld [vmem:[%s11732_s1 + $0x888] ss:$16 sps:$4 sm:$0xff]  }
  0xdb   :  { %5192 = vmatpush1.bf16.msra.mxu0 %v8017_v51  ;;  %5725 = vmatpush1.bf16.msra.mxu1 %v8020_v53  ;;  %v8109_v51 = vld [vmem:[%s11732_s1 + $0x8a4] ss:$16 sps:$4 sm:$0xff]   ;;  %v8112_v53 = vld [vmem:[%s11732_s1 + $0x8ac] ss:$16 sps:$4 sm:$0xff]  }
  0xdc   :  { %5193 = vmatprep.subr.bf16.mxu0 %v8025_v54  ;;  %5726 = vmatprep.subr.bf16.mxu1 %v8028_v55  ;;  %v8107_v54 = vld [vmem:[%s11732_s1 + $0x8a0] ss:$16 sps:$4 sm:$0xff]   ;;  %v8110_v55 = vld [vmem:[%s11732_s1 + $0x8a8] ss:$16 sps:$4 sm:$0xff]  }
  0xdf   :  { %5194 = vmatpush1.bf16.msra.mxu0 %v8023_v56  ;;  %5727 = vmatpush1.bf16.msra.mxu1 %v8026_v57  ;;  %v8115_v56 = vld [vmem:[%s11732_s1 + $0x8c4] ss:$16 sps:$4 sm:$0xff]   ;;  %v8118_v57 = vld [vmem:[%s11732_s1 + $0x8cc] ss:$16 sps:$4 sm:$0xff]  }
  0xe0   :  { %5195 = vmatprep.subr.bf16.mxu0 %v8031_v58  ;;  %5728 = vmatprep.subr.bf16.mxu1 %v8034_v59  ;;  %v8113_v58 = vld [vmem:[%s11732_s1 + $0x8c0] ss:$16 sps:$4 sm:$0xff]   ;;  %v8116_v59 = vld [vmem:[%s11732_s1 + $0x8c8] ss:$16 sps:$4 sm:$0xff]  }
  0xe3   :  { %5196 = vmatpush1.bf16.msra.mxu0 %v8029_v60  ;;  %5729 = vmatpush1.bf16.msra.mxu1 %v8032_v61  ;;  %v8121_v60 = vld [vmem:[%s11732_s1 + $0x8e4] ss:$16 sps:$4 sm:$0xff]   ;;  %v8124_v61 = vld [vmem:[%s11732_s1 + $0x8ec] ss:$16 sps:$4 sm:$0xff]  }
  0xe4   :  { %5197 = vmatprep.subr.bf16.mxu0 %v8037_v62  ;;  %5730 = vmatprep.subr.bf16.mxu1 %v8040_v63  ;;  %v8119_v62 = vld [vmem:[%s11732_s1 + $0x8e0] ss:$16 sps:$4 sm:$0xff]   ;;  %v8122_v63 = vld [vmem:[%s11732_s1 + $0x8e8] ss:$16 sps:$4 sm:$0xff]  }
  0xe7   :  { %5198 = vmatpush1.bf16.msra.mxu0 %v8035_v0  ;;  %5731 = vmatpush1.bf16.msra.mxu1 %v8038_v1  ;;  %v8127_v0 = vld [vmem:[%s11732_s1 + $0x904] ss:$16 sps:$4 sm:$0xff]   ;;  %v8130_v1 = vld [vmem:[%s11732_s1 + $0x90c] ss:$16 sps:$4 sm:$0xff]  }
  0xe8   :  { %5199 = vmatprep.subr.bf16.mxu0 %v8043_v2  ;;  %5732 = vmatprep.subr.bf16.mxu1 %v8046_v3  ;;  %v8125_v2 = vld [vmem:[%s11732_s1 + $0x900] ss:$16 sps:$4 sm:$0xff]   ;;  %v8128_v3 = vld [vmem:[%s11732_s1 + $0x908] ss:$16 sps:$4 sm:$0xff]  }
  0xeb   :  { %5200 = vmatpush1.bf16.msra.mxu0 %v8041_v4  ;;  %5733 = vmatpush1.bf16.msra.mxu1 %v8044_v5  ;;  %v8133_v4 = vld [vmem:[%s11732_s1 + $0x924] ss:$16 sps:$4 sm:$0xff]   ;;  %v8136_v5 = vld [vmem:[%s11732_s1 + $0x92c] ss:$16 sps:$4 sm:$0xff]  }
  0xec   :  { %5201 = vmatprep.subr.bf16.mxu0 %v8049_v6  ;;  %5734 = vmatprep.subr.bf16.mxu1 %v8052_v7  ;;  %v8131_v6 = vld [vmem:[%s11732_s1 + $0x920] ss:$16 sps:$4 sm:$0xff]   ;;  %v8134_v7 = vld [vmem:[%s11732_s1 + $0x928] ss:$16 sps:$4 sm:$0xff]  }
  0xef   :  { %5202 = vmatpush1.bf16.msra.mxu0 %v8047_v8  ;;  %5735 = vmatpush1.bf16.msra.mxu1 %v8050_v9  ;;  %v8139_v8 = vld [vmem:[%s11732_s1 + $0x944] ss:$16 sps:$4 sm:$0xff]   ;;  %v8142_v9 = vld [vmem:[%s11732_s1 + $0x94c] ss:$16 sps:$4 sm:$0xff]  }
  0xf0   :  { %5203 = vmatprep.subr.bf16.mxu0 %v8055_v10  ;;  %5736 = vmatprep.subr.bf16.mxu1 %v8058_v11  ;;  %v8137_v10 = vld [vmem:[%s11732_s1 + $0x940] ss:$16 sps:$4 sm:$0xff]   ;;  %v8140_v11 = vld [vmem:[%s11732_s1 + $0x948] ss:$16 sps:$4 sm:$0xff]  }
  0xf3   :  { %5204 = vmatpush1.bf16.msra.mxu0 %v8053_v12  ;;  %5737 = vmatpush1.bf16.msra.mxu1 %v8056_v52  ;;  %v8145_v12 = vld [vmem:[%s11732_s1 + $0x964] ss:$16 sps:$4 sm:$0xff]   ;;  %v8148_v52 = vld [vmem:[%s11732_s1 + $0x96c] ss:$16 sps:$4 sm:$0xff]  }
  0xf4   :  { %5205 = vmatprep.subr.bf16.mxu0 %v8061_v15  ;;  %5738 = vmatprep.subr.bf16.mxu1 %v8064_v16  ;;  %v8143_v15 = vld [vmem:[%s11732_s1 + $0x960] ss:$16 sps:$4 sm:$0xff]   ;;  %v8146_v16 = vld [vmem:[%s11732_s1 + $0x968] ss:$16 sps:$4 sm:$0xff]  }
  0xf7   :  { %5206 = vmatpush1.bf16.msra.mxu0 %v8059_v17  ;;  %5739 = vmatpush1.bf16.msra.mxu1 %v8062_v18  ;;  %v8151_v17 = vld [vmem:[%s11732_s1 + $0x984] ss:$16 sps:$4 sm:$0xff]   ;;  %v8154_v18 = vld [vmem:[%s11732_s1 + $0x98c] ss:$16 sps:$4 sm:$0xff]  }
  0xf8   :  { %5207 = vmatprep.subr.bf16.mxu0 %v8067_v19  ;;  %5740 = vmatprep.subr.bf16.mxu1 %v8070_v20  ;;  %v8149_v19 = vld [vmem:[%s11732_s1 + $0x980] ss:$16 sps:$4 sm:$0xff]   ;;  %v8152_v20 = vld [vmem:[%s11732_s1 + $0x988] ss:$16 sps:$4 sm:$0xff]  }
  0xfb   :  { %5208 = vmatpush1.bf16.msra.mxu0 %v8065_v22  ;;  %5741 = vmatpush1.bf16.msra.mxu1 %v8068_v23  ;;  %v8157_v22 = vld [vmem:[%s11732_s1 + $0x9a4] ss:$16 sps:$4 sm:$0xff]   ;;  %v8160_v23 = vld [vmem:[%s11732_s1 + $0x9ac] ss:$16 sps:$4 sm:$0xff]  }
  0xfc   :  { %5209 = vmatprep.subr.bf16.mxu0 %v8073_v24  ;;  %5742 = vmatprep.subr.bf16.mxu1 %v8076_v13  ;;  %v8155_v24 = vld [vmem:[%s11732_s1 + $0x9a0] ss:$16 sps:$4 sm:$0xff]   ;;  %v8158_v13 = vld [vmem:[%s11732_s1 + $0x9a8] ss:$16 sps:$4 sm:$0xff]  }
  0xff   :  { %5210 = vmatpush1.bf16.msra.mxu0 %v8071_v27  ;;  %5743 = vmatpush1.bf16.msra.mxu1 %v8074_v28  ;;  %v8163_v27 = vld [vmem:[%s11732_s1 + $0x9c4] ss:$16 sps:$4 sm:$0xff]   ;;  %v8166_v28 = vld [vmem:[%s11732_s1 + $0x9cc] ss:$16 sps:$4 sm:$0xff]  }
 0x100   :  { %5220 = vmatprep.subr.bf16.mxu0 %v8079_v29  ;;  %5753 = vmatprep.subr.bf16.mxu1 %v8082_v14  ;;  %v8161_v29 = vld [vmem:[%s11732_s1 + $0x9c0] ss:$16 sps:$4 sm:$0xff]   ;;  %v8164_v14 = vld [vmem:[%s11732_s1 + $0x9c8] ss:$16 sps:$4 sm:$0xff]  }
 0x102   :  { %5212 = vmatmul.mubr.bf16.vlgmr.msra.gmra.mrb[0].mxu0 %v916_v31  ;;  %5745 = vmatmul.mubr.bf16.vlgmr.msra.gmra.mrb[0].mxu1 %v916_v31  ;;  %v8172_v31 = vld [vmem:[%s11732_s1 + $0x9ec] ss:$16 sps:$4 sm:$0xff]  }
 0x103   :  { %5221 = vmatpush1.bf16.msra.mxu0 %v8077_v25  ;;  %5754 = vmatpush1.bf16.msra.mxu1 %v8080_v32  ;;  %v8167_v25 = vld [vmem:[%s11732_s1 + $0x9e0] ss:$16 sps:$4 sm:$0xff]   ;;  %v8170_v32 = vld [vmem:[%s11732_s1 + $0x9e8] ss:$16 sps:$4 sm:$0xff]  }
 0x104   :  { %5222 = vmatprep.subr.bf16.mxu0 %v8085_v33  ;;  %5755 = vmatprep.subr.bf16.mxu1 %v8088_v26  ;;  %v8175_v33 = vld [vmem:[%s11732_s1 + $0xa04] ss:$16 sps:$4 sm:$0xff]   ;;  %v8178_v26 = vld [vmem:[%s11732_s1 + $0xa0c] ss:$16 sps:$4 sm:$0xff]  }
 0x105   :  { %5252 = vmatprep.mubr.bf16.mxu0 %v9862_v34  ;;  %5785 = vmatprep.mubr.bf16.mxu1 %v9862_v34 }
 0x107   :  { %5223 = vmatpush1.bf16.msra.mxu0 %v8083_v35  ;;  %5756 = vmatpush1.bf16.msra.mxu1 %v8086_v36  ;;  %v10048_v35 = vrot.slane %v9819_v21, %v9161_v49  ;;  %v8173_v36 = vld [vmem:[%s11732_s1 + $0xa00] ss:$16 sps:$4 sm:$0xff]   ;;  %v8184_v21 = vld [vmem:[%s11732_s1 + $0xa2c] ss:$16 sps:$4 sm:$0xff]  }
 0x108   :  { %5224 = vmatprep.subr.bf16.mxu0 %v8091_v37  ;;  %5757 = vmatprep.subr.bf16.mxu1 %v8094_v38  ;;  %v8176_v37 = vld [vmem:[%s11732_s1 + $0xa08] ss:$16 sps:$4 sm:$0xff]   ;;  %v8181_v38 = vld [vmem:[%s11732_s1 + $0xa24] ss:$16 sps:$4 sm:$0xff]  }
 0x10b   :  { %5225 = vmatpush1.bf16.msra.mxu0 %v8089_v39  ;;  %5758 = vmatpush1.bf16.msra.mxu1 %v8092_v40  ;;  %v966_v39 = vcombine.high %v9862_v34, %v9862_v34  ;;  %v8179_v40 = vld [vmem:[%s11732_s1 + $0xa20] ss:$16 sps:$4 sm:$0xff]   ;;  %v8187_v34 = vld [vmem:[%s11732_s1 + $0xa44] ss:$16 sps:$4 sm:$0xff]  }
 0x10c   :  { %5226 = vmatprep.subr.bf16.mxu0 %v8097_v41  ;;  %5759 = vmatprep.subr.bf16.mxu1 %v8100_v43  ;;  %v8182_v41 = vld [vmem:[%s11732_s1 + $0xa28] ss:$16 sps:$4 sm:$0xff]   ;;  %v8190_v43 = vld [vmem:[%s11732_s1 + $0xa4c] ss:$16 sps:$4 sm:$0xff]  }
 0x10f   :  { %5227 = vmatpush1.bf16.msra.mxu0 %v8095_v44  ;;  %5760 = vmatpush1.bf16.msra.mxu1 %v8098_v45  ;;  %v8185_v44 = vld [vmem:[%s11732_s1 + $0xa40] ss:$16 sps:$4 sm:$0xff]   ;;  %v8188_v45 = vld [vmem:[%s11732_s1 + $0xa48] ss:$16 sps:$4 sm:$0xff]  }
 0x110   :  { %5228 = vmatprep.subr.bf16.mxu0 %v8103_v46  ;;  %5761 = vmatprep.subr.bf16.mxu1 %v8106_v47  ;;  %v8193_v46 = vld [vmem:[%s11732_s1 + $0xa64] ss:$16 sps:$4 sm:$0xff]   ;;  %v8196_v47 = vld [vmem:[%s11732_s1 + $0xa6c] ss:$16 sps:$4 sm:$0xff]  }
 0x113   :  { %5229 = vmatpush1.bf16.msra.mxu0 %v8101_v48  ;;  %5762 = vmatpush1.bf16.msra.mxu1 %v8104_v50  ;;  %v8191_v48 = vld [vmem:[%s11732_s1 + $0xa60] ss:$16 sps:$4 sm:$0xff]   ;;  %v8194_v50 = vld [vmem:[%s11732_s1 + $0xa68] ss:$16 sps:$4 sm:$0xff]  }
 0x114   :  { %5230 = vmatprep.subr.bf16.mxu0 %v8109_v51  ;;  %5763 = vmatprep.subr.bf16.mxu1 %v8112_v53  ;;  %v8199_v51 = vld [vmem:[%s11732_s1 + $0xa84] ss:$16 sps:$4 sm:$0xff]   ;;  %v8202_v53 = vld [vmem:[%s11732_s1 + $0xa8c] ss:$16 sps:$4 sm:$0xff]  }
 0x117   :  { %5231 = vmatpush1.bf16.msra.mxu0 %v8107_v54  ;;  %5764 = vmatpush1.bf16.msra.mxu1 %v8110_v55  ;;  %v8197_v54 = vld [vmem:[%s11732_s1 + $0xa80] ss:$16 sps:$4 sm:$0xff]   ;;  %v8200_v55 = vld [vmem:[%s11732_s1 + $0xa88] ss:$16 sps:$4 sm:$0xff]  }
 0x118   :  { %5232 = vmatprep.subr.bf16.mxu0 %v8115_v56  ;;  %5765 = vmatprep.subr.bf16.mxu1 %v8118_v57  ;;  %v8205_v56 = vld [vmem:[%s11732_s1 + $0xaa4] ss:$16 sps:$4 sm:$0xff]   ;;  %v8208_v57 = vld [vmem:[%s11732_s1 + $0xaac] ss:$16 sps:$4 sm:$0xff]  }
 0x11b   :  { %5233 = vmatpush1.bf16.msra.mxu0 %v8113_v58  ;;  %5766 = vmatpush1.bf16.msra.mxu1 %v8116_v59  ;;  %v8203_v58 = vld [vmem:[%s11732_s1 + $0xaa0] ss:$16 sps:$4 sm:$0xff]   ;;  %v8206_v59 = vld [vmem:[%s11732_s1 + $0xaa8] ss:$16 sps:$4 sm:$0xff]  }
 0x11c   :  { %5234 = vmatprep.subr.bf16.mxu0 %v8121_v60  ;;  %5767 = vmatprep.subr.bf16.mxu1 %v8124_v61  ;;  %v8211_v60 = vld [vmem:[%s11732_s1 + $0xac4] ss:$16 sps:$4 sm:$0xff]   ;;  %v8214_v61 = vld [vmem:[%s11732_s1 + $0xacc] ss:$16 sps:$4 sm:$0xff]  }
 0x11f   :  { %5235 = vmatpush1.bf16.msra.mxu0 %v8119_v62  ;;  %5768 = vmatpush1.bf16.msra.mxu1 %v8122_v63  ;;  %v8209_v62 = vld [vmem:[%s11732_s1 + $0xac0] ss:$16 sps:$4 sm:$0xff]   ;;  %v8212_v63 = vld [vmem:[%s11732_s1 + $0xac8] ss:$16 sps:$4 sm:$0xff]  }
 0x120   :  { %5236 = vmatprep.subr.bf16.mxu0 %v8127_v0  ;;  %5769 = vmatprep.subr.bf16.mxu1 %v8130_v1  ;;  %v8217_v0 = vld [vmem:[%s11732_s1 + $0xae4] ss:$16 sps:$4 sm:$0xff]   ;;  %v8220_v1 = vld [vmem:[%s11732_s1 + $0xaec] ss:$16 sps:$4 sm:$0xff]  }
 0x123   :  { %5237 = vmatpush1.bf16.msra.mxu0 %v8125_v2  ;;  %5770 = vmatpush1.bf16.msra.mxu1 %v8128_v3  ;;  %v8215_v2 = vld [vmem:[%s11732_s1 + $0xae0] ss:$16 sps:$4 sm:$0xff]   ;;  %v8218_v3 = vld [vmem:[%s11732_s1 + $0xae8] ss:$16 sps:$4 sm:$0xff]  }
 0x124   :  { %5238 = vmatprep.subr.bf16.mxu0 %v8133_v4  ;;  %5771 = vmatprep.subr.bf16.mxu1 %v8136_v5  ;;  %v8223_v4 = vld [vmem:[%s11732_s1 + $0xb04] ss:$16 sps:$4 sm:$0xff]   ;;  %v8226_v5 = vld [vmem:[%s11732_s1 + $0xb0c] ss:$16 sps:$4 sm:$0xff]  }
 0x127   :  { %5239 = vmatpush1.bf16.msra.mxu0 %v8131_v6  ;;  %5772 = vmatpush1.bf16.msra.mxu1 %v8134_v7  ;;  %v8221_v6 = vld [vmem:[%s11732_s1 + $0xb00] ss:$16 sps:$4 sm:$0xff]   ;;  %v8224_v7 = vld [vmem:[%s11732_s1 + $0xb08] ss:$16 sps:$4 sm:$0xff]  }
 0x128   :  { %5240 = vmatprep.subr.bf16.mxu0 %v8139_v8  ;;  %5773 = vmatprep.subr.bf16.mxu1 %v8142_v9  ;;  %v8229_v8 = vld [vmem:[%s11732_s1 + $0xb24] ss:$16 sps:$4 sm:$0xff]   ;;  %v8232_v9 = vld [vmem:[%s11732_s1 + $0xb2c] ss:$16 sps:$4 sm:$0xff]  }
 0x12b   :  { %5241 = vmatpush1.bf16.msra.mxu0 %v8137_v10  ;;  %5774 = vmatpush1.bf16.msra.mxu1 %v8140_v11  ;;  %v8227_v10 = vld [vmem:[%s11732_s1 + $0xb20] ss:$16 sps:$4 sm:$0xff]   ;;  %v8230_v11 = vld [vmem:[%s11732_s1 + $0xb28] ss:$16 sps:$4 sm:$0xff]  }
 0x12c   :  { %5242 = vmatprep.subr.bf16.mxu0 %v8145_v12  ;;  %5775 = vmatprep.subr.bf16.mxu1 %v8148_v52  ;;  %v8235_v12 = vld [vmem:[%s11732_s1 + $0xb44] ss:$16 sps:$4 sm:$0xff]   ;;  %v8238_v52 = vld [vmem:[%s11732_s1 + $0xb4c] ss:$16 sps:$4 sm:$0xff]  }
 0x12f   :  { %5243 = vmatpush1.bf16.msra.mxu0 %v8143_v15  ;;  %5776 = vmatpush1.bf16.msra.mxu1 %v8146_v16  ;;  %v8233_v15 = vld [vmem:[%s11732_s1 + $0xb40] ss:$16 sps:$4 sm:$0xff]   ;;  %v8236_v16 = vld [vmem:[%s11732_s1 + $0xb48] ss:$16 sps:$4 sm:$0xff]  }
 0x130   :  { %5244 = vmatprep.subr.bf16.mxu0 %v8151_v17  ;;  %5777 = vmatprep.subr.bf16.mxu1 %v8154_v18  ;;  %v8241_v17 = vld [vmem:[%s11732_s1 + $0xb64] ss:$16 sps:$4 sm:$0xff]   ;;  %v8244_v18 = vld [vmem:[%s11732_s1 + $0xb6c] ss:$16 sps:$4 sm:$0xff]  }
 0x133   :  { %5245 = vmatpush1.bf16.msra.mxu0 %v8149_v19  ;;  %5778 = vmatpush1.bf16.msra.mxu1 %v8152_v20  ;;  %v8239_v19 = vld [vmem:[%s11732_s1 + $0xb60] ss:$16 sps:$4 sm:$0xff]   ;;  %v8242_v20 = vld [vmem:[%s11732_s1 + $0xb68] ss:$16 sps:$4 sm:$0xff]  }
 0x134   :  { %5246 = vmatprep.subr.bf16.mxu0 %v8157_v22  ;;  %5779 = vmatprep.subr.bf16.mxu1 %v8160_v23  ;;  %v8247_v22 = vld [vmem:[%s11732_s1 + $0xb84] ss:$16 sps:$4 sm:$0xff]   ;;  %v8250_v23 = vld [vmem:[%s11732_s1 + $0xb8c] ss:$16 sps:$4 sm:$0xff]  }
 0x137   :  { %5247 = vmatpush1.bf16.msra.mxu0 %v8155_v24  ;;  %5780 = vmatpush1.bf16.msra.mxu1 %v8158_v13  ;;  %v8245_v24 = vld [vmem:[%s11732_s1 + $0xb80] ss:$16 sps:$4 sm:$0xff]   ;;  %v8248_v13 = vld [vmem:[%s11732_s1 + $0xb88] ss:$16 sps:$4 sm:$0xff]  }
 0x138   :  { %5248 = vmatprep.subr.bf16.mxu0 %v8163_v27  ;;  %5781 = vmatprep.subr.bf16.mxu1 %v8166_v28  ;;  %v8253_v27 = vld [vmem:[%s11732_s1 + $0xba4] ss:$16 sps:$4 sm:$0xff]   ;;  %v8256_v28 = vld [vmem:[%s11732_s1 + $0xbac] ss:$16 sps:$4 sm:$0xff]  }
 0x13b   :  { %5249 = vmatpush1.bf16.msra.mxu0 %v8161_v29  ;;  %5782 = vmatpush1.bf16.msra.mxu1 %v8164_v14  ;;  %v8251_v29 = vld [vmem:[%s11732_s1 + $0xba0] ss:$16 sps:$4 sm:$0xff]   ;;  %v8254_v14 = vld [vmem:[%s11732_s1 + $0xba8] ss:$16 sps:$4 sm:$0xff]  }
 0x13c   :  { %5250 = vmatprep.subr.bf16.mxu0 %v8169_v30  ;;  %5783 = vmatprep.subr.bf16.mxu1 %v8172_v31  ;;  %v8259_v30 = vld [vmem:[%s11732_s1 + $0xbc4] ss:$16 sps:$4 sm:$0xff]   ;;  %v8262_v31 = vld [vmem:[%s11732_s1 + $0xbcc] ss:$16 sps:$4 sm:$0xff]  }
 0x13f   :  { %5251 = vmatpush1.bf16.msra.mxu0 %v8167_v25  ;;  %5784 = vmatpush1.bf16.msra.mxu1 %v8170_v32  ;;  %v8935_v25 = vld [vmem:[%s11731_s0 + $0x8] sm:$0xff] }
 0x140   :  { %5261 = vmatprep.subr.bf16.mxu0 %v8175_v33  ;;  %5794 = vmatprep.subr.bf16.mxu1 %v8178_v26  ;;  %v919_v32 = vcombine.high %v8935_v25, %v8935_v25  ;;  %v8257_v33 = vld [vmem:[%s11732_s1 + $0xbc0] ss:$16 sps:$4 sm:$0xff]   ;;  %v8260_v26 = vld [vmem:[%s11732_s1 + $0xbc8] ss:$16 sps:$4 sm:$0xff]  }
 0x141   :  { %v8341_v25 = vld [vmem:[%s11732_s1 + $0xd80] ss:$16 sps:$4 sm:$0xff]  }
 0x142   :  { %5253 = vmatmul.mubr.bf16.vlgmr.msra.gmra.mrb[0].mxu0 %v10048_v35  ;;  %5786 = vmatmul.mubr.bf16.vlgmr.msra.gmra.mrb[0].mxu1 %v10048_v35 }
 0x143   :  { %5262 = vmatpush1.bf16.msra.mxu0 %v8173_v36  ;;  %5795 = vmatpush1.bf16.msra.mxu1 %v8176_v37  ;;  %v8265_v36 = vld [vmem:[%s11732_s1 + $0xbe4] ss:$16 sps:$4 sm:$0xff]   ;;  %v8268_v37 = vld [vmem:[%s11732_s1 + $0xbec] ss:$16 sps:$4 sm:$0xff]  }
 0x144   :  { %5263 = vmatprep.subr.bf16.mxu0 %v8181_v38  ;;  %5796 = vmatprep.subr.bf16.mxu1 %v8184_v21  ;;  %v10238_v38 = vrot.slane %v919_v32, %v9161_v49  ;;  %v8263_v21 = vld [vmem:[%s11732_s1 + $0xbe0] ss:$16 sps:$4 sm:$0xff]   ;;  %v8344_v32 = vld [vmem:[%s11732_s1 + $0xd88] ss:$16 sps:$4 sm:$0xff]  }
 0x145   :  { %5293 = vmatprep.mubr.bf16.mxu0 %v966_v39  ;;  %5826 = vmatprep.mubr.bf16.mxu1 %v966_v39  ;;  %v8266_v39 = vld [vmem:[%s11732_s1 + $0xbe8] ss:$16 sps:$4 sm:$0xff]  }
 0x147   :  { %5264 = vmatpush1.bf16.msra.mxu0 %v8179_v40  ;;  %5797 = vmatpush1.bf16.msra.mxu1 %v8182_v41  ;;  %v8271_v40 = vld [vmem:[%s11732_s1 + $0xc04] ss:$16 sps:$4 sm:$0xff]   ;;  %v8274_v41 = vld [vmem:[%s11732_s1 + $0xc0c] ss:$16 sps:$4 sm:$0xff]  }
 0x148   :  { %5265 = vmatprep.subr.bf16.mxu0 %v8187_v34  ;;  %5798 = vmatprep.subr.bf16.mxu1 %v8190_v43  ;;  %v935_v34 = vcombine.high %v10238_v38, %v10238_v38  ;;  %v964_v43 = vcombine.high %v10048_v35, %v10048_v35  ;;  %v8280_v35 = vld [vmem:[%s11732_s1 + $0xc2c] ss:$16 sps:$4 sm:$0xff]  }
 0x14b   :  { %5266 = vmatpush1.bf16.msra.mxu0 %v8185_v44  ;;  %5799 = vmatpush1.bf16.msra.mxu1 %v8188_v45  ;;  %v8269_v44 = vld [vmem:[%s11732_s1 + $0xc00] ss:$16 sps:$4 sm:$0xff]   ;;  %v8272_v45 = vld [vmem:[%s11732_s1 + $0xc08] ss:$16 sps:$4 sm:$0xff]  }
 0x14c   :  { %5267 = vmatprep.subr.bf16.mxu0 %v8193_v46  ;;  %5800 = vmatprep.subr.bf16.mxu1 %v8196_v47  ;;  %v8277_v46 = vld [vmem:[%s11732_s1 + $0xc24] ss:$16 sps:$4 sm:$0xff]   ;;  %v10269_v47 = vrot.slane %v935_v34, %v9161_v49 }
 0x14d   :  { %v8361_v34 = vld [vmem:[%s11732_s1 + $0xde4] ss:$16 sps:$4 sm:$0xff]  }
 0x14f   :  { %5268 = vmatpush1.bf16.msra.mxu0 %v8191_v48  ;;  %5801 = vmatpush1.bf16.msra.mxu1 %v8194_v50  ;;  %v8275_v48 = vld [vmem:[%s11732_s1 + $0xc20] ss:$16 sps:$4 sm:$0xff]   ;;  %v8278_v50 = vld [vmem:[%s11732_s1 + $0xc28] ss:$16 sps:$4 sm:$0xff]  }
 0x150   :  { %5269 = vmatprep.subr.bf16.mxu0 %v8199_v51  ;;  %5802 = vmatprep.subr.bf16.mxu1 %v8202_v53  ;;  %v8283_v51 = vld [vmem:[%s11732_s1 + $0xc44] ss:$16 sps:$4 sm:$0xff]   ;;  %v8286_v53 = vld [vmem:[%s11732_s1 + $0xc4c] ss:$16 sps:$4 sm:$0xff]  }
 0x153   :  { %5270 = vmatpush1.bf16.msra.mxu0 %v8197_v54  ;;  %5803 = vmatpush1.bf16.msra.mxu1 %v8200_v55  ;;  %v8281_v54 = vld [vmem:[%s11732_s1 + $0xc40] ss:$16 sps:$4 sm:$0xff]   ;;  %v8284_v55 = vld [vmem:[%s11732_s1 + $0xc48] ss:$16 sps:$4 sm:$0xff]  }
 0x154   :  { %5271 = vmatprep.subr.bf16.mxu0 %v8205_v56  ;;  %5804 = vmatprep.subr.bf16.mxu1 %v8208_v57  ;;  %v8289_v56 = vld [vmem:[%s11732_s1 + $0xc64] ss:$16 sps:$4 sm:$0xff]   ;;  %v8292_v57 = vld [vmem:[%s11732_s1 + $0xc6c] ss:$16 sps:$4 sm:$0xff]  }
 0x157   :  { %5272 = vmatpush1.bf16.msra.mxu0 %v8203_v58  ;;  %5805 = vmatpush1.bf16.msra.mxu1 %v8206_v59  ;;  %v8287_v58 = vld [vmem:[%s11732_s1 + $0xc60] ss:$16 sps:$4 sm:$0xff]   ;;  %v8290_v59 = vld [vmem:[%s11732_s1 + $0xc68] ss:$16 sps:$4 sm:$0xff]  }
 0x158   :  { %5273 = vmatprep.subr.bf16.mxu0 %v8211_v60  ;;  %5806 = vmatprep.subr.bf16.mxu1 %v8214_v61  ;;  %v8295_v60 = vld [vmem:[%s11732_s1 + $0xc84] ss:$16 sps:$4 sm:$0xff]   ;;  %v8298_v61 = vld [vmem:[%s11732_s1 + $0xc8c] ss:$16 sps:$4 sm:$0xff]  }
 0x15b   :  { %5274 = vmatpush1.bf16.msra.mxu0 %v8209_v62  ;;  %5807 = vmatpush1.bf16.msra.mxu1 %v8212_v63  ;;  %v8293_v62 = vld [vmem:[%s11732_s1 + $0xc80] ss:$16 sps:$4 sm:$0xff]   ;;  %v8296_v63 = vld [vmem:[%s11732_s1 + $0xc88] ss:$16 sps:$4 sm:$0xff]  }
 0x15c   :  { %5275 = vmatprep.subr.bf16.mxu0 %v8217_v0  ;;  %5808 = vmatprep.subr.bf16.mxu1 %v8220_v1  ;;  %v8301_v0 = vld [vmem:[%s11732_s1 + $0xca4] ss:$16 sps:$4 sm:$0xff]   ;;  %v8304_v1 = vld [vmem:[%s11732_s1 + $0xcac] ss:$16 sps:$4 sm:$0xff]  }
 0x15f   :  { %5276 = vmatpush1.bf16.msra.mxu0 %v8215_v2  ;;  %5809 = vmatpush1.bf16.msra.mxu1 %v8218_v3  ;;  %v8299_v2 = vld [vmem:[%s11732_s1 + $0xca0] ss:$16 sps:$4 sm:$0xff]   ;;  %v8302_v3 = vld [vmem:[%s11732_s1 + $0xca8] ss:$16 sps:$4 sm:$0xff]  }
 0x160   :  { %5277 = vmatprep.subr.bf16.mxu0 %v8223_v4  ;;  %5810 = vmatprep.subr.bf16.mxu1 %v8226_v5  ;;  %v8307_v4 = vld [vmem:[%s11732_s1 + $0xcc4] ss:$16 sps:$4 sm:$0xff]   ;;  %v8310_v5 = vld [vmem:[%s11732_s1 + $0xccc] ss:$16 sps:$4 sm:$0xff]  }
 0x163   :  { %5278 = vmatpush1.bf16.msra.mxu0 %v8221_v6  ;;  %5811 = vmatpush1.bf16.msra.mxu1 %v8224_v7  ;;  %v8305_v6 = vld [vmem:[%s11732_s1 + $0xcc0] ss:$16 sps:$4 sm:$0xff]   ;;  %v8308_v7 = vld [vmem:[%s11732_s1 + $0xcc8] ss:$16 sps:$4 sm:$0xff]  }
 0x164   :  { %5279 = vmatprep.subr.bf16.mxu0 %v8229_v8  ;;  %5812 = vmatprep.subr.bf16.mxu1 %v8232_v9  ;;  %v8313_v8 = vld [vmem:[%s11732_s1 + $0xce4] ss:$16 sps:$4 sm:$0xff]   ;;  %v8316_v9 = vld [vmem:[%s11732_s1 + $0xcec] ss:$16 sps:$4 sm:$0xff]  }
 0x167   :  { %5280 = vmatpush1.bf16.msra.mxu0 %v8227_v10  ;;  %5813 = vmatpush1.bf16.msra.mxu1 %v8230_v11  ;;  %v8311_v10 = vld [vmem:[%s11732_s1 + $0xce0] ss:$16 sps:$4 sm:$0xff]   ;;  %v8314_v11 = vld [vmem:[%s11732_s1 + $0xce8] ss:$16 sps:$4 sm:$0xff]  }
 0x168   :  { %5281 = vmatprep.subr.bf16.mxu0 %v8235_v12  ;;  %5814 = vmatprep.subr.bf16.mxu1 %v8238_v52  ;;  %v8319_v12 = vld [vmem:[%s11732_s1 + $0xd04] ss:$16 sps:$4 sm:$0xff]   ;;  %v8322_v52 = vld [vmem:[%s11732_s1 + $0xd0c] ss:$16 sps:$4 sm:$0xff]  }
 0x16b   :  { %5282 = vmatpush1.bf16.msra.mxu0 %v8233_v15  ;;  %5815 = vmatpush1.bf16.msra.mxu1 %v8236_v16  ;;  %v8317_v15 = vld [vmem:[%s11732_s1 + $0xd00] ss:$16 sps:$4 sm:$0xff]   ;;  %v8320_v16 = vld [vmem:[%s11732_s1 + $0xd08] ss:$16 sps:$4 sm:$0xff]  }
 0x16c   :  { %5283 = vmatprep.subr.bf16.mxu0 %v8241_v17  ;;  %5816 = vmatprep.subr.bf16.mxu1 %v8244_v18  ;;  %v8325_v17 = vld [vmem:[%s11732_s1 + $0xd24] ss:$16 sps:$4 sm:$0xff]   ;;  %v8328_v18 = vld [vmem:[%s11732_s1 + $0xd2c] ss:$16 sps:$4 sm:$0xff]  }
 0x16f   :  { %5284 = vmatpush1.bf16.msra.mxu0 %v8239_v19  ;;  %5817 = vmatpush1.bf16.msra.mxu1 %v8242_v20  ;;  %v8323_v19 = vld [vmem:[%s11732_s1 + $0xd20] ss:$16 sps:$4 sm:$0xff]   ;;  %v8326_v20 = vld [vmem:[%s11732_s1 + $0xd28] ss:$16 sps:$4 sm:$0xff]  }
 0x170   :  { %5285 = vmatprep.subr.bf16.mxu0 %v8247_v22  ;;  %5818 = vmatprep.subr.bf16.mxu1 %v8250_v23  ;;  %v8331_v22 = vld [vmem:[%s11732_s1 + $0xd44] ss:$16 sps:$4 sm:$0xff]   ;;  %v8334_v23 = vld [vmem:[%s11732_s1 + $0xd4c] ss:$16 sps:$4 sm:$0xff]  }
 0x173   :  { %5286 = vmatpush1.bf16.msra.mxu0 %v8245_v24  ;;  %5819 = vmatpush1.bf16.msra.mxu1 %v8248_v13  ;;  %v8329_v24 = vld [vmem:[%s11732_s1 + $0xd40] ss:$16 sps:$4 sm:$0xff]   ;;  %v8332_v13 = vld [vmem:[%s11732_s1 + $0xd48] ss:$16 sps:$4 sm:$0xff]  }
 0x174   :  { %5287 = vmatprep.subr.bf16.mxu0 %v8253_v27  ;;  %5820 = vmatprep.subr.bf16.mxu1 %v8256_v28  ;;  %v8337_v27 = vld [vmem:[%s11732_s1 + $0xd64] ss:$16 sps:$4 sm:$0xff]   ;;  %v8340_v28 = vld [vmem:[%s11732_s1 + $0xd6c] ss:$16 sps:$4 sm:$0xff]  }
 0x177   :  { %5288 = vmatpush1.bf16.msra.mxu0 %v8251_v29  ;;  %5821 = vmatpush1.bf16.msra.mxu1 %v8254_v14  ;;  %v8335_v29 = vld [vmem:[%s11732_s1 + $0xd60] ss:$16 sps:$4 sm:$0xff]   ;;  %v8338_v14 = vld [vmem:[%s11732_s1 + $0xd68] ss:$16 sps:$4 sm:$0xff]  }
 0x178   :  { %5289 = vmatprep.subr.bf16.mxu0 %v8259_v30  ;;  %5822 = vmatprep.subr.bf16.mxu1 %v8262_v31  ;;  %v8343_v30 = vld [vmem:[%s11732_s1 + $0xd84] ss:$16 sps:$4 sm:$0xff]   ;;  %v8346_v31 = vld [vmem:[%s11732_s1 + $0xd8c] ss:$16 sps:$4 sm:$0xff]  }
 0x17b   :  { %5290 = vmatpush1.bf16.msra.mxu0 %v8257_v33  ;;  %5823 = vmatpush1.bf16.msra.mxu1 %v8260_v26  ;;  %v8349_v33 = vld [vmem:[%s11732_s1 + $0xda4] ss:$16 sps:$4 sm:$0xff]   ;;  %v8352_v26 = vld [vmem:[%s11732_s1 + $0xdac] ss:$16 sps:$4 sm:$0xff]  }
 0x17c   :  { %5291 = vmatprep.subr.bf16.mxu0 %v8265_v36  ;;  %5824 = vmatprep.subr.bf16.mxu1 %v8268_v37  ;;  %v8347_v36 = vld [vmem:[%s11732_s1 + $0xda0] ss:$16 sps:$4 sm:$0xff]   ;;  %v8350_v37 = vld [vmem:[%s11732_s1 + $0xda8] ss:$16 sps:$4 sm:$0xff]  }
 0x17f   :  { %5292 = vmatpush1.bf16.msra.mxu0 %v8263_v21  ;;  %5825 = vmatpush1.bf16.msra.mxu1 %v8266_v39  ;;  %v8355_v21 = vld [vmem:[%s11732_s1 + $0xdc4] ss:$16 sps:$4 sm:$0xff]   ;;  %v8358_v39 = vld [vmem:[%s11732_s1 + $0xdcc] ss:$16 sps:$4 sm:$0xff]  }
 0x180   :  { %5302 = vmatprep.subr.bf16.mxu0 %v8271_v40  ;;  %5835 = vmatprep.subr.bf16.mxu1 %v8274_v41  ;;  %v8353_v40 = vld [vmem:[%s11732_s1 + $0xdc0] ss:$16 sps:$4 sm:$0xff]   ;;  %v8356_v41 = vld [vmem:[%s11732_s1 + $0xdc8] ss:$16 sps:$4 sm:$0xff]  }
 0x182   :  { %5294 = vmatmul.mubr.bf16.vlgmr.msra.gmra.mrb[0].mxu0 %v964_v43  ;;  %5827 = vmatmul.mubr.bf16.vlgmr.msra.gmra.mrb[0].mxu1 %v964_v43  ;;  %v8364_v43 = vld [vmem:[%s11732_s1 + $0xdec] ss:$16 sps:$4 sm:$0xff]  }
 0x183   :  { %5303 = vmatpush1.bf16.msra.mxu0 %v8269_v44  ;;  %5836 = vmatpush1.bf16.msra.mxu1 %v8272_v45  ;;  %v8359_v44 = vld [vmem:[%s11732_s1 + $0xde0] ss:$16 sps:$4 sm:$0xff]   ;;  %v8362_v45 = vld [vmem:[%s11732_s1 + $0xde8] ss:$16 sps:$4 sm:$0xff]  }
 0x184   :  { %5304 = vmatprep.subr.bf16.mxu0 %v8277_v46  ;;  %5837 = vmatprep.subr.bf16.mxu1 %v8280_v35  ;;  %v8368_v46 = vld [vmem:[%s11732_s1 + $0xe04] ss:$16 sps:$4 sm:$0xff]   ;;  %v8371_v35 = vld [vmem:[%s11732_s1 + $0xe0c] ss:$16 sps:$4 sm:$0xff]  }
 0x185   :  { %5334 = vmatprep.mubr.bf16.mxu0 %v10269_v47  ;;  %5867 = vmatprep.mubr.bf16.mxu1 %v10269_v47 }
 0x187   :  { %5305 = vmatpush1.bf16.msra.mxu0 %v8275_v48  ;;  %5838 = vmatpush1.bf16.msra.mxu1 %v8278_v50  ;;  %v10455_v48 = vrot.slane %v10238_v38, %v9161_v49  ;;  %v8366_v50 = vld [vmem:[%s11732_s1 + $0xe00] ss:$16 sps:$4 sm:$0xff]   ;;  %v8377_v38 = vld [vmem:[%s11732_s1 + $0xe2c] ss:$16 sps:$4 sm:$0xff]  }
 0x188   :  { %5306 = vmatprep.subr.bf16.mxu0 %v8283_v51  ;;  %5839 = vmatprep.subr.bf16.mxu1 %v8286_v53  ;;  %v8369_v51 = vld [vmem:[%s11732_s1 + $0xe08] ss:$16 sps:$4 sm:$0xff]   ;;  %v8374_v53 = vld [vmem:[%s11732_s1 + $0xe24] ss:$16 sps:$4 sm:$0xff]  }
 0x18b   :  { %5307 = vmatpush1.bf16.msra.mxu0 %v8281_v54  ;;  %5840 = vmatpush1.bf16.msra.mxu1 %v8284_v55  ;;  %v967_v54 = vcombine.high %v10269_v47, %v10269_v47  ;;  %v8372_v55 = vld [vmem:[%s11732_s1 + $0xe20] ss:$16 sps:$4 sm:$0xff]   ;;  %v8380_v47 = vld [vmem:[%s11732_s1 + $0xe44] ss:$16 sps:$4 sm:$0xff]  }
 0x18c   :  { %5308 = vmatprep.subr.bf16.mxu0 %v8289_v56  ;;  %5841 = vmatprep.subr.bf16.mxu1 %v8292_v57  ;;  %v8375_v56 = vld [vmem:[%s11732_s1 + $0xe28] ss:$16 sps:$4 sm:$0xff]   ;;  %v8383_v57 = vld [vmem:[%s11732_s1 + $0xe4c] ss:$16 sps:$4 sm:$0xff]  }
 0x18f   :  { %5309 = vmatpush1.bf16.msra.mxu0 %v8287_v58  ;;  %5842 = vmatpush1.bf16.msra.mxu1 %v8290_v59  ;;  %v8378_v58 = vld [vmem:[%s11732_s1 + $0xe40] ss:$16 sps:$4 sm:$0xff]   ;;  %v8381_v59 = vld [vmem:[%s11732_s1 + $0xe48] ss:$16 sps:$4 sm:$0xff]  }
 0x190   :  { %5310 = vmatprep.subr.bf16.mxu0 %v8295_v60  ;;  %5843 = vmatprep.subr.bf16.mxu1 %v8298_v61  ;;  %v8386_v60 = vld [vmem:[%s11732_s1 + $0xe64] ss:$16 sps:$4 sm:$0xff]   ;;  %v8389_v61 = vld [vmem:[%s11732_s1 + $0xe6c] ss:$16 sps:$4 sm:$0xff]  }
 0x193   :  { %5311 = vmatpush1.bf16.msra.mxu0 %v8293_v62  ;;  %5844 = vmatpush1.bf16.msra.mxu1 %v8296_v63  ;;  %v8384_v62 = vld [vmem:[%s11732_s1 + $0xe60] ss:$16 sps:$4 sm:$0xff]   ;;  %v8387_v63 = vld [vmem:[%s11732_s1 + $0xe68] ss:$16 sps:$4 sm:$0xff]  }
 0x194   :  { %5312 = vmatprep.subr.bf16.mxu0 %v8301_v0  ;;  %5845 = vmatprep.subr.bf16.mxu1 %v8304_v1  ;;  %v8392_v0 = vld [vmem:[%s11732_s1 + $0xe84] ss:$16 sps:$4 sm:$0xff]   ;;  %v8395_v1 = vld [vmem:[%s11732_s1 + $0xe8c] ss:$16 sps:$4 sm:$0xff]  }
 0x197   :  { %5313 = vmatpush1.bf16.msra.mxu0 %v8299_v2  ;;  %5846 = vmatpush1.bf16.msra.mxu1 %v8302_v3  ;;  %v8390_v2 = vld [vmem:[%s11732_s1 + $0xe80] ss:$16 sps:$4 sm:$0xff]   ;;  %v8393_v3 = vld [vmem:[%s11732_s1 + $0xe88] ss:$16 sps:$4 sm:$0xff]  }
 0x198   :  { %5314 = vmatprep.subr.bf16.mxu0 %v8307_v4  ;;  %5847 = vmatprep.subr.bf16.mxu1 %v8310_v5  ;;  %v8398_v4 = vld [vmem:[%s11732_s1 + $0xea4] ss:$16 sps:$4 sm:$0xff]   ;;  %v8401_v5 = vld [vmem:[%s11732_s1 + $0xeac] ss:$16 sps:$4 sm:$0xff]  }
 0x19b   :  { %5315 = vmatpush1.bf16.msra.mxu0 %v8305_v6  ;;  %5848 = vmatpush1.bf16.msra.mxu1 %v8308_v7  ;;  %v8396_v6 = vld [vmem:[%s11732_s1 + $0xea0] ss:$16 sps:$4 sm:$0xff]   ;;  %v8399_v7 = vld [vmem:[%s11732_s1 + $0xea8] ss:$16 sps:$4 sm:$0xff]  }
 0x19c   :  { %5316 = vmatprep.subr.bf16.mxu0 %v8313_v8  ;;  %5849 = vmatprep.subr.bf16.mxu1 %v8316_v9  ;;  %v8404_v8 = vld [vmem:[%s11732_s1 + $0xec4] ss:$16 sps:$4 sm:$0xff]   ;;  %v8407_v9 = vld [vmem:[%s11732_s1 + $0xecc] ss:$16 sps:$4 sm:$0xff]  }
 0x19f   :  { %5317 = vmatpush1.bf16.msra.mxu0 %v8311_v10  ;;  %5850 = vmatpush1.bf16.msra.mxu1 %v8314_v11  ;;  %v8402_v10 = vld [vmem:[%s11732_s1 + $0xec0] ss:$16 sps:$4 sm:$0xff]   ;;  %v8405_v11 = vld [vmem:[%s11732_s1 + $0xec8] ss:$16 sps:$4 sm:$0xff]  }
 0x1a0   :  { %5318 = vmatprep.subr.bf16.mxu0 %v8319_v12  ;;  %5851 = vmatprep.subr.bf16.mxu1 %v8322_v52  ;;  %v8410_v12 = vld [vmem:[%s11732_s1 + $0xee4] ss:$16 sps:$4 sm:$0xff]   ;;  %v8413_v52 = vld [vmem:[%s11732_s1 + $0xeec] ss:$16 sps:$4 sm:$0xff]  }
 0x1a3   :  { %5319 = vmatpush1.bf16.msra.mxu0 %v8317_v15  ;;  %5852 = vmatpush1.bf16.msra.mxu1 %v8320_v16  ;;  %v8408_v15 = vld [vmem:[%s11732_s1 + $0xee0] ss:$16 sps:$4 sm:$0xff]   ;;  %v8411_v16 = vld [vmem:[%s11732_s1 + $0xee8] ss:$16 sps:$4 sm:$0xff]  }
 0x1a4   :  { %5320 = vmatprep.subr.bf16.mxu0 %v8325_v17  ;;  %5853 = vmatprep.subr.bf16.mxu1 %v8328_v18  ;;  %v8416_v17 = vld [vmem:[%s11732_s1 + $0xf04] ss:$16 sps:$4 sm:$0xff]   ;;  %v8419_v18 = vld [vmem:[%s11732_s1 + $0xf0c] ss:$16 sps:$4 sm:$0xff]  }
 0x1a7   :  { %5321 = vmatpush1.bf16.msra.mxu0 %v8323_v19  ;;  %5854 = vmatpush1.bf16.msra.mxu1 %v8326_v20  ;;  %v8414_v19 = vld [vmem:[%s11732_s1 + $0xf00] ss:$16 sps:$4 sm:$0xff]   ;;  %v8417_v20 = vld [vmem:[%s11732_s1 + $0xf08] ss:$16 sps:$4 sm:$0xff]  }
 0x1a8   :  { %5322 = vmatprep.subr.bf16.mxu0 %v8331_v22  ;;  %5855 = vmatprep.subr.bf16.mxu1 %v8334_v23  ;;  %v8422_v22 = vld [vmem:[%s11732_s1 + $0xf24] ss:$16 sps:$4 sm:$0xff]   ;;  %v8425_v23 = vld [vmem:[%s11732_s1 + $0xf2c] ss:$16 sps:$4 sm:$0xff]  }
 0x1ab   :  { %5323 = vmatpush1.bf16.msra.mxu0 %v8329_v24  ;;  %5856 = vmatpush1.bf16.msra.mxu1 %v8332_v13  ;;  %v8420_v24 = vld [vmem:[%s11732_s1 + $0xf20] ss:$16 sps:$4 sm:$0xff]   ;;  %v8423_v13 = vld [vmem:[%s11732_s1 + $0xf28] ss:$16 sps:$4 sm:$0xff]  }
 0x1ac   :  { %5324 = vmatprep.subr.bf16.mxu0 %v8337_v27  ;;  %5857 = vmatprep.subr.bf16.mxu1 %v8340_v28  ;;  %v8428_v27 = vld [vmem:[%s11732_s1 + $0xf44] ss:$16 sps:$4 sm:$0xff]   ;;  %v8431_v28 = vld [vmem:[%s11732_s1 + $0xf4c] ss:$16 sps:$4 sm:$0xff]  }
 0x1af   :  { %5325 = vmatpush1.bf16.msra.mxu0 %v8335_v29  ;;  %5858 = vmatpush1.bf16.msra.mxu1 %v8338_v14  ;;  %v8426_v29 = vld [vmem:[%s11732_s1 + $0xf40] ss:$16 sps:$4 sm:$0xff]   ;;  %v8429_v14 = vld [vmem:[%s11732_s1 + $0xf48] ss:$16 sps:$4 sm:$0xff]  }
 0x1b0   :  { %5326 = vmatprep.subr.bf16.mxu0 %v8343_v30  ;;  %5859 = vmatprep.subr.bf16.mxu1 %v8346_v31  ;;  %v8434_v30 = vld [vmem:[%s11732_s1 + $0xf64] ss:$16 sps:$4 sm:$0xff]   ;;  %v8437_v31 = vld [vmem:[%s11732_s1 + $0xf6c] ss:$16 sps:$4 sm:$0xff]  }
 0x1b3   :  { %5327 = vmatpush1.bf16.msra.mxu0 %v8341_v25  ;;  %5860 = vmatpush1.bf16.msra.mxu1 %v8344_v32  ;;  %v8432_v25 = vld [vmem:[%s11732_s1 + $0xf60] ss:$16 sps:$4 sm:$0xff]   ;;  %v8435_v32 = vld [vmem:[%s11732_s1 + $0xf68] ss:$16 sps:$4 sm:$0xff]  }
 0x1b4   :  { %5328 = vmatprep.subr.bf16.mxu0 %v8349_v33  ;;  %5861 = vmatprep.subr.bf16.mxu1 %v8352_v26  ;;  %v8440_v33 = vld [vmem:[%s11732_s1 + $0xf84] ss:$16 sps:$4 sm:$0xff]   ;;  %v8443_v26 = vld [vmem:[%s11732_s1 + $0xf8c] ss:$16 sps:$4 sm:$0xff]  }
 0x1b7   :  { %5329 = vmatpush1.bf16.msra.mxu0 %v8347_v36  ;;  %5862 = vmatpush1.bf16.msra.mxu1 %v8350_v37  ;;  %v8438_v36 = vld [vmem:[%s11732_s1 + $0xf80] ss:$16 sps:$4 sm:$0xff]   ;;  %v8441_v37 = vld [vmem:[%s11732_s1 + $0xf88] ss:$16 sps:$4 sm:$0xff]  }
 0x1b8   :  { %5330 = vmatprep.subr.bf16.mxu0 %v8355_v21  ;;  %5863 = vmatprep.subr.bf16.mxu1 %v8358_v39  ;;  %v8446_v21 = vld [vmem:[%s11732_s1 + $0xfa4] ss:$16 sps:$4 sm:$0xff]   ;;  %v8449_v39 = vld [vmem:[%s11732_s1 + $0xfac] ss:$16 sps:$4 sm:$0xff]  }
 0x1bb   :  { %5331 = vmatpush1.bf16.msra.mxu0 %v8353_v40  ;;  %5864 = vmatpush1.bf16.msra.mxu1 %v8356_v41  ;;  %v8444_v40 = vld [vmem:[%s11732_s1 + $0xfa0] ss:$16 sps:$4 sm:$0xff]   ;;  %v8447_v41 = vld [vmem:[%s11732_s1 + $0xfa8] ss:$16 sps:$4 sm:$0xff]  }
 0x1bc   :  { %5332 = vmatprep.subr.bf16.mxu0 %v8361_v34  ;;  %5865 = vmatprep.subr.bf16.mxu1 %v8364_v43  ;;  %v8452_v34 = vld [vmem:[%s11732_s1 + $0xfc4] ss:$16 sps:$4 sm:$0xff]   ;;  %v8455_v43 = vld [vmem:[%s11732_s1 + $0xfcc] ss:$16 sps:$4 sm:$0xff]  }
 0x1bf   :  { %5333 = vmatpush1.bf16.msra.mxu0 %v8359_v44  ;;  %5866 = vmatpush1.bf16.msra.mxu1 %v8362_v45  ;;  %v10632_v44 = vld [vmem:[%s11731_s0 + $0x10] sm:$0xff] }
 0x1c0   :  { %5343 = vmatprep.subr.bf16.mxu0 %v8368_v46  ;;  %5876 = vmatprep.subr.bf16.mxu1 %v8371_v35  ;;  %v8450_v45 = vld [vmem:[%s11732_s1 + $0xfc0] ss:$16 sps:$4 sm:$0xff]   ;;  %v8453_v46 = vld [vmem:[%s11732_s1 + $0xfc8] ss:$16 sps:$4 sm:$0xff]   ;;  %v8458_v35 = vld [vmem:[%s11732_s1 + $0xfe4] ss:$16 sps:$4 sm:$0xff]  }
 0x1c2   :  { %5335 = vmatmul.mubr.bf16.vlgmr.msra.gmra.mrb[0].mxu0 %v10455_v48  ;;  %5868 = vmatmul.mubr.bf16.vlgmr.msra.gmra.mrb[0].mxu1 %v10455_v48 }
 0x1c3   :  { %5344 = vmatpush1.bf16.msra.mxu0 %v8366_v50  ;;  %5877 = vmatpush1.bf16.msra.mxu1 %v8369_v51  ;;  %v8461_v50 = vld [vmem:[%s11732_s1 + $0xfec] ss:$16 sps:$4 sm:$0xff]   ;;  %v10648_v51 = vrot.slane %v10632_v44, %v9161_v49 }
 0x1c4   :  { %5345 = vmatprep.subr.bf16.mxu0 %v8374_v53  ;;  %5878 = vmatprep.subr.bf16.mxu1 %v8377_v38 }
 0x1c5   :  { %5375 = vmatprep.mubr.bf16.mxu0 %v967_v54  ;;  %5908 = vmatprep.mubr.bf16.mxu1 %v967_v54 }
 0x1c7   :  { %5346 = vmatpush1.bf16.msra.mxu0 %v8372_v55  ;;  %5879 = vmatpush1.bf16.msra.mxu1 %v8375_v56 }
 0x1c8   :  { %5347 = vmatprep.subr.bf16.mxu0 %v8380_v47  ;;  %5880 = vmatprep.subr.bf16.mxu1 %v8383_v57 }
 0x1cb   :  { %5348 = vmatpush1.bf16.msra.mxu0 %v8378_v58  ;;  %5881 = vmatpush1.bf16.msra.mxu1 %v8381_v59 }
 0x1cc   :  { %5349 = vmatprep.subr.bf16.mxu0 %v8386_v60  ;;  %5882 = vmatprep.subr.bf16.mxu1 %v8389_v61 }
 0x1cf   :  { %5350 = vmatpush1.bf16.msra.mxu0 %v8384_v62  ;;  %5883 = vmatpush1.bf16.msra.mxu1 %v8387_v63 }
 0x1d0   :  { %5351 = vmatprep.subr.bf16.mxu0 %v8392_v0  ;;  %5884 = vmatprep.subr.bf16.mxu1 %v8395_v1 }
 0x1d3   :  { %5352 = vmatpush1.bf16.msra.mxu0 %v8390_v2  ;;  %5885 = vmatpush1.bf16.msra.mxu1 %v8393_v3 }
 0x1d4   :  { %5353 = vmatprep.subr.bf16.mxu0 %v8398_v4  ;;  %5886 = vmatprep.subr.bf16.mxu1 %v8401_v5 }
 0x1d7   :  { %5354 = vmatpush1.bf16.msra.mxu0 %v8396_v6  ;;  %5887 = vmatpush1.bf16.msra.mxu1 %v8399_v7 }
 0x1d8   :  { %5355 = vmatprep.subr.bf16.mxu0 %v8404_v8  ;;  %5888 = vmatprep.subr.bf16.mxu1 %v8407_v9 }
 0x1db   :  { %5356 = vmatpush1.bf16.msra.mxu0 %v8402_v10  ;;  %5889 = vmatpush1.bf16.msra.mxu1 %v8405_v11 }
 0x1dc   :  { %5357 = vmatprep.subr.bf16.mxu0 %v8410_v12  ;;  %5890 = vmatprep.subr.bf16.mxu1 %v8413_v52 }
 0x1df   :  { %5358 = vmatpush1.bf16.msra.mxu0 %v8408_v15  ;;  %5891 = vmatpush1.bf16.msra.mxu1 %v8411_v16 }
 0x1e0   :  { %5359 = vmatprep.subr.bf16.mxu0 %v8416_v17  ;;  %5892 = vmatprep.subr.bf16.mxu1 %v8419_v18 }
 0x1e3   :  { %5360 = vmatpush1.bf16.msra.mxu0 %v8414_v19  ;;  %5893 = vmatpush1.bf16.msra.mxu1 %v8417_v20 }
 0x1e4   :  { %5361 = vmatprep.subr.bf16.mxu0 %v8422_v22  ;;  %5894 = vmatprep.subr.bf16.mxu1 %v8425_v23 }
 0x1e7   :  { %5362 = vmatpush1.bf16.msra.mxu0 %v8420_v24  ;;  %5895 = vmatpush1.bf16.msra.mxu1 %v8423_v13 }
 0x1e8   :  { %5363 = vmatprep.subr.bf16.mxu0 %v8428_v27  ;;  %5896 = vmatprep.subr.bf16.mxu1 %v8431_v28 }
 0x1eb   :  { %5364 = vmatpush1.bf16.msra.mxu0 %v8426_v29  ;;  %5897 = vmatpush1.bf16.msra.mxu1 %v8429_v14 }
 0x1ec   :  { %5365 = vmatprep.subr.bf16.mxu0 %v8434_v30  ;;  %5898 = vmatprep.subr.bf16.mxu1 %v8437_v31 }
 0x1ef   :  { %5366 = vmatpush1.bf16.msra.mxu0 %v8432_v25  ;;  %5899 = vmatpush1.bf16.msra.mxu1 %v8435_v32 }
 0x1f0   :  { %5367 = vmatprep.subr.bf16.mxu0 %v8440_v33  ;;  %5900 = vmatprep.subr.bf16.mxu1 %v8443_v26 }
 0x1f3   :  { %5368 = vmatpush1.bf16.msra.mxu0 %v8438_v36  ;;  %5901 = vmatpush1.bf16.msra.mxu1 %v8441_v37 }
 0x1f4   :  { %5369 = vmatprep.subr.bf16.mxu0 %v8446_v21  ;;  %5902 = vmatprep.subr.bf16.mxu1 %v8449_v39 }
 0x1f7   :  { %5370 = vmatpush1.bf16.msra.mxu0 %v8444_v40  ;;  %5903 = vmatpush1.bf16.msra.mxu1 %v8447_v41 }
 0x1f8   :  { %5371 = vmatprep.subr.bf16.mxu0 %v8452_v34  ;;  %5904 = vmatprep.subr.bf16.mxu1 %v8455_v43 }
 0x1f9   :  { %16 = vsyncpa [#allocation3], 0  ;;  %v8456_v53 = vld [vmem:[%s11732_s1 + $0xfe0] ss:$16 sps:$4 sm:$0xff]   ;;  %v8459_v38 = vld [vmem:[%s11732_s1 + $0xfe8] ss:$16 sps:$4 sm:$0xff]   ;;  %v983_v56 = vcombine.high %v10648_v51, %v10648_v51  ;;  %v965_v47 = vcombine.high %v10455_v48, %v10455_v48 }
 0x1fa   :  { %v8464_v54 = vld [vmem:[%s11732_s1 + $0x1004] ss:$16 sps:$4 sm:$0xff]   ;;  %v8467_v55 = vld [vmem:[%s11732_s1 + $0x100c] ss:$16 sps:$4 sm:$0xff]   ;;  %v8462_v57 = vld [vmem:[%s11732_s1 + $0x1000] ss:$16 sps:$4 sm:$0xff]  }
 0x1fb   :  { %5372 = vmatpush1.bf16.msra.mxu0 %v8450_v45  ;;  %5905 = vmatpush1.bf16.msra.mxu1 %v8453_v46  ;;  %v8465_v58 = vld [vmem:[%s11732_s1 + $0x1008] ss:$16 sps:$4 sm:$0xff]   ;;  %v8470_v59 = vld [vmem:[%s11732_s1 + $0x1024] ss:$16 sps:$4 sm:$0xff]   ;;  %v8473_v48 = vld [vmem:[%s11732_s1 + $0x102c] ss:$16 sps:$4 sm:$0xff]   ;;  %v10679_v60 = vrot.slane %v983_v56, %v9161_v49 }
 0x1fc   :  { %5373 = vmatprep.subr.bf16.mxu0 %v8458_v35  ;;  %5906 = vmatprep.subr.bf16.mxu1 %v8461_v50  ;;  %v8468_v61 = vld [vmem:[%s11732_s1 + $0x1020] ss:$16 sps:$4 sm:$0xff]   ;;  %v8471_v62 = vld [vmem:[%s11732_s1 + $0x1028] ss:$16 sps:$4 sm:$0xff]   ;;  %v8476_v63 = vld [vmem:[%s11732_s1 + $0x1044] ss:$16 sps:$4 sm:$0xff]  }
 0x1fd   :  { %v8479_v0 = vld [vmem:[%s11732_s1 + $0x104c] ss:$16 sps:$4 sm:$0xff]   ;;  %v8474_v1 = vld [vmem:[%s11732_s1 + $0x1040] ss:$16 sps:$4 sm:$0xff]   ;;  %v8477_v2 = vld [vmem:[%s11732_s1 + $0x1048] ss:$16 sps:$4 sm:$0xff]  }
 0x1fe   :  { %v8482_v3 = vld [vmem:[%s11732_s1 + $0x1064] ss:$16 sps:$4 sm:$0xff]   ;;  %v8485_v4 = vld [vmem:[%s11732_s1 + $0x106c] ss:$16 sps:$4 sm:$0xff]   ;;  %v8480_v5 = vld [vmem:[%s11732_s1 + $0x1060] ss:$16 sps:$4 sm:$0xff]  }
 0x1ff   :  { %5374 = vmatpush1.bf16.msra.mxu0 %v8456_v53  ;;  %5907 = vmatpush1.bf16.msra.mxu1 %v8459_v38  ;;  %v8483_v6 = vld [vmem:[%s11732_s1 + $0x1068] ss:$16 sps:$4 sm:$0xff]   ;;  %v8488_v7 = vld [vmem:[%s11732_s1 + $0x1084] ss:$16 sps:$4 sm:$0xff]   ;;  %v8491_v8 = vld [vmem:[%s11732_s1 + $0x108c] ss:$16 sps:$4 sm:$0xff]  }
 0x200   :  { %5384 = vmatprep.subr.bf16.mxu0 %v8464_v54  ;;  %5917 = vmatprep.subr.bf16.mxu1 %v8467_v55  ;;  %v8486_v9 = vld [vmem:[%s11732_s1 + $0x1080] ss:$16 sps:$4 sm:$0xff]   ;;  %v8489_v10 = vld [vmem:[%s11732_s1 + $0x1088] ss:$16 sps:$4 sm:$0xff]   ;;  %v8494_v11 = vld [vmem:[%s11732_s1 + $0x10a4] ss:$16 sps:$4 sm:$0xff]  }
 0x201   :  { %v8497_v12 = vld [vmem:[%s11732_s1 + $0x10ac] ss:$16 sps:$4 sm:$0xff]   ;;  %v8492_v52 = vld [vmem:[%s11732_s1 + $0x10a0] ss:$16 sps:$4 sm:$0xff]   ;;  %v8495_v15 = vld [vmem:[%s11732_s1 + $0x10a8] ss:$16 sps:$4 sm:$0xff]  }
 0x202   :  { %5376 = vmatmul.mubr.bf16.vlgmr.msra.gmra.mrb[0].mxu0 %v965_v47  ;;  %5909 = vmatmul.mubr.bf16.vlgmr.msra.gmra.mrb[0].mxu1 %v965_v47  ;;  %v8500_v16 = vld [vmem:[%s11732_s1 + $0x10c4] ss:$16 sps:$4 sm:$0xff]   ;;  %v8503_v17 = vld [vmem:[%s11732_s1 + $0x10cc] ss:$16 sps:$4 sm:$0xff]   ;;  %v8498_v18 = vld [vmem:[%s11732_s1 + $0x10c0] ss:$16 sps:$4 sm:$0xff]  }
 0x203   :  { %5385 = vmatpush1.bf16.msra.mxu0 %v8462_v57  ;;  %5918 = vmatpush1.bf16.msra.mxu1 %v8465_v58  ;;  %v8501_v19 = vld [vmem:[%s11732_s1 + $0x10c8] ss:$16 sps:$4 sm:$0xff]   ;;  %v8506_v20 = vld [vmem:[%s11732_s1 + $0x10e4] ss:$16 sps:$4 sm:$0xff]   ;;  %v8509_v22 = vld [vmem:[%s11732_s1 + $0x10ec] ss:$16 sps:$4 sm:$0xff]  }
 0x204   :  { %5386 = vmatprep.subr.bf16.mxu0 %v8470_v59  ;;  %5919 = vmatprep.subr.bf16.mxu1 %v8473_v48  ;;  %v8504_v23 = vld [vmem:[%s11732_s1 + $0x10e0] ss:$16 sps:$4 sm:$0xff]   ;;  %v8507_v24 = vld [vmem:[%s11732_s1 + $0x10e8] ss:$16 sps:$4 sm:$0xff]   ;;  %v8512_v13 = vld [vmem:[%s11732_s1 + $0x1104] ss:$16 sps:$4 sm:$0xff]  }
 0x205   :  { %5416 = vmatprep.mubr.bf16.mxu0 %v10679_v60  ;;  %5949 = vmatprep.mubr.bf16.mxu1 %v10679_v60  ;;  %v8515_v27 = vld [vmem:[%s11732_s1 + $0x110c] ss:$16 sps:$4 sm:$0xff]   ;;  %v8510_v28 = vld [vmem:[%s11732_s1 + $0x1100] ss:$16 sps:$4 sm:$0xff]   ;;  %v8513_v29 = vld [vmem:[%s11732_s1 + $0x1108] ss:$16 sps:$4 sm:$0xff]  }
 0x206   :  { %v8518_v14 = vld [vmem:[%s11732_s1 + $0x1124] ss:$16 sps:$4 sm:$0xff]   ;;  %v8521_v30 = vld [vmem:[%s11732_s1 + $0x112c] ss:$16 sps:$4 sm:$0xff]   ;;  %v8516_v31 = vld [vmem:[%s11732_s1 + $0x1120] ss:$16 sps:$4 sm:$0xff]  }
 0x207   :  { %5387 = vmatpush1.bf16.msra.mxu0 %v8468_v61  ;;  %5920 = vmatpush1.bf16.msra.mxu1 %v8471_v62  ;;  %v8519_v25 = vld [vmem:[%s11732_s1 + $0x1128] ss:$16 sps:$4 sm:$0xff]   ;;  %v8524_v32 = vld [vmem:[%s11732_s1 + $0x1144] ss:$16 sps:$4 sm:$0xff]   ;;  %v8527_v33 = vld [vmem:[%s11732_s1 + $0x114c] ss:$16 sps:$4 sm:$0xff]   ;;  %v10865_v62 = vrot.slane %v10648_v51, %v9161_v49 }
 0x208   :  { %5388 = vmatprep.subr.bf16.mxu0 %v8476_v63  ;;  %5921 = vmatprep.subr.bf16.mxu1 %v8479_v0  ;;  %v8522_v26 = vld [vmem:[%s11732_s1 + $0x1140] ss:$16 sps:$4 sm:$0xff]   ;;  %v8525_v36 = vld [vmem:[%s11732_s1 + $0x1148] ss:$16 sps:$4 sm:$0xff]   ;;  %v8530_v37 = vld [vmem:[%s11732_s1 + $0x1164] ss:$16 sps:$4 sm:$0xff]  }
 0x209   :  { %v8533_v21 = vld [vmem:[%s11732_s1 + $0x116c] ss:$16 sps:$4 sm:$0xff]   ;;  %v8528_v39 = vld [vmem:[%s11732_s1 + $0x1160] ss:$16 sps:$4 sm:$0xff]   ;;  %v8531_v40 = vld [vmem:[%s11732_s1 + $0x1168] ss:$16 sps:$4 sm:$0xff]  }
 0x20a   :  { %v8536_v41 = vld [vmem:[%s11732_s1 + $0x1184] ss:$16 sps:$4 sm:$0xff]   ;;  %v8539_v34 = vld [vmem:[%s11732_s1 + $0x118c] ss:$16 sps:$4 sm:$0xff]   ;;  %v8534_v43 = vld [vmem:[%s11732_s1 + $0x1180] ss:$16 sps:$4 sm:$0xff]  }
 0x20b   :  { %5389 = vmatpush1.bf16.msra.mxu0 %v8474_v1  ;;  %5922 = vmatpush1.bf16.msra.mxu1 %v8477_v2  ;;  %v8537_v45 = vld [vmem:[%s11732_s1 + $0x1188] ss:$16 sps:$4 sm:$0xff]   ;;  %v8542_v46 = vld [vmem:[%s11732_s1 + $0x11a4] ss:$16 sps:$4 sm:$0xff]   ;;  %v8545_v35 = vld [vmem:[%s11732_s1 + $0x11ac] ss:$16 sps:$4 sm:$0xff]   ;;  %v1015_v2 = vcombine.high %v10679_v60, %v10679_v60 }
 0x20c   :  { %5390 = vmatprep.subr.bf16.mxu0 %v8482_v3  ;;  %5923 = vmatprep.subr.bf16.mxu1 %v8485_v4  ;;  %v8540_v50 = vld [vmem:[%s11732_s1 + $0x11a0] ss:$16 sps:$4 sm:$0xff]   ;;  %v8543_v53 = vld [vmem:[%s11732_s1 + $0x11a8] ss:$16 sps:$4 sm:$0xff]   ;;  %v8548_v38 = vld [vmem:[%s11732_s1 + $0x11c4] ss:$16 sps:$4 sm:$0xff]  }
 0x20d   :  { %v8551_v54 = vld [vmem:[%s11732_s1 + $0x11cc] ss:$16 sps:$4 sm:$0xff]   ;;  %v8546_v55 = vld [vmem:[%s11732_s1 + $0x11c0] ss:$16 sps:$4 sm:$0xff]   ;;  %v8549_v56 = vld [vmem:[%s11732_s1 + $0x11c8] ss:$16 sps:$4 sm:$0xff]  }
 0x20e   :  { %v8554_v47 = vld [vmem:[%s11732_s1 + $0x11e4] ss:$16 sps:$4 sm:$0xff]   ;;  %v8557_v57 = vld [vmem:[%s11732_s1 + $0x11ec] ss:$16 sps:$4 sm:$0xff]   ;;  %v8552_v58 = vld [vmem:[%s11732_s1 + $0x11e0] ss:$16 sps:$4 sm:$0xff]  }
 0x20f   :  { %5391 = vmatpush1.bf16.msra.mxu0 %v8480_v5  ;;  %5924 = vmatpush1.bf16.msra.mxu1 %v8483_v6  ;;  %v8555_v59 = vld [vmem:[%s11732_s1 + $0x11e8] ss:$16 sps:$4 sm:$0xff]   ;;  %v8560_v48 = vld [vmem:[%s11732_s1 + $0x1204] ss:$16 sps:$4 sm:$0xff]   ;;  %v8563_v61 = vld [vmem:[%s11732_s1 + $0x120c] ss:$16 sps:$4 sm:$0xff]  }
 0x210   :  { %5392 = vmatprep.subr.bf16.mxu0 %v8488_v7  ;;  %5925 = vmatprep.subr.bf16.mxu1 %v8491_v8  ;;  %v8558_v63 = vld [vmem:[%s11732_s1 + $0x1200] ss:$16 sps:$4 sm:$0xff]   ;;  %v8561_v0 = vld [vmem:[%s11732_s1 + $0x1208] ss:$16 sps:$4 sm:$0xff]   ;;  %v8566_v1 = vld [vmem:[%s11732_s1 + $0x1224] ss:$16 sps:$4 sm:$0xff]  }
 0x211   :  { %v8569_v51 = vld [vmem:[%s11732_s1 + $0x122c] ss:$16 sps:$4 sm:$0xff]   ;;  %v8564_v3 = vld [vmem:[%s11732_s1 + $0x1220] ss:$16 sps:$4 sm:$0xff]   ;;  %v8567_v4 = vld [vmem:[%s11732_s1 + $0x1228] ss:$16 sps:$4 sm:$0xff]  }
 0x212   :  { %v8572_v60 = vld [vmem:[%s11732_s1 + $0x1244] ss:$16 sps:$4 sm:$0xff]   ;;  %v8575_v5 = vld [vmem:[%s11732_s1 + $0x124c] ss:$16 sps:$4 sm:$0xff]   ;;  %v8570_v6 = vld [vmem:[%s11732_s1 + $0x1240] ss:$16 sps:$4 sm:$0xff]  }
 0x213   :  { %5393 = vmatpush1.bf16.msra.mxu0 %v8486_v9  ;;  %5926 = vmatpush1.bf16.msra.mxu1 %v8489_v10  ;;  %v8573_v7 = vld [vmem:[%s11732_s1 + $0x1248] ss:$16 sps:$4 sm:$0xff]   ;;  %v8578_v8 = vld [vmem:[%s11732_s1 + $0x1264] ss:$16 sps:$4 sm:$0xff]   ;;  %v8581_v9 = vld [vmem:[%s11732_s1 + $0x126c] ss:$16 sps:$4 sm:$0xff]  }
 0x214   :  { %5394 = vmatprep.subr.bf16.mxu0 %v8494_v11  ;;  %5927 = vmatprep.subr.bf16.mxu1 %v8497_v12  ;;  %v8576_v10 = vld [vmem:[%s11732_s1 + $0x1260] ss:$16 sps:$4 sm:$0xff]   ;;  %v8579_v11 = vld [vmem:[%s11732_s1 + $0x1268] ss:$16 sps:$4 sm:$0xff]   ;;  %v8584_v12 = vld [vmem:[%s11732_s1 + $0x1284] ss:$16 sps:$4 sm:$0xff]  }
 0x215   :  { %vm8964_vm0 = vmmov 0   ;;  %s8965_s15 = smov [#allocation2]  }
 0x216   :  { %s6661_s16 = sshll.u32 %s8965_s15, 4  ;;  %s6662_s16 = int_to_ptr.vmem [resolvable:$true] %s6661_s16 }
 0x217   :  { %5395 = vmatpush1.bf16.msra.mxu0 %v8492_v52  ;;  %5928 = vmatpush1.bf16.msra.mxu1 %v8495_v15  ;;  %v8587_v52 = vld [vmem:[%s11732_s1 + $0x128c] ss:$16 sps:$4 sm:$0xff]   ;;  %v8582_v15 = vld [vmem:[%s11732_s1 + $0x1280] ss:$16 sps:$4 sm:$0xff]   ;;  %p8942_p1 = scmp.lt.s32.totalorder %s6662_s16, %s6662_s16 }
 0x218   :  { %5396 = vmatprep.subr.bf16.mxu0 %v8500_v16  ;;  %5929 = vmatprep.subr.bf16.mxu1 %v8503_v17  ;;  %v8585_v16 = vld [vmem:[%s11732_s1 + $0x1288] ss:$16 sps:$4 sm:$0xff]   ;;  %v8590_v17 = vld [vmem:[%s11732_s1 + $0x12a4] ss:$16 sps:$4 sm:$0xff]  }
 0x21b   :  { %5397 = vmatpush1.bf16.msra.mxu0 %v8498_v18  ;;  %5930 = vmatpush1.bf16.msra.mxu1 %v8501_v19  ;;  %v8593_v18 = vld [vmem:[%s11732_s1 + $0x12ac] ss:$16 sps:$4 sm:$0xff]   ;;  %v8588_v19 = vld [vmem:[%s11732_s1 + $0x12a0] ss:$16 sps:$4 sm:$0xff]  }
 0x21c   :  { %5398 = vmatprep.subr.bf16.mxu0 %v8506_v20  ;;  %5931 = vmatprep.subr.bf16.mxu1 %v8509_v22  ;;  %v8591_v20 = vld [vmem:[%s11732_s1 + $0x12a8] ss:$16 sps:$4 sm:$0xff]   ;;  %v8596_v22 = vld [vmem:[%s11732_s1 + $0x12c4] ss:$16 sps:$4 sm:$0xff]  }
 0x21f   :  { %5399 = vmatpush1.bf16.msra.mxu0 %v8504_v23  ;;  %5932 = vmatpush1.bf16.msra.mxu1 %v8507_v24  ;;  %v8599_v23 = vld [vmem:[%s11732_s1 + $0x12cc] ss:$16 sps:$4 sm:$0xff]   ;;  %v8594_v24 = vld [vmem:[%s11732_s1 + $0x12c0] ss:$16 sps:$4 sm:$0xff]  }
 0x220   :  { %5400 = vmatprep.subr.bf16.mxu0 %v8512_v13  ;;  %5933 = vmatprep.subr.bf16.mxu1 %v8515_v27  ;;  %v8597_v13 = vld [vmem:[%s11732_s1 + $0x12c8] ss:$16 sps:$4 sm:$0xff]   ;;  %v8602_v27 = vld [vmem:[%s11732_s1 + $0x12e4] ss:$16 sps:$4 sm:$0xff]  }
 0x223   :  { %5401 = vmatpush1.bf16.msra.mxu0 %v8510_v28  ;;  %5934 = vmatpush1.bf16.msra.mxu1 %v8513_v29  ;;  %v8605_v28 = vld [vmem:[%s11732_s1 + $0x12ec] ss:$16 sps:$4 sm:$0xff]   ;;  %v8600_v29 = vld [vmem:[%s11732_s1 + $0x12e0] ss:$16 sps:$4 sm:$0xff]  }
 0x224   :  { %5402 = vmatprep.subr.bf16.mxu0 %v8518_v14  ;;  %5935 = vmatprep.subr.bf16.mxu1 %v8521_v30  ;;  %v8603_v14 = vld [vmem:[%s11732_s1 + $0x12e8] ss:$16 sps:$4 sm:$0xff]   ;;  %v8608_v30 = vld [vmem:[%s11732_s1 + $0x1304] ss:$16 sps:$4 sm:$0xff]  }
 0x227   :  { %5403 = vmatpush1.bf16.msra.mxu0 %v8516_v31  ;;  %5936 = vmatpush1.bf16.msra.mxu1 %v8519_v25  ;;  %v8611_v31 = vld [vmem:[%s11732_s1 + $0x130c] ss:$16 sps:$4 sm:$0xff]   ;;  %v8606_v25 = vld [vmem:[%s11732_s1 + $0x1300] ss:$16 sps:$4 sm:$0xff]  }
 0x228   :  { %5404 = vmatprep.subr.bf16.mxu0 %v8524_v32  ;;  %5937 = vmatprep.subr.bf16.mxu1 %v8527_v33  ;;  %v8609_v32 = vld [vmem:[%s11732_s1 + $0x1308] ss:$16 sps:$4 sm:$0xff]   ;;  %v8614_v33 = vld [vmem:[%s11732_s1 + $0x1324] ss:$16 sps:$4 sm:$0xff]  }
 0x22b   :  { %5405 = vmatpush1.bf16.msra.mxu0 %v8522_v26  ;;  %5938 = vmatpush1.bf16.msra.mxu1 %v8525_v36  ;;  %v8617_v26 = vld [vmem:[%s11732_s1 + $0x132c] ss:$16 sps:$4 sm:$0xff]   ;;  %v8612_v36 = vld [vmem:[%s11732_s1 + $0x1320] ss:$16 sps:$4 sm:$0xff]  }
 0x22c   :  { %5406 = vmatprep.subr.bf16.mxu0 %v8530_v37  ;;  %5939 = vmatprep.subr.bf16.mxu1 %v8533_v21  ;;  %v8615_v37 = vld [vmem:[%s11732_s1 + $0x1328] ss:$16 sps:$4 sm:$0xff]   ;;  %v8620_v21 = vld [vmem:[%s11732_s1 + $0x1344] ss:$16 sps:$4 sm:$0xff]  }
 0x22f   :  { %5407 = vmatpush1.bf16.msra.mxu0 %v8528_v39  ;;  %5940 = vmatpush1.bf16.msra.mxu1 %v8531_v40  ;;  %v8623_v39 = vld [vmem:[%s11732_s1 + $0x134c] ss:$16 sps:$4 sm:$0xff]   ;;  %v8618_v40 = vld [vmem:[%s11732_s1 + $0x1340] ss:$16 sps:$4 sm:$0xff]  }
 0x230   :  { %5408 = vmatprep.subr.bf16.mxu0 %v8536_v41  ;;  %5941 = vmatprep.subr.bf16.mxu1 %v8539_v34  ;;  %v8621_v41 = vld [vmem:[%s11732_s1 + $0x1348] ss:$16 sps:$4 sm:$0xff]   ;;  %v8626_v34 = vld [vmem:[%s11732_s1 + $0x1364] ss:$16 sps:$4 sm:$0xff]  }
 0x233   :  { %5409 = vmatpush1.bf16.msra.mxu0 %v8534_v43  ;;  %5942 = vmatpush1.bf16.msra.mxu1 %v8537_v45  ;;  %v8629_v43 = vld [vmem:[%s11732_s1 + $0x136c] ss:$16 sps:$4 sm:$0xff]   ;;  %v8624_v45 = vld [vmem:[%s11732_s1 + $0x1360] ss:$16 sps:$4 sm:$0xff]  }
 0x234   :  { %5410 = vmatprep.subr.bf16.mxu0 %v8542_v46  ;;  %5943 = vmatprep.subr.bf16.mxu1 %v8545_v35  ;;  %v8627_v46 = vld [vmem:[%s11732_s1 + $0x1368] ss:$16 sps:$4 sm:$0xff]   ;;  %v8632_v35 = vld [vmem:[%s11732_s1 + $0x1384] ss:$16 sps:$4 sm:$0xff]  }
 0x237   :  { %5411 = vmatpush1.bf16.msra.mxu0 %v8540_v50  ;;  %5944 = vmatpush1.bf16.msra.mxu1 %v8543_v53  ;;  %v8635_v50 = vld [vmem:[%s11732_s1 + $0x138c] ss:$16 sps:$4 sm:$0xff]   ;;  %v8630_v53 = vld [vmem:[%s11732_s1 + $0x1380] ss:$16 sps:$4 sm:$0xff]  }
 0x238   :  { %5412 = vmatprep.subr.bf16.mxu0 %v8548_v38  ;;  %5945 = vmatprep.subr.bf16.mxu1 %v8551_v54  ;;  %v8633_v38 = vld [vmem:[%s11732_s1 + $0x1388] ss:$16 sps:$4 sm:$0xff]   ;;  %v8638_v54 = vld [vmem:[%s11732_s1 + $0x13a4] ss:$16 sps:$4 sm:$0xff]  }
 0x23b   :  { %5413 = vmatpush1.bf16.msra.mxu0 %v8546_v55  ;;  %5946 = vmatpush1.bf16.msra.mxu1 %v8549_v56  ;;  %v8641_v55 = vld [vmem:[%s11732_s1 + $0x13ac] ss:$16 sps:$4 sm:$0xff]   ;;  %v8636_v56 = vld [vmem:[%s11732_s1 + $0x13a0] ss:$16 sps:$4 sm:$0xff]  }
 0x23c   :  { %5414 = vmatprep.subr.bf16.mxu0 %v8554_v47  ;;  %5947 = vmatprep.subr.bf16.mxu1 %v8557_v57  ;;  %v8639_v47 = vld [vmem:[%s11732_s1 + $0x13a8] ss:$16 sps:$4 sm:$0xff]   ;;  %v8644_v57 = vld [vmem:[%s11732_s1 + $0x13c4] ss:$16 sps:$4 sm:$0xff]  }
 0x23f   :  { %5415 = vmatpush1.bf16.msra.mxu0 %v8552_v58  ;;  %5948 = vmatpush1.bf16.msra.mxu1 %v8555_v59  ;;  %v8647_v58 = vld [vmem:[%s11732_s1 + $0x13cc] ss:$16 sps:$4 sm:$0xff]   ;;  %v968_v59 = vcombine.high %v10632_v44, %v10632_v44 }
 0x240   :  { %5425 = vmatprep.subr.bf16.mxu0 %v8560_v48  ;;  %5958 = vmatprep.subr.bf16.mxu1 %v8563_v61  ;;  %v8642_v48 = vld [vmem:[%s11732_s1 + $0x13c0] ss:$16 sps:$4 sm:$0xff]   ;;  %v8645_v61 = vld [vmem:[%s11732_s1 + $0x13c8] ss:$16 sps:$4 sm:$0xff]   ;;  %v8653_v44 = vld [vmem:[%s11732_s1 + $0x13ec] ss:$16 sps:$4 sm:$0xff]  }
 0x242   :  { %5417 = vmatmul.mubr.bf16.vlgmr.msra.gmra.mrb[0].mxu0 %v10865_v62  ;;  %5950 = vmatmul.mubr.bf16.vlgmr.msra.gmra.mrb[0].mxu1 %v10865_v62 }
 0x243   :  { %5426 = vmatpush1.bf16.msra.mxu0 %v8558_v63  ;;  %5959 = vmatpush1.bf16.msra.mxu1 %v8561_v0  ;;  %v8650_v63 = vld [vmem:[%s11732_s1 + $0x13e4] ss:$16 sps:$4 sm:$0xff]   ;;  %v11054_v0 = vrot.slane %v968_v59, %v9161_v49  ;;  %v8729_v59 = vld [vmem:[%s11732_s1 + $0x1588] ss:$16 sps:$4 sm:$0xff]  }
 0x244   :  { %5427 = vmatprep.subr.bf16.mxu0 %v8566_v1  ;;  %5960 = vmatprep.subr.bf16.mxu1 %v8569_v51  ;;  %v8648_v1 = vld [vmem:[%s11732_s1 + $0x13e0] ss:$16 sps:$4 sm:$0xff]   ;;  %v8651_v51 = vld [vmem:[%s11732_s1 + $0x13e8] ss:$16 sps:$4 sm:$0xff]  }
 0x245   :  { %5457 = vmatprep.mubr.bf16.mxu0 %v1015_v2  ;;  %5990 = vmatprep.mubr.bf16.mxu1 %v1015_v2  ;;  %v8656_v2 = vld [vmem:[%s11732_s1 + $0x1404] ss:$16 sps:$4 sm:$0xff]  }
 0x247   :  { %5428 = vmatpush1.bf16.msra.mxu0 %v8564_v3  ;;  %5961 = vmatpush1.bf16.msra.mxu1 %v8567_v4  ;;  %v8659_v3 = vld [vmem:[%s11732_s1 + $0x140c] ss:$16 sps:$4 sm:$0xff]   ;;  %v984_v4 = vcombine.high %v11054_v0, %v11054_v0 }
 0x248   :  { %5429 = vmatprep.subr.bf16.mxu0 %v8572_v60  ;;  %5962 = vmatprep.subr.bf16.mxu1 %v8575_v5  ;;  %v1013_v60 = vcombine.high %v10865_v62, %v10865_v62  ;;  %v8654_v5 = vld [vmem:[%s11732_s1 + $0x1400] ss:$16 sps:$4 sm:$0xff]   ;;  %v8665_v62 = vld [vmem:[%s11732_s1 + $0x142c] ss:$16 sps:$4 sm:$0xff]  }
 0x24b   :  { %5430 = vmatpush1.bf16.msra.mxu0 %v8570_v6  ;;  %5963 = vmatpush1.bf16.msra.mxu1 %v8573_v7  ;;  %v8657_v6 = vld [vmem:[%s11732_s1 + $0x1408] ss:$16 sps:$4 sm:$0xff]   ;;  %v8662_v7 = vld [vmem:[%s11732_s1 + $0x1424] ss:$16 sps:$4 sm:$0xff]  }
 0x24c   :  { %5431 = vmatprep.subr.bf16.mxu0 %v8578_v8  ;;  %5964 = vmatprep.subr.bf16.mxu1 %v8581_v9  ;;  %v11085_v8 = vrot.slane %v984_v4, %v9161_v49  ;;  %v8660_v9 = vld [vmem:[%s11732_s1 + $0x1420] ss:$16 sps:$4 sm:$0xff]   ;;  %v8746_v4 = vld [vmem:[%s11732_s1 + $0x15e4] ss:$16 sps:$4 sm:$0xff]  }
 0x24f   :  { %5432 = vmatpush1.bf16.msra.mxu0 %v8576_v10  ;;  %5965 = vmatpush1.bf16.msra.mxu1 %v8579_v11  ;;  %v8663_v10 = vld [vmem:[%s11732_s1 + $0x1428] ss:$16 sps:$4 sm:$0xff]   ;;  %v8668_v11 = vld [vmem:[%s11732_s1 + $0x1444] ss:$16 sps:$4 sm:$0xff]  }
 0x250   :  { %5433 = vmatprep.subr.bf16.mxu0 %v8584_v12  ;;  %5966 = vmatprep.subr.bf16.mxu1 %v8587_v52  ;;  %v8671_v12 = vld [vmem:[%s11732_s1 + $0x144c] ss:$16 sps:$4 sm:$0xff]   ;;  %v8666_v52 = vld [vmem:[%s11732_s1 + $0x1440] ss:$16 sps:$4 sm:$0xff]  }
 0x253   :  { %5434 = vmatpush1.bf16.msra.mxu0 %v8582_v15  ;;  %5967 = vmatpush1.bf16.msra.mxu1 %v8585_v16  ;;  %v8669_v15 = vld [vmem:[%s11732_s1 + $0x1448] ss:$16 sps:$4 sm:$0xff]   ;;  %v8674_v16 = vld [vmem:[%s11732_s1 + $0x1464] ss:$16 sps:$4 sm:$0xff]  }
 0x254   :  { %5435 = vmatprep.subr.bf16.mxu0 %v8590_v17  ;;  %5968 = vmatprep.subr.bf16.mxu1 %v8593_v18  ;;  %v8677_v17 = vld [vmem:[%s11732_s1 + $0x146c] ss:$16 sps:$4 sm:$0xff]   ;;  %v8672_v18 = vld [vmem:[%s11732_s1 + $0x1460] ss:$16 sps:$4 sm:$0xff]  }
 0x257   :  { %5436 = vmatpush1.bf16.msra.mxu0 %v8588_v19  ;;  %5969 = vmatpush1.bf16.msra.mxu1 %v8591_v20  ;;  %v8675_v19 = vld [vmem:[%s11732_s1 + $0x1468] ss:$16 sps:$4 sm:$0xff]   ;;  %v8680_v20 = vld [vmem:[%s11732_s1 + $0x1484] ss:$16 sps:$4 sm:$0xff]  }
 0x258   :  { %5437 = vmatprep.subr.bf16.mxu0 %v8596_v22  ;;  %5970 = vmatprep.subr.bf16.mxu1 %v8599_v23  ;;  %v8683_v22 = vld [vmem:[%s11732_s1 + $0x148c] ss:$16 sps:$4 sm:$0xff]   ;;  %v8678_v23 = vld [vmem:[%s11732_s1 + $0x1480] ss:$16 sps:$4 sm:$0xff]  }
 0x25b   :  { %5438 = vmatpush1.bf16.msra.mxu0 %v8594_v24  ;;  %5971 = vmatpush1.bf16.msra.mxu1 %v8597_v13  ;;  %v8681_v24 = vld [vmem:[%s11732_s1 + $0x1488] ss:$16 sps:$4 sm:$0xff]   ;;  %v8686_v13 = vld [vmem:[%s11732_s1 + $0x14a4] ss:$16 sps:$4 sm:$0xff]  }
 0x25c   :  { %5439 = vmatprep.subr.bf16.mxu0 %v8602_v27  ;;  %5972 = vmatprep.subr.bf16.mxu1 %v8605_v28  ;;  %v8689_v27 = vld [vmem:[%s11732_s1 + $0x14ac] ss:$16 sps:$4 sm:$0xff]   ;;  %v8684_v28 = vld [vmem:[%s11732_s1 + $0x14a0] ss:$16 sps:$4 sm:$0xff]  }
 0x25f   :  { %5440 = vmatpush1.bf16.msra.mxu0 %v8600_v29  ;;  %5973 = vmatpush1.bf16.msra.mxu1 %v8603_v14  ;;  %v8687_v29 = vld [vmem:[%s11732_s1 + $0x14a8] ss:$16 sps:$4 sm:$0xff]   ;;  %v8692_v14 = vld [vmem:[%s11732_s1 + $0x14c4] ss:$16 sps:$4 sm:$0xff]  }
 0x260   :  { %5441 = vmatprep.subr.bf16.mxu0 %v8608_v30  ;;  %5974 = vmatprep.subr.bf16.mxu1 %v8611_v31  ;;  %v8695_v30 = vld [vmem:[%s11732_s1 + $0x14cc] ss:$16 sps:$4 sm:$0xff]   ;;  %v8690_v31 = vld [vmem:[%s11732_s1 + $0x14c0] ss:$16 sps:$4 sm:$0xff]  }
 0x263   :  { %5442 = vmatpush1.bf16.msra.mxu0 %v8606_v25  ;;  %5975 = vmatpush1.bf16.msra.mxu1 %v8609_v32  ;;  %v8693_v25 = vld [vmem:[%s11732_s1 + $0x14c8] ss:$16 sps:$4 sm:$0xff]   ;;  %v8698_v32 = vld [vmem:[%s11732_s1 + $0x14e4] ss:$16 sps:$4 sm:$0xff]  }
 0x264   :  { %5443 = vmatprep.subr.bf16.mxu0 %v8614_v33  ;;  %5976 = vmatprep.subr.bf16.mxu1 %v8617_v26  ;;  %v8701_v33 = vld [vmem:[%s11732_s1 + $0x14ec] ss:$16 sps:$4 sm:$0xff]   ;;  %v8696_v26 = vld [vmem:[%s11732_s1 + $0x14e0] ss:$16 sps:$4 sm:$0xff]  }
 0x267   :  { %5444 = vmatpush1.bf16.msra.mxu0 %v8612_v36  ;;  %5977 = vmatpush1.bf16.msra.mxu1 %v8615_v37  ;;  %v8699_v36 = vld [vmem:[%s11732_s1 + $0x14e8] ss:$16 sps:$4 sm:$0xff]   ;;  %v8704_v37 = vld [vmem:[%s11732_s1 + $0x1504] ss:$16 sps:$4 sm:$0xff]  }
 0x268   :  { %5445 = vmatprep.subr.bf16.mxu0 %v8620_v21  ;;  %5978 = vmatprep.subr.bf16.mxu1 %v8623_v39  ;;  %v8707_v21 = vld [vmem:[%s11732_s1 + $0x150c] ss:$16 sps:$4 sm:$0xff]   ;;  %v8702_v39 = vld [vmem:[%s11732_s1 + $0x1500] ss:$16 sps:$4 sm:$0xff]  }
 0x26b   :  { %5446 = vmatpush1.bf16.msra.mxu0 %v8618_v40  ;;  %5979 = vmatpush1.bf16.msra.mxu1 %v8621_v41  ;;  %v8705_v40 = vld [vmem:[%s11732_s1 + $0x1508] ss:$16 sps:$4 sm:$0xff]   ;;  %v8710_v41 = vld [vmem:[%s11732_s1 + $0x1524] ss:$16 sps:$4 sm:$0xff]  }
 0x26c   :  { %5447 = vmatprep.subr.bf16.mxu0 %v8626_v34  ;;  %5980 = vmatprep.subr.bf16.mxu1 %v8629_v43  ;;  %v8713_v34 = vld [vmem:[%s11732_s1 + $0x152c] ss:$16 sps:$4 sm:$0xff]   ;;  %v8708_v43 = vld [vmem:[%s11732_s1 + $0x1520] ss:$16 sps:$4 sm:$0xff]  }
 0x26f   :  { %5448 = vmatpush1.bf16.msra.mxu0 %v8624_v45  ;;  %5981 = vmatpush1.bf16.msra.mxu1 %v8627_v46  ;;  %v8711_v45 = vld [vmem:[%s11732_s1 + $0x1528] ss:$16 sps:$4 sm:$0xff]   ;;  %v8716_v46 = vld [vmem:[%s11732_s1 + $0x1544] ss:$16 sps:$4 sm:$0xff]  }
 0x270   :  { %5449 = vmatprep.subr.bf16.mxu0 %v8632_v35  ;;  %5982 = vmatprep.subr.bf16.mxu1 %v8635_v50  ;;  %v8719_v35 = vld [vmem:[%s11732_s1 + $0x154c] ss:$16 sps:$4 sm:$0xff]   ;;  %v8714_v50 = vld [vmem:[%s11732_s1 + $0x1540] ss:$16 sps:$4 sm:$0xff]  }
 0x273   :  { %5450 = vmatpush1.bf16.msra.mxu0 %v8630_v53  ;;  %5983 = vmatpush1.bf16.msra.mxu1 %v8633_v38  ;;  %v8717_v53 = vld [vmem:[%s11732_s1 + $0x1548] ss:$16 sps:$4 sm:$0xff]   ;;  %v8722_v38 = vld [vmem:[%s11732_s1 + $0x1564] ss:$16 sps:$4 sm:$0xff]  }
 0x274   :  { %5451 = vmatprep.subr.bf16.mxu0 %v8638_v54  ;;  %5984 = vmatprep.subr.bf16.mxu1 %v8641_v55  ;;  %v8725_v54 = vld [vmem:[%s11732_s1 + $0x156c] ss:$16 sps:$4 sm:$0xff]   ;;  %v8720_v55 = vld [vmem:[%s11732_s1 + $0x1560] ss:$16 sps:$4 sm:$0xff]  }
 0x277   :  { %5452 = vmatpush1.bf16.msra.mxu0 %v8636_v56  ;;  %5985 = vmatpush1.bf16.msra.mxu1 %v8639_v47  ;;  %v8723_v56 = vld [vmem:[%s11732_s1 + $0x1568] ss:$16 sps:$4 sm:$0xff]   ;;  %v8728_v47 = vld [vmem:[%s11732_s1 + $0x1584] ss:$16 sps:$4 sm:$0xff]  }
 0x278   :  { %5453 = vmatprep.subr.bf16.mxu0 %v8644_v57  ;;  %5986 = vmatprep.subr.bf16.mxu1 %v8647_v58  ;;  %v8731_v57 = vld [vmem:[%s11732_s1 + $0x158c] ss:$16 sps:$4 sm:$0xff]   ;;  %v8726_v58 = vld [vmem:[%s11732_s1 + $0x1580] ss:$16 sps:$4 sm:$0xff]  }
 0x27b   :  { %5454 = vmatpush1.bf16.msra.mxu0 %v8642_v48  ;;  %5987 = vmatpush1.bf16.msra.mxu1 %v8645_v61  ;;  %v8734_v48 = vld [vmem:[%s11732_s1 + $0x15a4] ss:$16 sps:$4 sm:$0xff]   ;;  %v8737_v61 = vld [vmem:[%s11732_s1 + $0x15ac] ss:$16 sps:$4 sm:$0xff]  }
 0x27c   :  { %5455 = vmatprep.subr.bf16.mxu0 %v8650_v63  ;;  %5988 = vmatprep.subr.bf16.mxu1 %v8653_v44  ;;  %v8732_v63 = vld [vmem:[%s11732_s1 + $0x15a0] ss:$16 sps:$4 sm:$0xff]   ;;  %v8735_v44 = vld [vmem:[%s11732_s1 + $0x15a8] ss:$16 sps:$4 sm:$0xff]  }
 0x27f   :  { %5456 = vmatpush1.bf16.msra.mxu0 %v8648_v1  ;;  %5989 = vmatpush1.bf16.msra.mxu1 %v8651_v51  ;;  %v8740_v1 = vld [vmem:[%s11732_s1 + $0x15c4] ss:$16 sps:$4 sm:$0xff]   ;;  %v8743_v51 = vld [vmem:[%s11732_s1 + $0x15cc] ss:$16 sps:$4 sm:$0xff]  }
 0x280   :  { %5466 = vmatprep.subr.bf16.mxu0 %v8656_v2  ;;  %5999 = vmatprep.subr.bf16.mxu1 %v8659_v3  ;;  %v8738_v2 = vld [vmem:[%s11732_s1 + $0x15c0] ss:$16 sps:$4 sm:$0xff]   ;;  %v8741_v3 = vld [vmem:[%s11732_s1 + $0x15c8] ss:$16 sps:$4 sm:$0xff]  }
 0x282   :  { %5458 = vmatmul.mubr.bf16.vlgmr.msra.gmra.mrb[0].mxu0 %v1013_v60  ;;  %5991 = vmatmul.mubr.bf16.vlgmr.msra.gmra.mrb[0].mxu1 %v1013_v60  ;;  %v8749_v60 = vld [vmem:[%s11732_s1 + $0x15ec] ss:$16 sps:$4 sm:$0xff]  }
 0x283   :  { %5467 = vmatpush1.bf16.msra.mxu0 %v8654_v5  ;;  %6000 = vmatpush1.bf16.msra.mxu1 %v8657_v6  ;;  %v8744_v5 = vld [vmem:[%s11732_s1 + $0x15e0] ss:$16 sps:$4 sm:$0xff]   ;;  %v8747_v6 = vld [vmem:[%s11732_s1 + $0x15e8] ss:$16 sps:$4 sm:$0xff]  }
 0x284   :  { %5468 = vmatprep.subr.bf16.mxu0 %v8662_v7  ;;  %6001 = vmatprep.subr.bf16.mxu1 %v8665_v62  ;;  %v8753_v7 = vld [vmem:[%s11732_s1 + $0x1604] ss:$16 sps:$4 sm:$0xff]   ;;  %v8756_v62 = vld [vmem:[%s11732_s1 + $0x160c] ss:$16 sps:$4 sm:$0xff]  }
 0x285   :  { %5498 = vmatprep.mubr.bf16.mxu0 %v11085_v8  ;;  %6031 = vmatprep.mubr.bf16.mxu1 %v11085_v8 }
 0x287   :  { %5469 = vmatpush1.bf16.msra.mxu0 %v8660_v9  ;;  %6002 = vmatpush1.bf16.msra.mxu1 %v8663_v10  ;;  %v11271_v9 = vrot.slane %v11054_v0, %v9161_v49  ;;  %v8751_v10 = vld [vmem:[%s11732_s1 + $0x1600] ss:$16 sps:$4 sm:$0xff]   ;;  %v8762_v0 = vld [vmem:[%s11732_s1 + $0x162c] ss:$16 sps:$4 sm:$0xff]  }
 0x288   :  { %5470 = vmatprep.subr.bf16.mxu0 %v8668_v11  ;;  %6003 = vmatprep.subr.bf16.mxu1 %v8671_v12  ;;  %v8754_v11 = vld [vmem:[%s11732_s1 + $0x1608] ss:$16 sps:$4 sm:$0xff]   ;;  %v8759_v12 = vld [vmem:[%s11732_s1 + $0x1624] ss:$16 sps:$4 sm:$0xff]  }
 0x28b   :  { %5471 = vmatpush1.bf16.msra.mxu0 %v8666_v52  ;;  %6004 = vmatpush1.bf16.msra.mxu1 %v8669_v15  ;;  %v1016_v52 = vcombine.high %v11085_v8, %v11085_v8  ;;  %v8757_v15 = vld [vmem:[%s11732_s1 + $0x1620] ss:$16 sps:$4 sm:$0xff]   ;;  %v8765_v8 = vld [vmem:[%s11732_s1 + $0x1644] ss:$16 sps:$4 sm:$0xff]  }
 0x28c   :  { %5472 = vmatprep.subr.bf16.mxu0 %v8674_v16  ;;  %6005 = vmatprep.subr.bf16.mxu1 %v8677_v17  ;;  %v8760_v16 = vld [vmem:[%s11732_s1 + $0x1628] ss:$16 sps:$4 sm:$0xff]   ;;  %v8768_v17 = vld [vmem:[%s11732_s1 + $0x164c] ss:$16 sps:$4 sm:$0xff]  }
 0x28f   :  { %5473 = vmatpush1.bf16.msra.mxu0 %v8672_v18  ;;  %6006 = vmatpush1.bf16.msra.mxu1 %v8675_v19  ;;  %v8763_v18 = vld [vmem:[%s11732_s1 + $0x1640] ss:$16 sps:$4 sm:$0xff]   ;;  %v8766_v19 = vld [vmem:[%s11732_s1 + $0x1648] ss:$16 sps:$4 sm:$0xff]  }
 0x290   :  { %5474 = vmatprep.subr.bf16.mxu0 %v8680_v20  ;;  %6007 = vmatprep.subr.bf16.mxu1 %v8683_v22  ;;  %v8771_v20 = vld [vmem:[%s11732_s1 + $0x1664] ss:$16 sps:$4 sm:$0xff]   ;;  %v8774_v22 = vld [vmem:[%s11732_s1 + $0x166c] ss:$16 sps:$4 sm:$0xff]  }
 0x293   :  { %5475 = vmatpush1.bf16.msra.mxu0 %v8678_v23  ;;  %6008 = vmatpush1.bf16.msra.mxu1 %v8681_v24  ;;  %v8769_v23 = vld [vmem:[%s11732_s1 + $0x1660] ss:$16 sps:$4 sm:$0xff]   ;;  %v8772_v24 = vld [vmem:[%s11732_s1 + $0x1668] ss:$16 sps:$4 sm:$0xff]  }
 0x294   :  { %5476 = vmatprep.subr.bf16.mxu0 %v8686_v13  ;;  %6009 = vmatprep.subr.bf16.mxu1 %v8689_v27  ;;  %v8777_v13 = vld [vmem:[%s11732_s1 + $0x1684] ss:$16 sps:$4 sm:$0xff]   ;;  %v8780_v27 = vld [vmem:[%s11732_s1 + $0x168c] ss:$16 sps:$4 sm:$0xff]  }
 0x297   :  { %5477 = vmatpush1.bf16.msra.mxu0 %v8684_v28  ;;  %6010 = vmatpush1.bf16.msra.mxu1 %v8687_v29  ;;  %v8775_v28 = vld [vmem:[%s11732_s1 + $0x1680] ss:$16 sps:$4 sm:$0xff]   ;;  %v8778_v29 = vld [vmem:[%s11732_s1 + $0x1688] ss:$16 sps:$4 sm:$0xff]  }
 0x298   :  { %5478 = vmatprep.subr.bf16.mxu0 %v8692_v14  ;;  %6011 = vmatprep.subr.bf16.mxu1 %v8695_v30  ;;  %v8783_v14 = vld [vmem:[%s11732_s1 + $0x16a4] ss:$16 sps:$4 sm:$0xff]   ;;  %v8786_v30 = vld [vmem:[%s11732_s1 + $0x16ac] ss:$16 sps:$4 sm:$0xff]  }
 0x29b   :  { %5479 = vmatpush1.bf16.msra.mxu0 %v8690_v31  ;;  %6012 = vmatpush1.bf16.msra.mxu1 %v8693_v25  ;;  %v8781_v31 = vld [vmem:[%s11732_s1 + $0x16a0] ss:$16 sps:$4 sm:$0xff]   ;;  %v8784_v25 = vld [vmem:[%s11732_s1 + $0x16a8] ss:$16 sps:$4 sm:$0xff]  }
 0x29c   :  { %5480 = vmatprep.subr.bf16.mxu0 %v8698_v32  ;;  %6013 = vmatprep.subr.bf16.mxu1 %v8701_v33  ;;  %v8789_v32 = vld [vmem:[%s11732_s1 + $0x16c4] ss:$16 sps:$4 sm:$0xff]   ;;  %v8792_v33 = vld [vmem:[%s11732_s1 + $0x16cc] ss:$16 sps:$4 sm:$0xff]  }
 0x29f   :  { %5481 = vmatpush1.bf16.msra.mxu0 %v8696_v26  ;;  %6014 = vmatpush1.bf16.msra.mxu1 %v8699_v36  ;;  %v8787_v26 = vld [vmem:[%s11732_s1 + $0x16c0] ss:$16 sps:$4 sm:$0xff]   ;;  %v8790_v36 = vld [vmem:[%s11732_s1 + $0x16c8] ss:$16 sps:$4 sm:$0xff]  }
 0x2a0   :  { %5482 = vmatprep.subr.bf16.mxu0 %v8704_v37  ;;  %6015 = vmatprep.subr.bf16.mxu1 %v8707_v21  ;;  %v8795_v37 = vld [vmem:[%s11732_s1 + $0x16e4] ss:$16 sps:$4 sm:$0xff]   ;;  %v8798_v21 = vld [vmem:[%s11732_s1 + $0x16ec] ss:$16 sps:$4 sm:$0xff]  }
 0x2a3   :  { %5483 = vmatpush1.bf16.msra.mxu0 %v8702_v39  ;;  %6016 = vmatpush1.bf16.msra.mxu1 %v8705_v40  ;;  %v8793_v39 = vld [vmem:[%s11732_s1 + $0x16e0] ss:$16 sps:$4 sm:$0xff]   ;;  %v8796_v40 = vld [vmem:[%s11732_s1 + $0x16e8] ss:$16 sps:$4 sm:$0xff]  }
 0x2a4   :  { %5484 = vmatprep.subr.bf16.mxu0 %v8710_v41  ;;  %6017 = vmatprep.subr.bf16.mxu1 %v8713_v34  ;;  %v8801_v41 = vld [vmem:[%s11732_s1 + $0x1704] ss:$16 sps:$4 sm:$0xff]   ;;  %v8804_v34 = vld [vmem:[%s11732_s1 + $0x170c] ss:$16 sps:$4 sm:$0xff]  }
 0x2a7   :  { %5485 = vmatpush1.bf16.msra.mxu0 %v8708_v43  ;;  %6018 = vmatpush1.bf16.msra.mxu1 %v8711_v45  ;;  %v8799_v43 = vld [vmem:[%s11732_s1 + $0x1700] ss:$16 sps:$4 sm:$0xff]   ;;  %v8802_v45 = vld [vmem:[%s11732_s1 + $0x1708] ss:$16 sps:$4 sm:$0xff]  }
 0x2a8   :  { %5486 = vmatprep.subr.bf16.mxu0 %v8716_v46  ;;  %6019 = vmatprep.subr.bf16.mxu1 %v8719_v35  ;;  %v8807_v46 = vld [vmem:[%s11732_s1 + $0x1724] ss:$16 sps:$4 sm:$0xff]   ;;  %v8810_v35 = vld [vmem:[%s11732_s1 + $0x172c] ss:$16 sps:$4 sm:$0xff]  }
 0x2ab   :  { %5487 = vmatpush1.bf16.msra.mxu0 %v8714_v50  ;;  %6020 = vmatpush1.bf16.msra.mxu1 %v8717_v53  ;;  %v8805_v50 = vld [vmem:[%s11732_s1 + $0x1720] ss:$16 sps:$4 sm:$0xff]   ;;  %v8808_v53 = vld [vmem:[%s11732_s1 + $0x1728] ss:$16 sps:$4 sm:$0xff]  }
 0x2ac   :  { %5488 = vmatprep.subr.bf16.mxu0 %v8722_v38  ;;  %6021 = vmatprep.subr.bf16.mxu1 %v8725_v54  ;;  %v8813_v38 = vld [vmem:[%s11732_s1 + $0x1744] ss:$16 sps:$4 sm:$0xff]   ;;  %v8816_v54 = vld [vmem:[%s11732_s1 + $0x174c] ss:$16 sps:$4 sm:$0xff]  }
 0x2af   :  { %5489 = vmatpush1.bf16.msra.mxu0 %v8720_v55  ;;  %6022 = vmatpush1.bf16.msra.mxu1 %v8723_v56  ;;  %v8811_v55 = vld [vmem:[%s11732_s1 + $0x1740] ss:$16 sps:$4 sm:$0xff]   ;;  %v8814_v56 = vld [vmem:[%s11732_s1 + $0x1748] ss:$16 sps:$4 sm:$0xff]  }
 0x2b0   :  { %5490 = vmatprep.subr.bf16.mxu0 %v8728_v47  ;;  %6023 = vmatprep.subr.bf16.mxu1 %v8731_v57  ;;  %v8819_v47 = vld [vmem:[%s11732_s1 + $0x1764] ss:$16 sps:$4 sm:$0xff]   ;;  %v8822_v57 = vld [vmem:[%s11732_s1 + $0x176c] ss:$16 sps:$4 sm:$0xff]  }
 0x2b3   :  { %5491 = vmatpush1.bf16.msra.mxu0 %v8726_v58  ;;  %6024 = vmatpush1.bf16.msra.mxu1 %v8729_v59  ;;  %v8817_v58 = vld [vmem:[%s11732_s1 + $0x1760] ss:$16 sps:$4 sm:$0xff]   ;;  %v8820_v59 = vld [vmem:[%s11732_s1 + $0x1768] ss:$16 sps:$4 sm:$0xff]  }
 0x2b4   :  { %5492 = vmatprep.subr.bf16.mxu0 %v8734_v48  ;;  %6025 = vmatprep.subr.bf16.mxu1 %v8737_v61  ;;  %v8825_v48 = vld [vmem:[%s11732_s1 + $0x1784] ss:$16 sps:$4 sm:$0xff]   ;;  %v8828_v61 = vld [vmem:[%s11732_s1 + $0x178c] ss:$16 sps:$4 sm:$0xff]  }
 0x2b7   :  { %5493 = vmatpush1.bf16.msra.mxu0 %v8732_v63  ;;  %6026 = vmatpush1.bf16.msra.mxu1 %v8735_v44  ;;  %v8823_v63 = vld [vmem:[%s11732_s1 + $0x1780] ss:$16 sps:$4 sm:$0xff]   ;;  %v8826_v44 = vld [vmem:[%s11732_s1 + $0x1788] ss:$16 sps:$4 sm:$0xff]  }
 0x2b8   :  { %5494 = vmatprep.subr.bf16.mxu0 %v8740_v1  ;;  %6027 = vmatprep.subr.bf16.mxu1 %v8743_v51  ;;  %v8831_v1 = vld [vmem:[%s11732_s1 + $0x17a4] ss:$16 sps:$4 sm:$0xff]   ;;  %v8834_v51 = vld [vmem:[%s11732_s1 + $0x17ac] ss:$16 sps:$4 sm:$0xff]  }
 0x2bb   :  { %5495 = vmatpush1.bf16.msra.mxu0 %v8738_v2  ;;  %6028 = vmatpush1.bf16.msra.mxu1 %v8741_v3  ;;  %v8829_v2 = vld [vmem:[%s11732_s1 + $0x17a0] ss:$16 sps:$4 sm:$0xff]   ;;  %v8832_v3 = vld [vmem:[%s11732_s1 + $0x17a8] ss:$16 sps:$4 sm:$0xff]  }
 0x2bc   :  { %5496 = vmatprep.subr.bf16.mxu0 %v8746_v4  ;;  %6029 = vmatprep.subr.bf16.mxu1 %v8749_v60  ;;  %v8837_v4 = vld [vmem:[%s11732_s1 + $0x17c4] ss:$16 sps:$4 sm:$0xff]   ;;  %v8840_v60 = vld [vmem:[%s11732_s1 + $0x17cc] ss:$16 sps:$4 sm:$0xff]  }
 0x2bf   :  { %5497 = vmatpush1.bf16.msra.mxu0 %v8744_v5  ;;  %6030 = vmatpush1.bf16.msra.mxu1 %v8747_v6  ;;  %v8835_v5 = vld [vmem:[%s11732_s1 + $0x17c0] ss:$16 sps:$4 sm:$0xff]   ;;  %v8838_v6 = vld [vmem:[%s11732_s1 + $0x17c8] ss:$16 sps:$4 sm:$0xff]  }
 0x2c0   :  { %5507 = vmatprep.subr.bf16.mxu0 %v8753_v7  ;;  %6040 = vmatprep.subr.bf16.mxu1 %v8756_v62  ;;  %v8843_v7 = vld [vmem:[%s11732_s1 + $0x17e4] ss:$16 sps:$4 sm:$0xff]   ;;  %v8846_v62 = vld [vmem:[%s11732_s1 + $0x17ec] ss:$16 sps:$4 sm:$0xff]  }
 0x2c2   :  { %5499 = vmatmul.mubr.bf16.vlgmr.msra.gmra.mrb[0].mxu0 %v11271_v9  ;;  %6032 = vmatmul.mubr.bf16.vlgmr.msra.gmra.mrb[0].mxu1 %v11271_v9 }
 0x2c3   :  { %5508 = vmatpush1.bf16.msra.mxu0 %v8751_v10  ;;  %6041 = vmatpush1.bf16.msra.mxu1 %v8754_v11  ;;  %v8841_v10 = vld [vmem:[%s11732_s1 + $0x17e0] ss:$16 sps:$4 sm:$0xff]   ;;  %v8844_v11 = vld [vmem:[%s11732_s1 + $0x17e8] ss:$16 sps:$4 sm:$0xff]  }
 0x2c4   :  { %5509 = vmatprep.subr.bf16.mxu0 %v8759_v12  ;;  %6042 = vmatprep.subr.bf16.mxu1 %v8762_v0  ;;  %v8849_v12 = vld [vmem:[%s11732_s1 + $0x1804] ss:$16 sps:$4 sm:$0xff]   ;;  %v8852_v0 = vld [vmem:[%s11732_s1 + $0x180c] ss:$16 sps:$4 sm:$0xff]  }
 0x2c5   :  { %5539 = vmatprep.mubr.bf16.mxu0 %v1016_v52  ;;  %6072 = vmatprep.mubr.bf16.mxu1 %v1016_v52  ;;  %v1014_v52 = vcombine.high %v11271_v9, %v11271_v9  ;;  %v8858_v9 = vld [vmem:[%s11732_s1 + $0x182c] ss:$16 sps:$4 sm:$0xff]  }
 0x2c7   :  { %5510 = vmatpush1.bf16.msra.mxu0 %v8757_v15  ;;  %6043 = vmatpush1.bf16.msra.mxu1 %v8760_v16  ;;  %v8847_v15 = vld [vmem:[%s11732_s1 + $0x1800] ss:$16 sps:$4 sm:$0xff]   ;;  %v8850_v16 = vld [vmem:[%s11732_s1 + $0x1808] ss:$16 sps:$4 sm:$0xff]  }
 0x2c8   :  { %5511 = vmatprep.subr.bf16.mxu0 %v8765_v8  ;;  %6044 = vmatprep.subr.bf16.mxu1 %v8768_v17  ;;  %v8855_v8 = vld [vmem:[%s11732_s1 + $0x1824] ss:$16 sps:$4 sm:$0xff]   ;;  %v8853_v17 = vld [vmem:[%s11732_s1 + $0x1820] ss:$16 sps:$4 sm:$0xff]  }
 0x2cb   :  { %5512 = vmatpush1.bf16.msra.mxu0 %v8763_v18  ;;  %6045 = vmatpush1.bf16.msra.mxu1 %v8766_v19  ;;  %v8856_v18 = vld [vmem:[%s11732_s1 + $0x1828] ss:$16 sps:$4 sm:$0xff]   ;;  %v8861_v19 = vld [vmem:[%s11732_s1 + $0x1844] ss:$16 sps:$4 sm:$0xff]  }
 0x2cc   :  { %5513 = vmatprep.subr.bf16.mxu0 %v8771_v20  ;;  %6046 = vmatprep.subr.bf16.mxu1 %v8774_v22  ;;  %v8864_v20 = vld [vmem:[%s11732_s1 + $0x184c] ss:$16 sps:$4 sm:$0xff]   ;;  %v8962_v22 = vmov 0  }
 0x2cf   :  { %5514 = vmatpush1.bf16.msra.mxu0 %v8769_v23  ;;  %6047 = vmatpush1.bf16.msra.mxu1 %v8772_v24  ;;  %v8859_v23 = vld [vmem:[%s11732_s1 + $0x1840] ss:$16 sps:$4 sm:$0xff]   ;;  %v8862_v24 = vld [vmem:[%s11732_s1 + $0x1848] ss:$16 sps:$4 sm:$0xff]  }
 0x2d0   :  { %5515 = vmatprep.subr.bf16.mxu0 %v8777_v13  ;;  %6048 = vmatprep.subr.bf16.mxu1 %v8780_v27  ;;  %v8867_v13 = vld [vmem:[%s11732_s1 + $0x1864] ss:$16 sps:$4 sm:$0xff]   ;;  %v8870_v27 = vld [vmem:[%s11732_s1 + $0x186c] ss:$16 sps:$4 sm:$0xff]  }
 0x2d3   :  { %5516 = vmatpush1.bf16.msra.mxu0 %v8775_v28  ;;  %6049 = vmatpush1.bf16.msra.mxu1 %v8778_v29  ;;  %v8865_v28 = vld [vmem:[%s11732_s1 + $0x1860] ss:$16 sps:$4 sm:$0xff]   ;;  %v8868_v29 = vld [vmem:[%s11732_s1 + $0x1868] ss:$16 sps:$4 sm:$0xff]  }
 0x2d4   :  { %5517 = vmatprep.subr.bf16.mxu0 %v8783_v14  ;;  %6050 = vmatprep.subr.bf16.mxu1 %v8786_v30  ;;  %v8873_v14 = vld [vmem:[%s11732_s1 + $0x1884] ss:$16 sps:$4 sm:$0xff]   ;;  %v8876_v30 = vld [vmem:[%s11732_s1 + $0x188c] ss:$16 sps:$4 sm:$0xff]  }
 0x2d7   :  { %5518 = vmatpush1.bf16.msra.mxu0 %v8781_v31  ;;  %6051 = vmatpush1.bf16.msra.mxu1 %v8784_v25  ;;  %v8871_v31 = vld [vmem:[%s11732_s1 + $0x1880] ss:$16 sps:$4 sm:$0xff]   ;;  %v8874_v25 = vld [vmem:[%s11732_s1 + $0x1888] ss:$16 sps:$4 sm:$0xff]  }
 0x2d8   :  { %5519 = vmatprep.subr.bf16.mxu0 %v8789_v32  ;;  %6052 = vmatprep.subr.bf16.mxu1 %v8792_v33  ;;  %v8879_v32 = vld [vmem:[%s11732_s1 + $0x18a4] ss:$16 sps:$4 sm:$0xff]   ;;  %v8882_v33 = vld [vmem:[%s11732_s1 + $0x18ac] ss:$16 sps:$4 sm:$0xff]  }
 0x2db   :  { %5520 = vmatpush1.bf16.msra.mxu0 %v8787_v26  ;;  %6053 = vmatpush1.bf16.msra.mxu1 %v8790_v36  ;;  %v8877_v26 = vld [vmem:[%s11732_s1 + $0x18a0] ss:$16 sps:$4 sm:$0xff]   ;;  %v8880_v36 = vld [vmem:[%s11732_s1 + $0x18a8] ss:$16 sps:$4 sm:$0xff]  }
 0x2dc   :  { %5521 = vmatprep.subr.bf16.mxu0 %v8795_v37  ;;  %6054 = vmatprep.subr.bf16.mxu1 %v8798_v21  ;;  %v8885_v37 = vld [vmem:[%s11732_s1 + $0x18c4] ss:$16 sps:$4 sm:$0xff]   ;;  %v8888_v21 = vld [vmem:[%s11732_s1 + $0x18cc] ss:$16 sps:$4 sm:$0xff]  }
 0x2df   :  { %5522 = vmatpush1.bf16.msra.mxu0 %v8793_v39  ;;  %6055 = vmatpush1.bf16.msra.mxu1 %v8796_v40  ;;  %v8883_v39 = vld [vmem:[%s11732_s1 + $0x18c0] ss:$16 sps:$4 sm:$0xff]   ;;  %v8886_v40 = vld [vmem:[%s11732_s1 + $0x18c8] ss:$16 sps:$4 sm:$0xff]  }
 0x2e0   :  { %5523 = vmatprep.subr.bf16.mxu0 %v8801_v41  ;;  %6056 = vmatprep.subr.bf16.mxu1 %v8804_v34  ;;  %v8891_v41 = vld [vmem:[%s11732_s1 + $0x18e4] ss:$16 sps:$4 sm:$0xff]   ;;  %v8894_v34 = vld [vmem:[%s11732_s1 + $0x18ec] ss:$16 sps:$4 sm:$0xff]  }
 0x2e3   :  { %5524 = vmatpush1.bf16.msra.mxu0 %v8799_v43  ;;  %6057 = vmatpush1.bf16.msra.mxu1 %v8802_v45  ;;  %v8889_v43 = vld [vmem:[%s11732_s1 + $0x18e0] ss:$16 sps:$4 sm:$0xff]   ;;  %v8892_v45 = vld [vmem:[%s11732_s1 + $0x18e8] ss:$16 sps:$4 sm:$0xff]  }
 0x2e4   :  { %5525 = vmatprep.subr.bf16.mxu0 %v8807_v46  ;;  %6058 = vmatprep.subr.bf16.mxu1 %v8810_v35  ;;  %v6669_v46 = vld.sshfl [vmem:[%s11731_s0 + $0x18] sm:$0x1 pattern:$0x75316420]  ;;  %v8895_v35 = vld [vmem:[%s11736_s5 + $0x40] sm:$0xff]  }
 0x2e7   :  { %5526 = vmatpush1.bf16.msra.mxu0 %v8805_v50  ;;  %6059 = vmatpush1.bf16.msra.mxu1 %v8808_v53  ;;  %v8896_v50 = vld [vmem:[%s11736_s5 + $0xc0] sm:$0xff]   ;;  %v1030_v53 = vrot.slane %v6669_v46, %v9161_v49  ;;  %v8900_v49 = vld [vmem:[%s11736_s5 + $0xc8] sm:$0xff]  }
 0x2e8   :  { %5527 = vmatprep.subr.bf16.mxu0 %v8813_v38  ;;  %6060 = vmatprep.subr.bf16.mxu1 %v8816_v54  ;;  %v8897_v38 = vld [vmem:[%s11736_s5] sm:$0xff]  }
 0x2e9   :  { %v8898_v54 = vld [vmem:[%s11736_s5 + $0x80] sm:$0xff]  }
 0x2eb   :  { %5528 = vmatpush1.bf16.msra.mxu0 %v8811_v55  ;;  %6061 = vmatpush1.bf16.msra.mxu1 %v8814_v56  ;;  %v8899_v55 = vld [vmem:[%s11736_s5 + $0x48] sm:$0xff]  }
 0x2ec   :  { %5529 = vmatprep.subr.bf16.mxu0 %v8819_v47  ;;  %6062 = vmatprep.subr.bf16.mxu1 %v8822_v57  ;;  %v8901_v56 = vld [vmem:[%s11736_s5 + $0x8] sm:$0xff]   ;;  %v8903_v57 = vld [vmem:[%s11736_s5 + $0x50] sm:$0xff]  }
 0x2ed   :  { %v8902_v47 = vld [vmem:[%s11736_s5 + $0x88] sm:$0xff]  }
 0x2ef   :  { %5530 = vmatpush1.bf16.msra.mxu0 %v8817_v58  ;;  %6063 = vmatpush1.bf16.msra.mxu1 %v8820_v59  ;;  %v8904_v58 = vld [vmem:[%s11736_s5 + $0xd0] sm:$0xff]  }
 0x2f0   :  { %5531 = vmatprep.subr.bf16.mxu0 %v8825_v48  ;;  %6064 = vmatprep.subr.bf16.mxu1 %v8828_v61  ;;  %v8905_v59 = vld [vmem:[%s11736_s5 + $0x10] sm:$0xff]   ;;  %v8907_v61 = vld [vmem:[%s11736_s5 + $0x58] sm:$0xff]  }
 0x2f1   :  { %v8906_v48 = vld [vmem:[%s11736_s5 + $0x90] sm:$0xff]  }
 0x2f3   :  { %5532 = vmatpush1.bf16.msra.mxu0 %v8823_v63  ;;  %6065 = vmatpush1.bf16.msra.mxu1 %v8826_v44  ;;  %v8908_v63 = vld [vmem:[%s11736_s5 + $0xd8] sm:$0xff]  }
 0x2f4   :  { %5533 = vmatprep.subr.bf16.mxu0 %v8831_v1  ;;  %6066 = vmatprep.subr.bf16.mxu1 %v8834_v51  ;;  %v8909_v44 = vld [vmem:[%s11736_s5 + $0x18] sm:$0xff]   ;;  %v8911_v51 = vld [vmem:[%s11736_s5 + $0x60] sm:$0xff]  }
 0x2f5   :  { %v8910_v1 = vld [vmem:[%s11736_s5 + $0x98] sm:$0xff]  }
 0x2f7   :  { %5534 = vmatpush1.bf16.msra.mxu0 %v8829_v2  ;;  %6067 = vmatpush1.bf16.msra.mxu1 %v8832_v3  ;;  %v8912_v2 = vld [vmem:[%s11736_s5 + $0xe0] sm:$0xff]  }
 0x2f8   :  { %5535 = vmatprep.subr.bf16.mxu0 %v8837_v4  ;;  %6068 = vmatprep.subr.bf16.mxu1 %v8840_v60  ;;  %v8913_v3 = vld [vmem:[%s11736_s5 + $0x20] sm:$0xff]   ;;  %v8915_v60 = vld [vmem:[%s11736_s5 + $0x68] sm:$0xff]  }
 0x2f9   :  { %v8914_v4 = vld [vmem:[%s11736_s5 + $0xa0] sm:$0xff]  }
 0x2fb   :  { %5536 = vmatpush1.bf16.msra.mxu0 %v8835_v5  ;;  %6069 = vmatpush1.bf16.msra.mxu1 %v8838_v6  ;;  %v8916_v5 = vld [vmem:[%s11736_s5 + $0xe8] sm:$0xff]  }
 0x2fc   :  { %5537 = vmatprep.subr.bf16.mxu0 %v8843_v7  ;;  %6070 = vmatprep.subr.bf16.mxu1 %v8846_v62  ;;  %v8917_v6 = vld [vmem:[%s11736_s5 + $0x28] sm:$0xff]   ;;  %v8919_v62 = vld [vmem:[%s11736_s5 + $0x70] sm:$0xff]  }
 0x2fd   :  { %v8918_v7 = vld [vmem:[%s11736_s5 + $0xa8] sm:$0xff]  }
 0x2ff   :  { %5538 = vmatpush1.bf16.msra.mxu0 %v8841_v10  ;;  %6071 = vmatpush1.bf16.msra.mxu1 %v8844_v11  ;;  %v8920_v10 = vld [vmem:[%s11736_s5 + $0xf0] sm:$0xff]  }
 0x300   :  { %5548 = vmatprep.subr.bf16.mxu0 %v8849_v12  ;;  %6081 = vmatprep.subr.bf16.mxu1 %v8852_v0  ;;  %v8921_v11 = vld [vmem:[%s11736_s5 + $0x30] sm:$0xff]   ;;  %v8923_v0 = vld [vmem:[%s11736_s5 + $0x78] sm:$0xff]  }
 0x301   :  { %v8922_v12 = vld [vmem:[%s11736_s5 + $0xb0] sm:$0xff]  }
 0x302   :  { %5540 = vmatmul.mubr.bf16.vlgmr.msra.gmra.mrb[0].mxu0 %v1014_v52  ;;  %6073 = vmatmul.mubr.bf16.vlgmr.msra.gmra.mrb[0].mxu1 %v1014_v52  ;;  %v8924_v52 = vld [vmem:[%s11736_s5 + $0xf8] sm:$0xff]  }
 0x303   :  { %5549 = vmatpush1.bf16.msra.mxu0 %v8847_v15  ;;  %6082 = vmatpush1.bf16.msra.mxu1 %v8850_v16  ;;  %v8925_v15 = vld [vmem:[%s11736_s5 + $0x38] sm:$0xff]  }
 0x304   :  { %5550 = vmatprep.subr.bf16.mxu0 %v8855_v8  ;;  %6083 = vmatprep.subr.bf16.mxu1 %v8858_v9  ;;  %v8926_v16 = vld [vmem:[%s11736_s5 + $0xb8] sm:$0xff]   ;;  %v8963_v8 = vmov 0.0   ;;  %v848_v9 = vsub.s32 0, %v9143_v42 }
 0x305   :  { %5580 = vmatprep.mubr.bf16.mxu0 %v8962_v22  ;;  %6113 = vmatprep.mubr.bf16.mxu1 %v8962_v22 }
 0x307   :  { %5551 = vmatpush1.bf16.msra.mxu0 %v8853_v17  ;;  %6084 = vmatpush1.bf16.msra.mxu1 %v8856_v18  ;;  %v856_v17 = vsub.s32 2, %v9143_v42  ;;  %v844_v18 = vld [vmem:[%s11733_s2] sm:$0xf] }
 0x308   :  { %5552 = vmatprep.subr.bf16.mxu0 %v8861_v19  ;;  %6085 = vmatprep.subr.bf16.mxu1 %v8864_v20  ;;  %v852_v19 = vsub.s32 1, %v9143_v42  ;;  %v860_v20 = vsub.s32 3, %v9143_v42  ;;  %v849_v22 = vrot.slane %v844_v18, %v848_v9 }
 0x30b   :  { %5553 = vmatpush1.bf16.msra.mxu0 %v8859_v23  ;;  %6086 = vmatpush1.bf16.msra.mxu1 %v8862_v24  ;;  %v857_v23 = vrot.slane %v844_v18, %v856_v17  ;;  %v6126_v24 = vld [vmem:[%s11734_s3] sm:$0xf] }
 0x30c   :  { %5554 = vmatprep.subr.bf16.mxu0 %v8867_v13  ;;  %6087 = vmatprep.subr.bf16.mxu1 %v8870_v27  ;;  %v853_v13 = vrot.slane %v844_v18, %v852_v19  ;;  %v861_v27 = vrot.slane %v844_v18, %v860_v20 }
 0x30f   :  { %5555 = vmatpush1.bf16.msra.mxu0 %v8865_v28  ;;  %6088 = vmatpush1.bf16.msra.mxu1 %v8868_v29  ;;  %v6152_v29 = vld [vmem:[%s11735_s4] sm:$0xf] }
 0x310   :  { %5556 = vmatprep.subr.bf16.mxu0 %v8873_v14  ;;  %6089 = vmatprep.subr.bf16.mxu1 %v8876_v30 }
 0x313   :  { %5557 = vmatpush1.bf16.msra.mxu0 %v8871_v31  ;;  %6090 = vmatpush1.bf16.msra.mxu1 %v8874_v25  ;;  %v6131_v31 = vrot.slane %v6126_v24, %v848_v9 }
 0x314   :  { %5558 = vmatprep.subr.bf16.mxu0 %v8879_v32  ;;  %6091 = vmatprep.subr.bf16.mxu1 %v8882_v33  ;;  %v6139_v32 = vrot.slane %v6126_v24, %v856_v17 }
 0x317   :  { %5559 = vmatpush1.bf16.msra.mxu0 %v8877_v26  ;;  %6092 = vmatpush1.bf16.msra.mxu1 %v8880_v36  ;;  %v6135_v36 = vrot.slane %v6126_v24, %v852_v19 }
 0x318   :  { %5560 = vmatprep.subr.bf16.mxu0 %v8885_v37  ;;  %6093 = vmatprep.subr.bf16.mxu1 %v8888_v21  ;;  %v6143_v21 = vrot.slane %v6126_v24, %v860_v20 }
 0x31b   :  { %5561 = vmatpush1.bf16.msra.mxu0 %v8883_v39  ;;  %6094 = vmatpush1.bf16.msra.mxu1 %v8886_v40 }
 0x31c   :  { %5562 = vmatprep.subr.bf16.mxu0 %v8891_v41  ;;  %6095 = vmatprep.subr.bf16.mxu1 %v8894_v34  ;;  %v6157_v34 = vrot.slane %v6152_v29, %v848_v9 }
 0x31f   :  { %5563 = vmatpush1.bf16.msra.mxu0 %v8889_v43  ;;  %6096 = vmatpush1.bf16.msra.mxu1 %v8892_v45  ;;  %v6165_v45 = vrot.slane %v6152_v29, %v856_v17 }
 0x320   :  { %7514 = vmatprep.subr.bf16.mxu0 %v8895_v35  ;;  %7536 = vmatprep.subr.bf16.mxu1 %v8896_v50 }
 0x322   :  { %5581 = vmatmul.mubr.bf16.vlgmr.msra.gmra.mrb[0].mxu0 %v1030_v53  ;;  %6114 = vmatmul.mubr.bf16.vlgmr.msra.gmra.mrb[0].mxu1 %v1030_v53 }
 0x323   :  { %7515 = vmatpush3.bf16.msra.mxu0 %v8897_v38  ;;  %7537 = vmatpush3.bf16.msra.mxu1 %v8898_v54  ;;  %v6161_v38 = vrot.slane %v6152_v29, %v852_v19  ;;  %v6169_v54 = vrot.slane %v6152_v29, %v860_v20 }
 0x324   :  { %7516 = vmatprep.subr.bf16.mxu0 %v8899_v55  ;;  %7538 = vmatprep.subr.bf16.mxu1 %v8900_v49 }
 0x327   :  { %7517 = vmatpush3.bf16.msra.mxu0 %v8901_v56  ;;  %7539 = vmatpush3.bf16.msra.mxu1 %v8902_v47 }
 0x328   :  { %7518 = vmatprep.subr.bf16.mxu0 %v8903_v57  ;;  %7540 = vmatprep.subr.bf16.mxu1 %v8904_v58 }
 0x32b   :  { %7519 = vmatpush3.bf16.msra.mxu0 %v8905_v59  ;;  %7541 = vmatpush3.bf16.msra.mxu1 %v8906_v48 }
 0x32c   :  { %7520 = vmatprep.subr.bf16.mxu0 %v8907_v61  ;;  %7542 = vmatprep.subr.bf16.mxu1 %v8908_v63 }
 0x32f   :  { %7521 = vmatpush3.bf16.msra.mxu0 %v8909_v44  ;;  %7543 = vmatpush3.bf16.msra.mxu1 %v8910_v1  ;;  %v8927_v44 = vld [vmem:[%s11740_s9] sm:$0xff]  }
 0x330   :  { %7522 = vmatprep.subr.bf16.mxu0 %v8911_v51  ;;  %7544 = vmatprep.subr.bf16.mxu1 %v8912_v2  ;;  %v8928_v2 = vld [vmem:[%s11740_s9 + $0x8] sm:$0xff]  }
 0x333   :  { %7523 = vmatpush3.bf16.msra.mxu0 %v8913_v3  ;;  %7545 = vmatpush3.bf16.msra.mxu1 %v8914_v4  ;;  %v8929_v3 = vld [vmem:[%s11740_s9 + $0x10] sm:$0xff]   ;;  %v8930_v4 = vld [vmem:[%s11740_s9 + $0x18] sm:$0xff]  }
 0x334   :  { %7524 = vmatprep.subr.bf16.mxu0 %v8915_v60  ;;  %7546 = vmatprep.subr.bf16.mxu1 %v8916_v5  ;;  %v8931_v60 = vld [vmem:[%s11740_s9 + $0x20] sm:$0xff]   ;;  %v8932_v5 = vld [vmem:[%s11740_s9 + $0x28] sm:$0xff]  }
 0x337   :  { %7525 = vmatpush3.bf16.msra.mxu0 %v8917_v6  ;;  %7547 = vmatpush3.bf16.msra.mxu1 %v8918_v7  ;;  %v8933_v6 = vld [vmem:[%s11740_s9 + $0x30] sm:$0xff]   ;;  %v8934_v7 = vld [vmem:[%s11740_s9 + $0x38] sm:$0xff]  }
 0x338   :  { %7526 = vmatprep.subr.bf16.mxu0 %v8919_v62  ;;  %7548 = vmatprep.subr.bf16.mxu1 %v8920_v10 }
 0x33b   :  { %7527 = vmatpush3.bf16.msra.mxu0 %v8921_v11  ;;  %7549 = vmatpush3.bf16.msra.mxu1 %v8922_v12  ;;  %v7470_v11 = vld [vmem:[%s11737_s6] ss:$0 sm:$0xff] }
 0x33c   :  { %7528 = vmatprep.subr.bf16.mxu0 %v8923_v0  ;;  %7550 = vmatprep.subr.bf16.mxu1 %v8924_v52 }
 0x33f   :  { %7529 = vmatpush3.bf16.msra.mxu0 %v8925_v15  ;;  %7551 = vmatpush3.bf16.msra.mxu1 %v8926_v16 }
 0x340   :  { %7567 = vmatprep.subr.bf16.mxu0 %v8963_v8 }
 0x3f5   :  { %v5582_v28 = vpop.f32.mrb[0].mxu0  ;;  %v6115_v14 = vpop.f32.mrb[0].mxu1 }
 0x3f6   :  { %v7587_v30 = vadd.f32 %v5582_v28, %v849_v22  ;;  %v7589_v25 = vadd.f32 %v6115_v14, %v857_v23  ;;  %v5584_v33 = vpop.f32.mrb[1].mxu0  ;;  %v6117_v42 = vpop.f32.mrb[1].mxu1  ;;  %v7504_v23 = vld [vmem:[%s11739_s8] ss:$0 sm:$0xff] }
 0x3f7   :  { %v7588_v26 = vadd.f32 %v5584_v33, %v853_v13  ;;  %v7590_v37 = vadd.f32 %v6117_v42, %v861_v27  ;;  %v5586_v39 = vpop.f32.mrb[2].mxu0  ;;  %v6119_v40 = vpop.f32.mrb[2].mxu1  ;;  %v7505_v28 = vld [vmem:[%s11741_s10] ss:$0 sm:$0xff] }
 0x3f8   :  { %v6122_v41 = vmax.f32 %v7587_v30, 0.0  ;;  %v6124_v43 = vmax.f32 %v7589_v25, 0.0  ;;  %v5587_v46 = vpop.f32.mrb[3].mxu0  ;;  %v6120_v35 = vpop.f32.mrb[3].mxu1 }
 0x3f9   :  { %v6123_v50 = vmax.f32 %v7588_v26, 0.0  ;;  %v6125_v53 = vmax.f32 %v7590_v37, 0.0 }
 0x3fa   :  { %v6148_v55 = vmul.f32 %v6131_v31, %v6122_v41  ;;  %v6150_v49 = vmul.f32 %v6139_v32, %v6124_v43 }
 0x3fb   :  { %v6149_v56 = vmul.f32 %v6135_v36, %v6123_v50  ;;  %v6151_v47 = vmul.f32 %v6143_v21, %v6125_v53 }
 0x3fc   :  { %v6174_v57 = vadd.f32 %v6157_v34, %v6148_v55  ;;  %v6176_v58 = vadd.f32 %v6165_v45, %v6150_v49 }
 0x3fd   :  { %v6175_v59 = vadd.f32 %v6161_v38, %v6149_v56  ;;  %v6177_v48 = vadd.f32 %v6169_v54, %v6151_v47 }
 0x3fe   :  { %v6178_v1 = vpack.c.bf16 %v6174_v57, %v6174_v57  ;;  %v6180_v51 = vpack.c.bf16 %v6176_v58, %v6176_v58 }
 0x3ff   :  { %v6179_v61 = vpack.c.bf16 %v6175_v59, %v6175_v59  ;;  %v6181_v63 = vpack.c.bf16 %v6177_v48, %v6177_v48 }
 0x401   :  { %6477 = vmatprep.mubr.bf16.mxu0 %v6179_v61  ;;  %6517 = vmatprep.mubr.bf16.mxu1 %v6181_v63 }
 0x402   :  { %6478 = vmatmul.mubr.bf16.vlgmr.msra.gmra.mrb[4].mxu0 %v6178_v1  ;;  %6518 = vmatmul.mubr.bf16.vlgmr.msra.gmra.mrb[4].mxu1 %v6180_v51 }
 0x403   :  { %7568 = vmatpush3.bf16.msra.mxu0 %v8927_v44  ;;  %7583 = vmatprep.mubr.msk.bf16.mxu0 %vm8964_vm0, %v8963_v8 }
 0x404   :  { %7569 = vmatprep.subr.bf16.mxu0 %v8963_v8 }
 0x407   :  { %7570 = vmatpush3.bf16.msra.mxu0 %v8928_v2 }
 0x408   :  { %7571 = vmatprep.subr.bf16.mxu0 %v8963_v8 }
 0x40b   :  { %7572 = vmatpush3.bf16.msra.mxu0 %v8929_v3 }
 0x40c   :  { %7573 = vmatprep.subr.bf16.mxu0 %v8963_v8 }
 0x40f   :  { %7574 = vmatpush3.bf16.msra.mxu0 %v8930_v4 }
 0x410   :  { %7575 = vmatprep.subr.bf16.mxu0 %v8963_v8 }
 0x413   :  { %7576 = vmatpush3.bf16.msra.mxu0 %v8931_v60 }
 0x414   :  { %7577 = vmatprep.subr.bf16.mxu0 %v8963_v8 }
 0x417   :  { %7578 = vmatpush3.bf16.msra.mxu0 %v8932_v5 }
 0x418   :  { %7579 = vmatprep.subr.bf16.mxu0 %v8963_v8 }
 0x41b   :  { %7580 = vmatpush3.bf16.msra.mxu0 %v8933_v6 }
 0x41c   :  { %7581 = vmatprep.subr.bf16.mxu0 %v8963_v8  ;;  %v7503_v8 = vld [vmem:[%s11738_s7] ss:$0 sm:$0xff]  ;;  %s8937_s7 = scalar_lea.vmem %s6662_s16, 32 }
 0x41d   :  { %p8938_p0 = scmp.ne.s32.totalorder %s6662_s16, %s8937_s7  ;;  %p8943_p2 = scmp.lt.s32.totalorder %s8937_s7, %s8937_s7 }
 0x41f   :  { %7582 = vmatpush3.bf16.msra.mxu0 %v8934_v7  ;;  %p8944_p3 = por %p8943_p2, %p8942_p1 }
 0x421   :  { %p8945_p4 = pnand %p8944_p3, %p8938_p0 }
 0x4d5   :  { %v7530_v62 = vpop.f32.mrb[4].mxu0  ;;  %v7552_v10 = vpop.f32.mrb[4].mxu1 }
 0x4d6   :  { %v7531_v12 = vpop.f32.mrb[5].mxu0  ;;  %v7553_v0 = vpop.f32.mrb[5].mxu1 }
 0x4d7   :  { %v7532_v52 = vadd.f32 %v7531_v12, %v7530_v62  ;;  %v7554_v15 = vadd.f32 %v7553_v0, %v7552_v10  ;;  %v7533_v16 = vpop.f32.mrb[6].mxu0  ;;  %v7555_v9 = vpop.f32.mrb[6].mxu1 }
 0x4d8   :  { %v7534_v17 = vpop.f32.mrb[7].mxu0  ;;  %v7556_v18 = vpop.f32.mrb[7].mxu1 }
 0x4d9   :  { %v6480_v19 = vadd.f32 %v7532_v52, %v7470_v11 }
 0x4db   :  { %v6520_v20 = vadd.f32 %v7554_v15, %v6480_v19 }
 0x4dd   :  { %v6525_v22 = vmax.f32 %v6520_v20, 0.0 }
 0x4df   :  { %v6533_v24 = vmul.f32 %v7503_v8, %v6525_v22 }
 0x4e1   :  { %v6541_v13 = vadd.f32 %v7504_v23, %v6533_v24 }
 0x4e3   :  { %v6542_v27 = vpack.c.bf16 %v6541_v13, %v6541_v13 }
 0x4e5   :  { %7584 = vmatmul.mubr.bf16.vlgmr.msra.gmra.mrb[8].mxu0 %v6542_v27 }
 0x5b8   :  { %v6648_v29 = vpop.f32.mrb[8].mxu0 }
 0x5b9   :  { %v6649_v14 = vadd.f32 %v7505_v28, %v6648_v29  ;;  %v7585_v30 = vpop.f32.mrb[9].mxu0 }
 0x5ba   :  { %v6651_v31 = vpop.f32.mrb[10].mxu0 }
 0x5bb   :  { %6654 = vst [vmem:[#allocation2] sm:$0x3] %v6649_v14  ;;  %v7586_v25 = vpop.f32.mrb[11].mxu0 }
 0x5bc   :  { %8948 = shalt.err (!%p8945_p4)
}
 0x5bd   :  { %s8949_s10 = scalar_lea.hbm %s11742_s11, 32 }
 0x5be   :  { %p8950_p5 = scmp.ne.s32.totalorder %s11742_s11, %s8949_s10  ;;  %p8953_p6 = scmp.lt.u32.totalorder %s8949_s10, %s11742_s11 }
 0x5c0   :  { %p8955_p7 = pnand %p8953_p6, %p8950_p5 }
 0x5c2   :  { %8958 = shalt.err (!%p8955_p7)
}
 0x5c3   :  { %6664 = dma.vmem_to_hbm [thread:$0]  %s6662_s16, 32, %s11742_s11, [#allocation3]  }
 0x5c4   :  { %8959 = dma.done.wait [#allocation3], 32  }
 0x5c5   :  { %8960 = vsyncadd [#allocation3], 4294967264 }
 0x5c6   :  { %6668 = vsyncpa [#allocation3], 1 }

</bundles_post_ra>
